<compile_context>
chip_gen: v5e
topology: v5e:2x2
jax: 0.10.0
libtpu: 0.0.40
codegen_flags: <defaults>
</compile_context>

<pallas_src>
import functools
import math

import jax
import jax.numpy as jnp
from jax import lax
from jax.experimental import pallas as pl
from jax.experimental.pallas import tpu as pltpu


# ----------------------------- in-kernel helpers -----------------------------

def _layernorm(x, w, b, eps=1e-5):
    mu = jnp.mean(x, axis=-1, keepdims=True)
    xc = x - mu
    var = jnp.mean(xc * xc, axis=-1, keepdims=True)
    return xc * lax.rsqrt(var + eps) * w + b


def _softplus(x):
    safe = jnp.minimum(x, 20.0)
    return jnp.where(x > 20.0, x, jnp.log1p(jnp.exp(safe)))


def _silu(x):
    return x * jax.nn.sigmoid(x)


def _gelu_tanh(x):
    # EUP-friendly GELU (tanh form).  |err| vs exact erf-GELU ~3e-4, smaller than
    # the bf16 MXU drift already accepted; keeps ~12 polynomial ops off the VALU.
    c = 0.7978845608028654  # sqrt(2/pi)
    return 0.5 * x * (1.0 + jnp.tanh(c * (x + 0.044715 * x * x * x)))


# --------------------------------- kernel ------------------------------------

def mamba_layer_kernel(
    x_ref,                        # (Bk*Lm, D)
    ln1w_ref, ln1b_ref,           # (1, D) f32
    wxz_ref,                      # (D, 2*d_inner) bf16  (in_proj, [x | z])
    convw_ref, convb_ref,         # (d_conv, d_inner) f32, (1, d_inner) f32
    xdt_ref,                      # (d_inner, dt_rank_pad) bf16
    wBC_ref,                      # (2*d_state, d_inner) bf16  ([B ; C], torch rows)
    dtw_ref, dtb_ref,             # (dt_rank_pad, d_inner) f32, (1, d_inner) f32
    AlogT_ref,                    # (d_state, d_inner) f32
    Dp_ref,                       # (1, d_inner) f32
    outw_ref,                     # (d_inner, D) bf16
    ln2w_ref, ln2b_ref,           # (1, D) f32
    fc1w_ref, fc1b_ref,           # (D, D) bf16, (1, D) f32
    fc2w_ref, fc2b_ref,           # (D, D) bf16, (1, D) f32
    out_ref,                      # (Bk*Lm, D)
    y_scr,                        # (Bk*Lm, d_inner) f32 scratch
    dA_scr, h_scr,                # (Lm, d_state, CH) f32 scratch (per-sequence)
    *, Lm, Bk, CH, n_dt,
):
    M = Bk * Lm
    d_inner = Dp_ref.shape[1]
    d_state = AlogT_ref.shape[0]
    d_conv = convw_ref.shape[0]
    f32 = jnp.float32
    bf16 = jnp.bfloat16

    xin = x_ref[...].astype(f32)                                     # (M, D)

    # ---- norm1 ----
    xn = _layernorm(xin, ln1w_ref[...], ln1b_ref[...])

    # ---- Mamba in_proj (bias=False): fused x|z matmul, batch folded into M ----
    xz = jnp.dot(xn.astype(bf16), wxz_ref[...],
                 preferred_element_type=f32)                         # (M, 2*d_inner)
    x_m = xz[:, :d_inner]
    z = xz[:, d_inner:]

    # ---- depthwise causal conv1d (padding=d_conv-1, truncated) + SiLU.
    #      Batch stays folded; sequence boundaries enforced with a (row mod Lm)
    #      mask; shift==0 tap needs neither realignment nor mask. ----
    pad = jnp.zeros((d_conv - 1, d_inner), f32)
    x_pad = jnp.concatenate([pad, x_m], axis=0)                      # (M+d_conv-1, d_inner)
    t_in_seq = jnp.mod(lax.broadcasted_iota(jnp.int32, (M, d_inner), 0), Lm)
    acc = jnp.zeros((M, d_inner), f32) + convb_ref[...]
    acc = acc + x_m * convw_ref[d_conv - 1:d_conv, :]                # shift == 0 tap
    for k in range(d_conv - 1):
        shift = d_conv - 1 - k            # out[t] += w[:,k] * x[t - shift]
        win = x_pad[k:k + M, :]
        win = jnp.where(t_in_seq >= shift, win, 0.0)
        acc = acc + win * convw_ref[k:k + 1, :]
    u = _silu(acc)                                                   # (M, d_inner)

    # ---- x_proj dt columns (MXU) ----
    u_b = u.astype(bf16)
    dt_in = jnp.dot(u_b, xdt_ref[...], preferred_element_type=f32)   # (M, dt_rank_pad)

    # ---- dt_proj on the VPU: K = dt_rank tiny -> broadcast-FMAs, frees an MXU
    #      pass in a GEMM-bound kernel.  f32 throughout (more precise than before).
    dt = jnp.zeros((M, d_inner), f32) + dtb_ref[...]
    dtw = dtw_ref[...]
    for k in range(n_dt):
        dt = dt + dt_in[:, k:k + 1] * dtw[k:k + 1, :]
    dt = _softplus(dt)                                               # (M, d_inner)

    # ---- B^T|C^T computed directly as W @ u^T: d_state on sublanes, time on
    #      lanes — exactly the layout the scan staging needs (no transposes). ----
    dn = (((1,), (1,)), ((), ()))
    BC_T = lax.dot_general(wBC_ref[...], u_b, dn,
                           preferred_element_type=f32)               # (2*d_state, M)
    B_T = BC_T[:d_state, :]
    C_T = BC_T[d_state:, :]

    A_T = -jnp.exp(AlogT_ref[...])                                   # (d_state, d_inner)
    dtu = dt * u                                                     # (M, d_inner)

    # ---- selective scan, per sequence, d_inner chunked so h stays in vregs.
    #      Transcendentals / broadcasts are staged into VMEM scratch first, so the
    #      serial recurrence is one FMA + one aligned full-tile store per step.
    #      C-weighting, the sublane reduce and y stores all happen off the chain.
    n_ch = d_inner // CH
    unroll = True if Lm <= 32 else 8
    for c in range(n_ch):
        cs = c * CH
        A_c = A_T[:, cs:cs + CH]
        for b in range(Bk):
            base = b * Lm
            # staging (off the serial chain)
            # TODO(synk): switch this static loop to a fori_loop for very large Lm.
            for t in range(Lm):
                r = base + t
                dA_scr[t] = jnp.exp(dt[r:r + 1, cs:cs + CH] * A_c)   # (d_state, CH)
                h_scr[t] = dtu[r:r + 1, cs:cs + CH] * B_T[:, r:r + 1]

            # serial recurrence: h = dA*h + dBu ; store h back into the scratch
            def step(t, h):
                h = dA_scr[t] * h + h_scr[t]
                h_scr[t] = h
                return h

            lax.fori_loop(0, Lm, step, jnp.zeros((d_state, CH), f32),
                          unroll=unroll)

            # readout (off the serial chain), packed into one aligned store
            ys = []
            for t in range(Lm):
                r = base + t
                ys.append(jnp.sum(h_scr[t] * C_T[:, r:r + 1], axis=0,
                                  keepdims=True))
            y_scr[base:base + Lm, cs:cs + CH] = jnp.concatenate(ys, axis=0)

    y = y_scr[...]                                                   # (M, d_inner)
    y = (y + u * Dp_ref[...]) * _silu(z)                             # D skip + gate

    mamba_out = jnp.dot(y.astype(bf16), outw_ref[...],
                        preferred_element_type=f32)                  # (M, D)

    # ---- residual + norm2 + FFN (no second residual in the reference module) ----
    resid = xin + mamba_out
    rn = _layernorm(resid, ln2w_ref[...], ln2b_ref[...])
    h1 = _gelu_tanh(jnp.dot(rn.astype(bf16), fc1w_ref[...],
                            preferred_element_type=f32) + fc1b_ref[...])
    out = jnp.dot(h1.astype(bf16), fc2w_ref[...],
                  preferred_element_type=f32) + fc2b_ref[...]

    out_ref[...] = out.astype(out_ref.dtype)


# --------------------------------- wrapper -----------------------------------

def _pick_bk(bsz, lm, bytes_per_row, max_rows=512, act_budget=16 << 20):
    """Largest Bk dividing bsz s.t. the M=Bk*Lm tile fits the row/VMEM budget,
    blocks stay (8,·)-tileable, and (for v7x megacore) grid >= 2 when possible."""
    row_cap = max(lm, min(max_rows, act_budget // max(1, bytes_per_row)))

    def ok(bk, need_multi):
        m = bk * lm
        if bsz % bk:
            return False
        if bk != bsz and m % 8:
            return False                      # keep blocks sublane-aligned
        if m > row_cap and bk != 1:
            return False
        if need_multi and (bsz // bk) < 2:
            return False
        return True

    for need_multi in ((bsz >= 2), False):
        for bk in range(bsz, 0, -1):
            if ok(bk, need_multi):
                return bk
    return bsz


def mamba_layer_forward(x, params, *, block_batch=None):
    """x: (B, L, C) with L == dim (same convention as MambaLayer.forward)."""
    Bsz, L, C = x.shape
    Lm, D = C, L
    # TODO(synk): fold these permutes into the kernel at realistic sizes.
    x_flat = jnp.transpose(x, (0, 2, 1)).reshape(Bsz * Lm, D)        # (B*Lm, D)

    d_inner = params["D"].shape[1]
    d_state = params["A_log_T"].shape[0]
    n_dt = int(params.get("dt_rank", params["dtw_T"].shape[0]))

    # d_inner chunk for the scan (keeps h in vregs, bounds scratch for v7x 64 MiB)
    CH = 256 if (d_inner % 256 == 0) else d_inner
    while CH > 128 and 2 * Lm * d_state * CH * 4 > (8 << 20) and d_inner % (CH // 2) == 0:
        CH //= 2

    bytes_per_row = 4 * (6 * D + 8 * d_inner + 2 * d_state)          # rough f32 activations/row
    Bk = block_batch if block_batch is not None else _pick_bk(Bsz, Lm, bytes_per_row)
    grid = (Bsz // Bk,)

    def full_spec(arr):
        n = arr.ndim
        return pl.BlockSpec(arr.shape, lambda g, _n=n: (0,) * _n)

    plist = [
        params["ln1_w"], params["ln1_b"],
        params["wxz_T"],
        params["conv_w"], params["conv_b"],
        params["xdt_T"], params["wBC"],
        params["dtw_T"], params["dt_b"],
        params["A_log_T"], params["D"],
        params["outw_T"],
        params["ln2_w"], params["ln2_b"],
        params["fc1w_T"], params["fc1_b"],
        params["fc2w_T"], params["fc2_b"],
    ]
    # TODO(synk): single-buffer these grid-invariant weights (pl.Buffered(1) or a
    # one-shot manual stage from pl.ANY) once weight VMEM matters (v7x: 64 MiB).
    in_specs = [pl.BlockSpec((Bk * Lm, D), lambda g: (g, 0))]
    in_specs += [full_spec(p) for p in plist]
    out_spec = pl.BlockSpec((Bk * Lm, D), lambda g: (g, 0))

    kernel = functools.partial(mamba_layer_kernel, Lm=Lm, Bk=Bk, CH=CH, n_dt=n_dt)

    out_flat = pl.pallas_call(
        kernel,
        out_shape=jax.ShapeDtypeStruct((Bsz * Lm, D), x.dtype),
        grid=grid,
        in_specs=in_specs,
        out_specs=out_spec,
        scratch_shapes=[
            pltpu.VMEM((Bk * Lm, d_inner), jnp.float32),             # y
            pltpu.VMEM((Lm, d_state, CH), jnp.float32),              # dA stage
            pltpu.VMEM((Lm, d_state, CH), jnp.float32),              # dBu -> h
        ],
        compiler_params=pltpu.CompilerParams(
            dimension_semantics=("parallel",),
            # 48 MiB stays under v7x's 64 MiB physical VMEM and within v5e/v6e.
            vmem_limit_bytes=48 * 1024 * 1024,
        ),
    )(x_flat, *plist)
    return jnp.transpose(out_flat.reshape(Bsz, Lm, D), (0, 2, 1))    # back to (B, L, C)


# ----------------------------- parameter setup --------------------------------

def init_params(key, dim, d_state=64, d_conv=4, expand=2):
    f32, bf16 = jnp.float32, jnp.bfloat16
    d_inner = expand * dim
    dt_rank = math.ceil(dim / 16)
    dt_rank_pad = max(8, ((dt_rank + 7) // 8) * 8)   # zero-padded -> numerically identical
    ks = jax.random.split(key, 10)

    in_proj_w = 0.02 * jax.random.normal(ks[0], (2 * d_inner, dim), f32)   # torch (out,in)
    conv_w = 0.1 * jax.random.normal(ks[1], (d_inner, d_conv), f32)        # (d_inner,1,d_conv)
    conv_b = 0.01 * jax.random.normal(ks[2], (d_inner,), f32)
    x_proj_w = 0.02 * jax.random.normal(ks[3], (dt_rank + 2 * d_state, d_inner), f32)
    dt_proj_w = (dt_rank ** -0.5) * jax.random.normal(ks[4], (d_inner, dt_rank), f32)
    dt_init = jnp.exp(jax.random.uniform(ks[5], (d_inner,), f32)
                      * (math.log(0.1) - math.log(0.001)) + math.log(0.001))
    dt_proj_b = dt_init + jnp.log(-jnp.expm1(-dt_init))                    # inv softplus
    A_log = jnp.log(jnp.broadcast_to(jnp.arange(1, d_state + 1, dtype=f32),
                                     (d_inner, d_state)))
    out_proj_w = 0.02 * jax.random.normal(ks[6], (dim, d_inner), f32)
    fc1_w = 0.02 * jax.random.normal(ks[7], (dim, dim), f32)
    fc2_w = 0.02 * jax.random.normal(ks[8], (dim, dim), f32)

    w_dt = x_proj_w[:dt_rank]
    w_BC = x_proj_w[dt_rank:]                                              # [B ; C]
    xdt_T = jnp.zeros((d_inner, dt_rank_pad), f32).at[:, :dt_rank].set(w_dt.T)
    dtw_T = jnp.zeros((dt_rank_pad, d_inner), f32).at[:dt_rank, :].set(dt_proj_w.T)

    return dict(
        dt_rank=dt_rank,
        ln1_w=jnp.ones((1, dim), f32), ln1_b=jnp.zeros((1, dim), f32),
        # MXU-consumed weights in bf16 (f32 accumulation inside the kernel).
        # TODO(synk): fp8 for these on v7x if accuracy allows.
        wxz_T=in_proj_w.T.astype(bf16),                  # (dim, 2*d_inner): [x | z]
        conv_w=conv_w.T, conv_b=conv_b.reshape(1, d_inner),
        xdt_T=xdt_T.astype(bf16), wBC=w_BC.astype(bf16),
        dtw_T=dtw_T,                                      # f32: consumed on the VPU
        dt_b=dt_proj_b.reshape(1, d_inner),
        A_log_T=A_log.T, D=jnp.ones((1, d_inner), f32),
        outw_T=out_proj_w.T.astype(bf16),
        ln2_w=jnp.ones((1, dim), f32), ln2_b=jnp.zeros((1, dim), f32),
        fc1w_T=fc1_w.T.astype(bf16), fc1_b=jnp.zeros((1, dim), f32),
        fc2w_T=fc2_w.T.astype(bf16), fc2_b=jnp.zeros((1, dim), f32),
    )


if __name__ == "__main__":
    dim = 32    # d_model; MambaLayer requires input (B, L, C) with L == dim
    seq = 8     # original C axis (becomes the Mamba sequence length)
    Bsz = 2
    key = jax.random.PRNGKey(0)
    kp, kx = jax.random.split(key)
    params = init_params(kp, dim)               # d_state=64, d_conv=4, expand=2
    x = jax.random.normal(kx, (Bsz, dim, seq), jnp.float32)   # (B, L, C)
    out = mamba_layer_forward(x, params)
    jax.block_until_ready(out)
    assert out.shape == x.shape
    assert bool(jnp.all(jnp.isfinite(out)))
    print("KERNEL_OK")
</pallas_src>

<mosaic_0001>
module attributes {stable_mosaic.version = 11 : i64} {
  func.func @mamba_layer_kernel(%arg0: i32, %arg1: memref<8x32xf32, #tpu.memory_space<vmem>>, %arg2: memref<1x32xf32, #tpu.memory_space<vmem>>, %arg3: memref<1x32xf32, #tpu.memory_space<vmem>>, %arg4: memref<32x128xbf16, #tpu.memory_space<vmem>>, %arg5: memref<4x64xf32, #tpu.memory_space<vmem>>, %arg6: memref<1x64xf32, #tpu.memory_space<vmem>>, %arg7: memref<64x8xbf16, #tpu.memory_space<vmem>>, %arg8: memref<128x64xbf16, #tpu.memory_space<vmem>>, %arg9: memref<8x64xf32, #tpu.memory_space<vmem>>, %arg10: memref<1x64xf32, #tpu.memory_space<vmem>>, %arg11: memref<64x64xf32, #tpu.memory_space<vmem>>, %arg12: memref<1x64xf32, #tpu.memory_space<vmem>>, %arg13: memref<64x32xbf16, #tpu.memory_space<vmem>>, %arg14: memref<1x32xf32, #tpu.memory_space<vmem>>, %arg15: memref<1x32xf32, #tpu.memory_space<vmem>>, %arg16: memref<32x32xbf16, #tpu.memory_space<vmem>>, %arg17: memref<1x32xf32, #tpu.memory_space<vmem>>, %arg18: memref<32x32xbf16, #tpu.memory_space<vmem>>, %arg19: memref<1x32xf32, #tpu.memory_space<vmem>>, %arg20: memref<8x32xf32, #tpu.memory_space<vmem>>, %arg21: memref<8x64xf32, #tpu.memory_space<vmem>>, %arg22: memref<8x64x64xf32, #tpu.memory_space<vmem>>, %arg23: memref<8x64x64xf32, #tpu.memory_space<vmem>>) attributes {dimension_semantics = [#tpu.dimension_semantics<parallel>], iteration_bounds = array<i64: 2>, scalar_prefetch = 0 : i64, scratch_operands = 3 : i64, tpu.core_type = #tpu.core_type<tc>, window_params = [{transform_indices = @transform_0, window_bounds = array<i64: 8, 32>}, {pipeline_mode = #tpu.pipeline_mode<synchronous>, transform_indices = @transform_1, window_bounds = array<i64: 1, 32>}, {pipeline_mode = #tpu.pipeline_mode<synchronous>, transform_indices = @transform_2, window_bounds = array<i64: 1, 32>}, {pipeline_mode = #tpu.pipeline_mode<synchronous>, transform_indices = @transform_3, window_bounds = array<i64: 32, 128>}, {pipeline_mode = #tpu.pipeline_mode<synchronous>, transform_indices = @transform_4, window_bounds = array<i64: 4, 64>}, {pipeline_mode = #tpu.pipeline_mode<synchronous>, transform_indices = @transform_5, window_bounds = array<i64: 1, 64>}, {pipeline_mode = #tpu.pipeline_mode<synchronous>, transform_indices = @transform_6, window_bounds = array<i64: 64, 8>}, {pipeline_mode = #tpu.pipeline_mode<synchronous>, transform_indices = @transform_7, window_bounds = array<i64: 128, 64>}, {pipeline_mode = #tpu.pipeline_mode<synchronous>, transform_indices = @transform_8, window_bounds = array<i64: 8, 64>}, {pipeline_mode = #tpu.pipeline_mode<synchronous>, transform_indices = @transform_9, window_bounds = array<i64: 1, 64>}, {pipeline_mode = #tpu.pipeline_mode<synchronous>, transform_indices = @transform_10, window_bounds = array<i64: 64, 64>}, {pipeline_mode = #tpu.pipeline_mode<synchronous>, transform_indices = @transform_11, window_bounds = array<i64: 1, 64>}, {pipeline_mode = #tpu.pipeline_mode<synchronous>, transform_indices = @transform_12, window_bounds = array<i64: 64, 32>}, {pipeline_mode = #tpu.pipeline_mode<synchronous>, transform_indices = @transform_13, window_bounds = array<i64: 1, 32>}, {pipeline_mode = #tpu.pipeline_mode<synchronous>, transform_indices = @transform_14, window_bounds = array<i64: 1, 32>}, {pipeline_mode = #tpu.pipeline_mode<synchronous>, transform_indices = @transform_15, window_bounds = array<i64: 32, 32>}, {pipeline_mode = #tpu.pipeline_mode<synchronous>, transform_indices = @transform_16, window_bounds = array<i64: 1, 32>}, {pipeline_mode = #tpu.pipeline_mode<synchronous>, transform_indices = @transform_17, window_bounds = array<i64: 32, 32>}, {pipeline_mode = #tpu.pipeline_mode<synchronous>, transform_indices = @transform_18, window_bounds = array<i64: 1, 32>}, {transform_indices = @transform_19, window_bounds = array<i64: 8, 32>}]} {
    %c0 = arith.constant 0 : index
    %c0_0 = arith.constant 0 : index
    %0 = vector.load %arg1[%c0, %c0_0] : memref<8x32xf32, #tpu.memory_space<vmem>>, vector<8x32xf32>
    %c0_1 = arith.constant 0 : index
    %c0_2 = arith.constant 0 : index
    %1 = vector.load %arg2[%c0_1, %c0_2] : memref<1x32xf32, #tpu.memory_space<vmem>>, vector<1x32xf32>
    %c0_3 = arith.constant 0 : index
    %c0_4 = arith.constant 0 : index
    %2 = vector.load %arg3[%c0_3, %c0_4] : memref<1x32xf32, #tpu.memory_space<vmem>>, vector<1x32xf32>
    %cst = arith.constant dense<0.000000e+00> : vector<8xf32>
    %3 = vector.multi_reduction <add>, %0, %cst [1] : vector<8x32xf32> to vector<8xf32>
    %4 = vector.shape_cast %3 : vector<8xf32> to vector<8x1xf32>
    %cst_5 = arith.constant 3.200000e+01 : f32
    %5 = vector.broadcast %cst_5 : f32 to vector<8x1xf32>
    %6 = arith.divf %4, %5 : vector<8x1xf32>
    %7 = vector.broadcast %6 : vector<8x1xf32> to vector<8x32xf32>
    %8 = arith.subf %0, %7 : vector<8x32xf32>
    %9 = arith.mulf %8, %8 : vector<8x32xf32>
    %cst_6 = arith.constant dense<0.000000e+00> : vector<8xf32>
    %10 = vector.multi_reduction <add>, %9, %cst_6 [1] : vector<8x32xf32> to vector<8xf32>
    %11 = vector.shape_cast %10 : vector<8xf32> to vector<8x1xf32>
    %cst_7 = arith.constant 3.200000e+01 : f32
    %12 = vector.broadcast %cst_7 : f32 to vector<8x1xf32>
    %13 = arith.divf %11, %12 : vector<8x1xf32>
    %cst_8 = arith.constant 9.99999974E-6 : f32
    %14 = vector.broadcast %cst_8 : f32 to vector<8x1xf32>
    %15 = arith.addf %13, %14 : vector<8x1xf32>
    %16 = math.rsqrt %15 : vector<8x1xf32>
    %17 = vector.broadcast %16 : vector<8x1xf32> to vector<8x32xf32>
    %18 = arith.mulf %8, %17 : vector<8x32xf32>
    %19 = vector.broadcast %1 : vector<1x32xf32> to vector<8x32xf32>
    %20 = arith.mulf %18, %19 : vector<8x32xf32>
    %21 = vector.broadcast %2 : vector<1x32xf32> to vector<8x32xf32>
    %22 = arith.addf %20, %21 : vector<8x32xf32>
    %23 = arith.truncf %22 : vector<8x32xf32> to vector<8x32xbf16>
    %c0_9 = arith.constant 0 : index
    %c0_10 = arith.constant 0 : index
    %24 = vector.load %arg4[%c0_9, %c0_10] : memref<32x128xbf16, #tpu.memory_space<vmem>>, vector<32x128xbf16>
    %cst_11 = arith.constant dense<0.000000e+00> : vector<8x128xf32>
    %25 = tpu.matmul %23, %24, %cst_11 {dimension_numbers = #tpu.dot_dimension_numbers<[1], [0], [0], [1], [0, 0, 1, 1], [], []>} : vector<8x32xbf16>, vector<32x128xbf16>, vector<8x128xf32> -> vector<8x128xf32>
    %26 = vector.extract_strided_slice %25 {offsets = [0, 0], sizes = [8, 64], strides = [1, 1]} : vector<8x128xf32> to vector<8x64xf32>
    %27 = vector.extract_strided_slice %25 {offsets = [0, 64], sizes = [8, 64], strides = [1, 1]} : vector<8x128xf32> to vector<8x64xf32>
    %cst_12 = arith.constant 0.000000e+00 : f32
    %28 = vector.broadcast %cst_12 : f32 to vector<3x64xf32>
    %29 = tpu.concatenate %28, %26 in 0 : vector<3x64xf32>, vector<8x64xf32> -> vector<11x64xf32>
    %30 = tpu.iota {dimensions = array<i32: 0>} : vector<8x64xi32>
    %c8_i32 = arith.constant 8 : i32
    %c0_i32 = arith.constant 0 : i32
    %31 = arith.cmpi eq, %c8_i32, %c0_i32 : i32
    %c1_i32 = arith.constant 1 : i32
    %32 = arith.select %31, %c1_i32, %c8_i32 : i32
    %33 = vector.broadcast %32 : i32 to vector<8x64xi32>
    %34 = arith.remsi %30, %33 : vector<8x64xi32>
    %c0_i32_13 = arith.constant 0 : i32
    %35 = vector.broadcast %c0_i32_13 : i32 to vector<8x64xi32>
    %36 = arith.cmpi ne, %34, %35 : vector<8x64xi32>
    %c0_i32_14 = arith.constant 0 : i32
    %37 = vector.broadcast %c0_i32_14 : i32 to vector<8x64xi32>
    %38 = arith.cmpi slt, %34, %37 : vector<8x64xi32>
    %c0_i32_15 = arith.constant 0 : i32
    %39 = arith.cmpi slt, %32, %c0_i32_15 : i32
    %40 = vector.broadcast %39 : i1 to vector<8x64xi1>
    %41 = vector.broadcast %40 : vector<8x64xi1> to vector<8x64xi1>
    %42 = arith.xori %38, %41 : vector<8x64xi1>
    %43 = arith.andi %42, %36 : vector<8x64xi1>
    %44 = vector.broadcast %32 : i32 to vector<8x64xi32>
    %45 = arith.addi %34, %44 : vector<8x64xi32>
    %46 = arith.select %43, %45, %34 : vector<8x64xi1>, vector<8x64xi32>
    %cst_16 = arith.constant 0.000000e+00 : f32
    %47 = vector.broadcast %cst_16 : f32 to vector<8x64xf32>
    %c0_17 = arith.constant 0 : index
    %c0_18 = arith.constant 0 : index
    %48 = vector.load %arg6[%c0_17, %c0_18] : memref<1x64xf32, #tpu.memory_space<vmem>>, vector<1x64xf32>
    %49 = vector.broadcast %48 : vector<1x64xf32> to vector<8x64xf32>
    %50 = arith.addf %47, %49 : vector<8x64xf32>
    %c3 = arith.constant 3 : index
    %c0_19 = arith.constant 0 : index
    %51 = vector.load %arg5[%c3, %c0_19] : memref<4x64xf32, #tpu.memory_space<vmem>>, vector<1x64xf32>
    %52 = vector.broadcast %51 : vector<1x64xf32> to vector<8x64xf32>
    %53 = arith.mulf %26, %52 : vector<8x64xf32>
    %54 = arith.addf %50, %53 : vector<8x64xf32>
    %55 = vector.extract_strided_slice %29 {offsets = [0, 0], sizes = [8, 64], strides = [1, 1]} : vector<11x64xf32> to vector<8x64xf32>
    %c3_i32 = arith.constant 3 : i32
    %56 = vector.broadcast %c3_i32 : i32 to vector<8x64xi32>
    %57 = arith.cmpi sge, %46, %56 : vector<8x64xi32>
    %cst_20 = arith.constant 0.000000e+00 : f32
    %58 = vector.broadcast %cst_20 : f32 to vector<8x64xf32>
    %59 = arith.select %57, %55, %58 : vector<8x64xi1>, vector<8x64xf32>
    %c0_21 = arith.constant 0 : index
    %c0_22 = arith.constant 0 : index
    %60 = vector.load %arg5[%c0_21, %c0_22] : memref<4x64xf32, #tpu.memory_space<vmem>>, vector<1x64xf32>
    %61 = vector.broadcast %60 : vector<1x64xf32> to vector<8x64xf32>
    %62 = arith.mulf %59, %61 : vector<8x64xf32>
    %63 = arith.addf %54, %62 : vector<8x64xf32>
    %64 = vector.extract_strided_slice %29 {offsets = [1, 0], sizes = [8, 64], strides = [1, 1]} : vector<11x64xf32> to vector<8x64xf32>
    %c2_i32 = arith.constant 2 : i32
    %65 = vector.broadcast %c2_i32 : i32 to vector<8x64xi32>
    %66 = arith.cmpi sge, %46, %65 : vector<8x64xi32>
    %cst_23 = arith.constant 0.000000e+00 : f32
    %67 = vector.broadcast %cst_23 : f32 to vector<8x64xf32>
    %68 = arith.select %66, %64, %67 : vector<8x64xi1>, vector<8x64xf32>
    %c1 = arith.constant 1 : index
    %c0_24 = arith.constant 0 : index
    %69 = vector.load %arg5[%c1, %c0_24] : memref<4x64xf32, #tpu.memory_space<vmem>>, vector<1x64xf32>
    %70 = vector.broadcast %69 : vector<1x64xf32> to vector<8x64xf32>
    %71 = arith.mulf %68, %70 : vector<8x64xf32>
    %72 = arith.addf %63, %71 : vector<8x64xf32>
    %73 = vector.extract_strided_slice %29 {offsets = [2, 0], sizes = [8, 64], strides = [1, 1]} : vector<11x64xf32> to vector<8x64xf32>
    %c1_i32_25 = arith.constant 1 : i32
    %74 = vector.broadcast %c1_i32_25 : i32 to vector<8x64xi32>
    %75 = arith.cmpi sge, %46, %74 : vector<8x64xi32>
    %cst_26 = arith.constant 0.000000e+00 : f32
    %76 = vector.broadcast %cst_26 : f32 to vector<8x64xf32>
    %77 = arith.select %75, %73, %76 : vector<8x64xi1>, vector<8x64xf32>
    %c2 = arith.constant 2 : index
    %c0_27 = arith.constant 0 : index
    %78 = vector.load %arg5[%c2, %c0_27] : memref<4x64xf32, #tpu.memory_space<vmem>>, vector<1x64xf32>
    %79 = vector.broadcast %78 : vector<1x64xf32> to vector<8x64xf32>
    %80 = arith.mulf %77, %79 : vector<8x64xf32>
    %81 = arith.addf %72, %80 : vector<8x64xf32>
    %82 = arith.negf %81 : vector<8x64xf32>
    %83 = math.exp %82 : vector<8x64xf32>
    %cst_28 = arith.constant 1.000000e+00 : f32
    %84 = vector.broadcast %cst_28 : f32 to vector<8x64xf32>
    %85 = arith.addf %84, %83 : vector<8x64xf32>
    %86 = arith.divf %84, %85 : vector<8x64xf32>
    %87 = arith.mulf %81, %86 : vector<8x64xf32>
    %88 = arith.truncf %87 : vector<8x64xf32> to vector<8x64xbf16>
    %c0_29 = arith.constant 0 : index
    %c0_30 = arith.constant 0 : index
    %89 = vector.load %arg7[%c0_29, %c0_30] : memref<64x8xbf16, #tpu.memory_space<vmem>>, vector<64x8xbf16>
    %cst_31 = arith.constant dense<0.000000e+00> : vector<8x8xf32>
    %90 = tpu.matmul %88, %89, %cst_31 {dimension_numbers = #tpu.dot_dimension_numbers<[1], [0], [0], [1], [0, 0, 1, 1], [], []>} : vector<8x64xbf16>, vector<64x8xbf16>, vector<8x8xf32> -> vector<8x8xf32>
    %cst_32 = arith.constant 0.000000e+00 : f32
    %91 = vector.broadcast %cst_32 : f32 to vector<8x64xf32>
    %c0_33 = arith.constant 0 : index
    %c0_34 = arith.constant 0 : index
    %92 = vector.load %arg10[%c0_33, %c0_34] : memref<1x64xf32, #tpu.memory_space<vmem>>, vector<1x64xf32>
    %93 = vector.broadcast %92 : vector<1x64xf32> to vector<8x64xf32>
    %94 = arith.addf %91, %93 : vector<8x64xf32>
    %c0_35 = arith.constant 0 : index
    %c0_36 = arith.constant 0 : index
    %95 = vector.load %arg9[%c0_35, %c0_36] : memref<8x64xf32, #tpu.memory_space<vmem>>, vector<8x64xf32>
    %96 = vector.extract_strided_slice %90 {offsets = [0, 0], sizes = [8, 1], strides = [1, 1]} : vector<8x8xf32> to vector<8x1xf32>
    %97 = vector.extract_strided_slice %95 {offsets = [0, 0], sizes = [1, 64], strides = [1, 1]} : vector<8x64xf32> to vector<1x64xf32>
    %98 = vector.broadcast %96 : vector<8x1xf32> to vector<8x64xf32>
    %99 = vector.broadcast %97 : vector<1x64xf32> to vector<8x64xf32>
    %100 = arith.mulf %98, %99 : vector<8x64xf32>
    %101 = arith.addf %94, %100 : vector<8x64xf32>
    %102 = vector.extract_strided_slice %90 {offsets = [0, 1], sizes = [8, 1], strides = [1, 1]} : vector<8x8xf32> to vector<8x1xf32>
    %103 = vector.extract_strided_slice %95 {offsets = [1, 0], sizes = [1, 64], strides = [1, 1]} : vector<8x64xf32> to vector<1x64xf32>
    %104 = vector.broadcast %102 : vector<8x1xf32> to vector<8x64xf32>
    %105 = vector.broadcast %103 : vector<1x64xf32> to vector<8x64xf32>
    %106 = arith.mulf %104, %105 : vector<8x64xf32>
    %107 = arith.addf %101, %106 : vector<8x64xf32>
    %cst_37 = arith.constant 2.000000e+01 : f32
    %108 = vector.broadcast %cst_37 : f32 to vector<8x64xf32>
    %109 = arith.minimumf %107, %108 : vector<8x64xf32>
    %cst_38 = arith.constant 2.000000e+01 : f32
    %110 = vector.broadcast %cst_38 : f32 to vector<8x64xf32>
    %111 = arith.cmpf ogt, %107, %110 : vector<8x64xf32>
    %112 = math.exp %109 : vector<8x64xf32>
    %113 = math.log1p %112 : vector<8x64xf32>
    %114 = arith.select %111, %107, %113 : vector<8x64xi1>, vector<8x64xf32>
    %c0_39 = arith.constant 0 : index
    %c0_40 = arith.constant 0 : index
    %115 = vector.load %arg8[%c0_39, %c0_40] : memref<128x64xbf16, #tpu.memory_space<vmem>>, vector<128x64xbf16>
    %cst_41 = arith.constant dense<0.000000e+00> : vector<128x8xf32>
    %116 = tpu.matmul %115, %88, %cst_41 {dimension_numbers = #tpu.dot_dimension_numbers<[1], [1], [0], [0], [0, 0, 1, 0], [], []>} : vector<128x64xbf16>, vector<8x64xbf16>, vector<128x8xf32> -> vector<128x8xf32>
    %117 = vector.extract_strided_slice %116 {offsets = [0, 0], sizes = [64, 8], strides = [1, 1]} : vector<128x8xf32> to vector<64x8xf32>
    %118 = vector.extract_strided_slice %116 {offsets = [64, 0], sizes = [64, 8], strides = [1, 1]} : vector<128x8xf32> to vector<64x8xf32>
    %c0_42 = arith.constant 0 : index
    %c0_43 = arith.constant 0 : index
    %119 = vector.load %arg11[%c0_42, %c0_43] : memref<64x64xf32, #tpu.memory_space<vmem>>, vector<64x64xf32>
    %120 = math.exp %119 : vector<64x64xf32>
    %cst_44 = arith.constant 0.000000e+00 : f32
    %121 = vector.broadcast %cst_44 : f32 to vector<64x64xf32>
    %122 = arith.subf %121, %120 : vector<64x64xf32>
    %123 = arith.mulf %114, %87 : vector<8x64xf32>
    %124 = vector.extract_strided_slice %114 {offsets = [0, 0], sizes = [1, 64], strides = [1, 1]} : vector<8x64xf32> to vector<1x64xf32>
    %125 = vector.broadcast %124 : vector<1x64xf32> to vector<64x64xf32>
    %126 = arith.mulf %125, %122 : vector<64x64xf32>
    %127 = math.exp %126 : vector<64x64xf32>
    %c0_45 = arith.constant 0 : index
    %c0_46 = arith.constant 0 : index
    %c0_47 = arith.constant 0 : index
    %128 = vector.load %arg22[%c0_45, %c0_46, %c0_47] : memref<8x64x64xf32, #tpu.memory_space<vmem>>, vector<1x64x64xf32>
    %129 = vector.shape_cast %128 : vector<1x64x64xf32> to vector<64x64xf32>
    %130 = vector.shape_cast %127 : vector<64x64xf32> to vector<1x64x64xf32>
    tpu.vector_store %arg22[%c0_45, %c0_46, %c0_47], %130 {strides = array<i32>} : memref<8x64x64xf32, #tpu.memory_space<vmem>>, vector<1x64x64xf32>,
    %131 = vector.extract_strided_slice %123 {offsets = [0, 0], sizes = [1, 64], strides = [1, 1]} : vector<8x64xf32> to vector<1x64xf32>
    %132 = vector.extract_strided_slice %117 {offsets = [0, 0], sizes = [64, 1], strides = [1, 1]} : vector<64x8xf32> to vector<64x1xf32>
    %133 = vector.broadcast %131 : vector<1x64xf32> to vector<64x64xf32>
    %134 = vector.broadcast %132 : vector<64x1xf32> to vector<64x64xf32>
    %135 = arith.mulf %133, %134 : vector<64x64xf32>
    %c0_48 = arith.constant 0 : index
    %c0_49 = arith.constant 0 : index
    %c0_50 = arith.constant 0 : index
    %136 = vector.load %arg23[%c0_48, %c0_49, %c0_50] : memref<8x64x64xf32, #tpu.memory_space<vmem>>, vector<1x64x64xf32>
    %137 = vector.shape_cast %136 : vector<1x64x64xf32> to vector<64x64xf32>
    %138 = vector.shape_cast %135 : vector<64x64xf32> to vector<1x64x64xf32>
    tpu.vector_store %arg23[%c0_48, %c0_49, %c0_50], %138 {strides = array<i32>} : memref<8x64x64xf32, #tpu.memory_space<vmem>>, vector<1x64x64xf32>,
    %139 = vector.extract_strided_slice %114 {offsets = [1, 0], sizes = [1, 64], strides = [1, 1]} : vector<8x64xf32> to vector<1x64xf32>
    %140 = vector.broadcast %139 : vector<1x64xf32> to vector<64x64xf32>
    %141 = arith.mulf %140, %122 : vector<64x64xf32>
    %142 = math.exp %141 : vector<64x64xf32>
    %c1_51 = arith.constant 1 : index
    %c0_52 = arith.constant 0 : index
    %c0_53 = arith.constant 0 : index
    %143 = vector.load %arg22[%c1_51, %c0_52, %c0_53] : memref<8x64x64xf32, #tpu.memory_space<vmem>>, vector<1x64x64xf32>
    %144 = vector.shape_cast %143 : vector<1x64x64xf32> to vector<64x64xf32>
    %145 = vector.shape_cast %142 : vector<64x64xf32> to vector<1x64x64xf32>
    tpu.vector_store %arg22[%c1_51, %c0_52, %c0_53], %145 {strides = array<i32>} : memref<8x64x64xf32, #tpu.memory_space<vmem>>, vector<1x64x64xf32>,
    %146 = vector.extract_strided_slice %123 {offsets = [1, 0], sizes = [1, 64], strides = [1, 1]} : vector<8x64xf32> to vector<1x64xf32>
    %147 = vector.extract_strided_slice %117 {offsets = [0, 1], sizes = [64, 1], strides = [1, 1]} : vector<64x8xf32> to vector<64x1xf32>
    %148 = vector.broadcast %146 : vector<1x64xf32> to vector<64x64xf32>
    %149 = vector.broadcast %147 : vector<64x1xf32> to vector<64x64xf32>
    %150 = arith.mulf %148, %149 : vector<64x64xf32>
    %c1_54 = arith.constant 1 : index
    %c0_55 = arith.constant 0 : index
    %c0_56 = arith.constant 0 : index
    %151 = vector.load %arg23[%c1_54, %c0_55, %c0_56] : memref<8x64x64xf32, #tpu.memory_space<vmem>>, vector<1x64x64xf32>
    %152 = vector.shape_cast %151 : vector<1x64x64xf32> to vector<64x64xf32>
    %153 = vector.shape_cast %150 : vector<64x64xf32> to vector<1x64x64xf32>
    tpu.vector_store %arg23[%c1_54, %c0_55, %c0_56], %153 {strides = array<i32>} : memref<8x64x64xf32, #tpu.memory_space<vmem>>, vector<1x64x64xf32>,
    %154 = vector.extract_strided_slice %114 {offsets = [2, 0], sizes = [1, 64], strides = [1, 1]} : vector<8x64xf32> to vector<1x64xf32>
    %155 = vector.broadcast %154 : vector<1x64xf32> to vector<64x64xf32>
    %156 = arith.mulf %155, %122 : vector<64x64xf32>
    %157 = math.exp %156 : vector<64x64xf32>
    %c2_57 = arith.constant 2 : index
    %c0_58 = arith.constant 0 : index
    %c0_59 = arith.constant 0 : index
    %158 = vector.load %arg22[%c2_57, %c0_58, %c0_59] : memref<8x64x64xf32, #tpu.memory_space<vmem>>, vector<1x64x64xf32>
    %159 = vector.shape_cast %158 : vector<1x64x64xf32> to vector<64x64xf32>
    %160 = vector.shape_cast %157 : vector<64x64xf32> to vector<1x64x64xf32>
    tpu.vector_store %arg22[%c2_57, %c0_58, %c0_59], %160 {strides = array<i32>} : memref<8x64x64xf32, #tpu.memory_space<vmem>>, vector<1x64x64xf32>,
    %161 = vector.extract_strided_slice %123 {offsets = [2, 0], sizes = [1, 64], strides = [1, 1]} : vector<8x64xf32> to vector<1x64xf32>
    %162 = vector.extract_strided_slice %117 {offsets = [0, 2], sizes = [64, 1], strides = [1, 1]} : vector<64x8xf32> to vector<64x1xf32>
    %163 = vector.broadcast %161 : vector<1x64xf32> to vector<64x64xf32>
    %164 = vector.broadcast %162 : vector<64x1xf32> to vector<64x64xf32>
    %165 = arith.mulf %163, %164 : vector<64x64xf32>
    %c2_60 = arith.constant 2 : index
    %c0_61 = arith.constant 0 : index
    %c0_62 = arith.constant 0 : index
    %166 = vector.load %arg23[%c2_60, %c0_61, %c0_62] : memref<8x64x64xf32, #tpu.memory_space<vmem>>, vector<1x64x64xf32>
    %167 = vector.shape_cast %166 : vector<1x64x64xf32> to vector<64x64xf32>
    %168 = vector.shape_cast %165 : vector<64x64xf32> to vector<1x64x64xf32>
    tpu.vector_store %arg23[%c2_60, %c0_61, %c0_62], %168 {strides = array<i32>} : memref<8x64x64xf32, #tpu.memory_space<vmem>>, vector<1x64x64xf32>,
    %169 = vector.extract_strided_slice %114 {offsets = [3, 0], sizes = [1, 64], strides = [1, 1]} : vector<8x64xf32> to vector<1x64xf32>
    %170 = vector.broadcast %169 : vector<1x64xf32> to vector<64x64xf32>
    %171 = arith.mulf %170, %122 : vector<64x64xf32>
    %172 = math.exp %171 : vector<64x64xf32>
    %c3_63 = arith.constant 3 : index
    %c0_64 = arith.constant 0 : index
    %c0_65 = arith.constant 0 : index
    %173 = vector.load %arg22[%c3_63, %c0_64, %c0_65] : memref<8x64x64xf32, #tpu.memory_space<vmem>>, vector<1x64x64xf32>
    %174 = vector.shape_cast %173 : vector<1x64x64xf32> to vector<64x64xf32>
    %175 = vector.shape_cast %172 : vector<64x64xf32> to vector<1x64x64xf32>
    tpu.vector_store %arg22[%c3_63, %c0_64, %c0_65], %175 {strides = array<i32>} : memref<8x64x64xf32, #tpu.memory_space<vmem>>, vector<1x64x64xf32>,
    %176 = vector.extract_strided_slice %123 {offsets = [3, 0], sizes = [1, 64], strides = [1, 1]} : vector<8x64xf32> to vector<1x64xf32>
    %177 = vector.extract_strided_slice %117 {offsets = [0, 3], sizes = [64, 1], strides = [1, 1]} : vector<64x8xf32> to vector<64x1xf32>
    %178 = vector.broadcast %176 : vector<1x64xf32> to vector<64x64xf32>
    %179 = vector.broadcast %177 : vector<64x1xf32> to vector<64x64xf32>
    %180 = arith.mulf %178, %179 : vector<64x64xf32>
    %c3_66 = arith.constant 3 : index
    %c0_67 = arith.constant 0 : index
    %c0_68 = arith.constant 0 : index
    %181 = vector.load %arg23[%c3_66, %c0_67, %c0_68] : memref<8x64x64xf32, #tpu.memory_space<vmem>>, vector<1x64x64xf32>
    %182 = vector.shape_cast %181 : vector<1x64x64xf32> to vector<64x64xf32>
    %183 = vector.shape_cast %180 : vector<64x64xf32> to vector<1x64x64xf32>
    tpu.vector_store %arg23[%c3_66, %c0_67, %c0_68], %183 {strides = array<i32>} : memref<8x64x64xf32, #tpu.memory_space<vmem>>, vector<1x64x64xf32>,
    %184 = vector.extract_strided_slice %114 {offsets = [4, 0], sizes = [1, 64], strides = [1, 1]} : vector<8x64xf32> to vector<1x64xf32>
    %185 = vector.broadcast %184 : vector<1x64xf32> to vector<64x64xf32>
    %186 = arith.mulf %185, %122 : vector<64x64xf32>
    %187 = math.exp %186 : vector<64x64xf32>
    %c4 = arith.constant 4 : index
    %c0_69 = arith.constant 0 : index
    %c0_70 = arith.constant 0 : index
    %188 = vector.load %arg22[%c4, %c0_69, %c0_70] : memref<8x64x64xf32, #tpu.memory_space<vmem>>, vector<1x64x64xf32>
    %189 = vector.shape_cast %188 : vector<1x64x64xf32> to vector<64x64xf32>
    %190 = vector.shape_cast %187 : vector<64x64xf32> to vector<1x64x64xf32>
    tpu.vector_store %arg22[%c4, %c0_69, %c0_70], %190 {strides = array<i32>} : memref<8x64x64xf32, #tpu.memory_space<vmem>>, vector<1x64x64xf32>,
    %191 = vector.extract_strided_slice %123 {offsets = [4, 0], sizes = [1, 64], strides = [1, 1]} : vector<8x64xf32> to vector<1x64xf32>
    %192 = vector.extract_strided_slice %117 {offsets = [0, 4], sizes = [64, 1], strides = [1, 1]} : vector<64x8xf32> to vector<64x1xf32>
    %193 = vector.broadcast %191 : vector<1x64xf32> to vector<64x64xf32>
    %194 = vector.broadcast %192 : vector<64x1xf32> to vector<64x64xf32>
    %195 = arith.mulf %193, %194 : vector<64x64xf32>
    %c4_71 = arith.constant 4 : index
    %c0_72 = arith.constant 0 : index
    %c0_73 = arith.constant 0 : index
    %196 = vector.load %arg23[%c4_71, %c0_72, %c0_73] : memref<8x64x64xf32, #tpu.memory_space<vmem>>, vector<1x64x64xf32>
    %197 = vector.shape_cast %196 : vector<1x64x64xf32> to vector<64x64xf32>
    %198 = vector.shape_cast %195 : vector<64x64xf32> to vector<1x64x64xf32>
    tpu.vector_store %arg23[%c4_71, %c0_72, %c0_73], %198 {strides = array<i32>} : memref<8x64x64xf32, #tpu.memory_space<vmem>>, vector<1x64x64xf32>,
    %199 = vector.extract_strided_slice %114 {offsets = [5, 0], sizes = [1, 64], strides = [1, 1]} : vector<8x64xf32> to vector<1x64xf32>
    %200 = vector.broadcast %199 : vector<1x64xf32> to vector<64x64xf32>
    %201 = arith.mulf %200, %122 : vector<64x64xf32>
    %202 = math.exp %201 : vector<64x64xf32>
    %c5 = arith.constant 5 : index
    %c0_74 = arith.constant 0 : index
    %c0_75 = arith.constant 0 : index
    %203 = vector.load %arg22[%c5, %c0_74, %c0_75] : memref<8x64x64xf32, #tpu.memory_space<vmem>>, vector<1x64x64xf32>
    %204 = vector.shape_cast %203 : vector<1x64x64xf32> to vector<64x64xf32>
    %205 = vector.shape_cast %202 : vector<64x64xf32> to vector<1x64x64xf32>
    tpu.vector_store %arg22[%c5, %c0_74, %c0_75], %205 {strides = array<i32>} : memref<8x64x64xf32, #tpu.memory_space<vmem>>, vector<1x64x64xf32>,
    %206 = vector.extract_strided_slice %123 {offsets = [5, 0], sizes = [1, 64], strides = [1, 1]} : vector<8x64xf32> to vector<1x64xf32>
    %207 = vector.extract_strided_slice %117 {offsets = [0, 5], sizes = [64, 1], strides = [1, 1]} : vector<64x8xf32> to vector<64x1xf32>
    %208 = vector.broadcast %206 : vector<1x64xf32> to vector<64x64xf32>
    %209 = vector.broadcast %207 : vector<64x1xf32> to vector<64x64xf32>
    %210 = arith.mulf %208, %209 : vector<64x64xf32>
    %c5_76 = arith.constant 5 : index
    %c0_77 = arith.constant 0 : index
    %c0_78 = arith.constant 0 : index
    %211 = vector.load %arg23[%c5_76, %c0_77, %c0_78] : memref<8x64x64xf32, #tpu.memory_space<vmem>>, vector<1x64x64xf32>
    %212 = vector.shape_cast %211 : vector<1x64x64xf32> to vector<64x64xf32>
    %213 = vector.shape_cast %210 : vector<64x64xf32> to vector<1x64x64xf32>
    tpu.vector_store %arg23[%c5_76, %c0_77, %c0_78], %213 {strides = array<i32>} : memref<8x64x64xf32, #tpu.memory_space<vmem>>, vector<1x64x64xf32>,
    %214 = vector.extract_strided_slice %114 {offsets = [6, 0], sizes = [1, 64], strides = [1, 1]} : vector<8x64xf32> to vector<1x64xf32>
    %215 = vector.broadcast %214 : vector<1x64xf32> to vector<64x64xf32>
    %216 = arith.mulf %215, %122 : vector<64x64xf32>
    %217 = math.exp %216 : vector<64x64xf32>
    %c6 = arith.constant 6 : index
    %c0_79 = arith.constant 0 : index
    %c0_80 = arith.constant 0 : index
    %218 = vector.load %arg22[%c6, %c0_79, %c0_80] : memref<8x64x64xf32, #tpu.memory_space<vmem>>, vector<1x64x64xf32>
    %219 = vector.shape_cast %218 : vector<1x64x64xf32> to vector<64x64xf32>
    %220 = vector.shape_cast %217 : vector<64x64xf32> to vector<1x64x64xf32>
    tpu.vector_store %arg22[%c6, %c0_79, %c0_80], %220 {strides = array<i32>} : memref<8x64x64xf32, #tpu.memory_space<vmem>>, vector<1x64x64xf32>,
    %221 = vector.extract_strided_slice %123 {offsets = [6, 0], sizes = [1, 64], strides = [1, 1]} : vector<8x64xf32> to vector<1x64xf32>
    %222 = vector.extract_strided_slice %117 {offsets = [0, 6], sizes = [64, 1], strides = [1, 1]} : vector<64x8xf32> to vector<64x1xf32>
    %223 = vector.broadcast %221 : vector<1x64xf32> to vector<64x64xf32>
    %224 = vector.broadcast %222 : vector<64x1xf32> to vector<64x64xf32>
    %225 = arith.mulf %223, %224 : vector<64x64xf32>
    %c6_81 = arith.constant 6 : index
    %c0_82 = arith.constant 0 : index
    %c0_83 = arith.constant 0 : index
    %226 = vector.load %arg23[%c6_81, %c0_82, %c0_83] : memref<8x64x64xf32, #tpu.memory_space<vmem>>, vector<1x64x64xf32>
    %227 = vector.shape_cast %226 : vector<1x64x64xf32> to vector<64x64xf32>
    %228 = vector.shape_cast %225 : vector<64x64xf32> to vector<1x64x64xf32>
    tpu.vector_store %arg23[%c6_81, %c0_82, %c0_83], %228 {strides = array<i32>} : memref<8x64x64xf32, #tpu.memory_space<vmem>>, vector<1x64x64xf32>,
    %229 = vector.extract_strided_slice %114 {offsets = [7, 0], sizes = [1, 64], strides = [1, 1]} : vector<8x64xf32> to vector<1x64xf32>
    %230 = vector.broadcast %229 : vector<1x64xf32> to vector<64x64xf32>
    %231 = arith.mulf %230, %122 : vector<64x64xf32>
    %232 = math.exp %231 : vector<64x64xf32>
    %c7 = arith.constant 7 : index
    %c0_84 = arith.constant 0 : index
    %c0_85 = arith.constant 0 : index
    %233 = vector.load %arg22[%c7, %c0_84, %c0_85] : memref<8x64x64xf32, #tpu.memory_space<vmem>>, vector<1x64x64xf32>
    %234 = vector.shape_cast %233 : vector<1x64x64xf32> to vector<64x64xf32>
    %235 = vector.shape_cast %232 : vector<64x64xf32> to vector<1x64x64xf32>
    tpu.vector_store %arg22[%c7, %c0_84, %c0_85], %235 {strides = array<i32>} : memref<8x64x64xf32, #tpu.memory_space<vmem>>, vector<1x64x64xf32>,
    %236 = vector.extract_strided_slice %123 {offsets = [7, 0], sizes = [1, 64], strides = [1, 1]} : vector<8x64xf32> to vector<1x64xf32>
    %237 = vector.extract_strided_slice %117 {offsets = [0, 7], sizes = [64, 1], strides = [1, 1]} : vector<64x8xf32> to vector<64x1xf32>
    %238 = vector.broadcast %236 : vector<1x64xf32> to vector<64x64xf32>
    %239 = vector.broadcast %237 : vector<64x1xf32> to vector<64x64xf32>
    %240 = arith.mulf %238, %239 : vector<64x64xf32>
    %c7_86 = arith.constant 7 : index
    %c0_87 = arith.constant 0 : index
    %c0_88 = arith.constant 0 : index
    %241 = vector.load %arg23[%c7_86, %c0_87, %c0_88] : memref<8x64x64xf32, #tpu.memory_space<vmem>>, vector<1x64x64xf32>
    %242 = vector.shape_cast %241 : vector<1x64x64xf32> to vector<64x64xf32>
    %243 = vector.shape_cast %240 : vector<64x64xf32> to vector<1x64x64xf32>
    tpu.vector_store %arg23[%c7_86, %c0_87, %c0_88], %243 {strides = array<i32>} : memref<8x64x64xf32, #tpu.memory_space<vmem>>, vector<1x64x64xf32>,
    %cst_89 = arith.constant 0.000000e+00 : f32
    %244 = vector.broadcast %cst_89 : f32 to vector<64x64xf32>
    %c0_i32_90 = arith.constant 0 : i32
    %245 = arith.index_cast %c0_i32_90 : i32 to index
    %c0_91 = arith.constant 0 : index
    %c0_92 = arith.constant 0 : index
    %246 = vector.load %arg22[%245, %c0_91, %c0_92] : memref<8x64x64xf32, #tpu.memory_space<vmem>>, vector<1x64x64xf32>
    %247 = vector.shape_cast %246 : vector<1x64x64xf32> to vector<64x64xf32>
    %248 = arith.mulf %247, %244 : vector<64x64xf32>
    %249 = arith.index_cast %c0_i32_90 : i32 to index
    %c0_93 = arith.constant 0 : index
    %c0_94 = arith.constant 0 : index
    %250 = vector.load %arg23[%249, %c0_93, %c0_94] : memref<8x64x64xf32, #tpu.memory_space<vmem>>, vector<1x64x64xf32>
    %251 = vector.shape_cast %250 : vector<1x64x64xf32> to vector<64x64xf32>
    %252 = arith.addf %248, %251 : vector<64x64xf32>
    %253 = arith.index_cast %c0_i32_90 : i32 to index
    %c0_95 = arith.constant 0 : index
    %c0_96 = arith.constant 0 : index
    %254 = vector.load %arg23[%253, %c0_95, %c0_96] : memref<8x64x64xf32, #tpu.memory_space<vmem>>, vector<1x64x64xf32>
    %255 = vector.shape_cast %254 : vector<1x64x64xf32> to vector<64x64xf32>
    %256 = vector.shape_cast %252 : vector<64x64xf32> to vector<1x64x64xf32>
    tpu.vector_store %arg23[%253, %c0_95, %c0_96], %256 {strides = array<i32>} : memref<8x64x64xf32, #tpu.memory_space<vmem>>, vector<1x64x64xf32>,
    %c1_i32_97 = arith.constant 1 : i32
    %257 = arith.index_cast %c1_i32_97 : i32 to index
    %c0_98 = arith.constant 0 : index
    %c0_99 = arith.constant 0 : index
    %258 = vector.load %arg22[%257, %c0_98, %c0_99] : memref<8x64x64xf32, #tpu.memory_space<vmem>>, vector<1x64x64xf32>
    %259 = vector.shape_cast %258 : vector<1x64x64xf32> to vector<64x64xf32>
    %260 = arith.mulf %259, %252 : vector<64x64xf32>
    %261 = arith.index_cast %c1_i32_97 : i32 to index
    %c0_100 = arith.constant 0 : index
    %c0_101 = arith.constant 0 : index
    %262 = vector.load %arg23[%261, %c0_100, %c0_101] : memref<8x64x64xf32, #tpu.memory_space<vmem>>, vector<1x64x64xf32>
    %263 = vector.shape_cast %262 : vector<1x64x64xf32> to vector<64x64xf32>
    %264 = arith.addf %260, %263 : vector<64x64xf32>
    %265 = arith.index_cast %c1_i32_97 : i32 to index
    %c0_102 = arith.constant 0 : index
    %c0_103 = arith.constant 0 : index
    %266 = vector.load %arg23[%265, %c0_102, %c0_103] : memref<8x64x64xf32, #tpu.memory_space<vmem>>, vector<1x64x64xf32>
    %267 = vector.shape_cast %266 : vector<1x64x64xf32> to vector<64x64xf32>
    %268 = vector.shape_cast %264 : vector<64x64xf32> to vector<1x64x64xf32>
    tpu.vector_store %arg23[%265, %c0_102, %c0_103], %268 {strides = array<i32>} : memref<8x64x64xf32, #tpu.memory_space<vmem>>, vector<1x64x64xf32>,
    %c2_i32_104 = arith.constant 2 : i32
    %269 = arith.index_cast %c2_i32_104 : i32 to index
    %c0_105 = arith.constant 0 : index
    %c0_106 = arith.constant 0 : index
    %270 = vector.load %arg22[%269, %c0_105, %c0_106] : memref<8x64x64xf32, #tpu.memory_space<vmem>>, vector<1x64x64xf32>
    %271 = vector.shape_cast %270 : vector<1x64x64xf32> to vector<64x64xf32>
    %272 = arith.mulf %271, %264 : vector<64x64xf32>
    %273 = arith.index_cast %c2_i32_104 : i32 to index
    %c0_107 = arith.constant 0 : index
    %c0_108 = arith.constant 0 : index
    %274 = vector.load %arg23[%273, %c0_107, %c0_108] : memref<8x64x64xf32, #tpu.memory_space<vmem>>, vector<1x64x64xf32>
    %275 = vector.shape_cast %274 : vector<1x64x64xf32> to vector<64x64xf32>
    %276 = arith.addf %272, %275 : vector<64x64xf32>
    %277 = arith.index_cast %c2_i32_104 : i32 to index
    %c0_109 = arith.constant 0 : index
    %c0_110 = arith.constant 0 : index
    %278 = vector.load %arg23[%277, %c0_109, %c0_110] : memref<8x64x64xf32, #tpu.memory_space<vmem>>, vector<1x64x64xf32>
    %279 = vector.shape_cast %278 : vector<1x64x64xf32> to vector<64x64xf32>
    %280 = vector.shape_cast %276 : vector<64x64xf32> to vector<1x64x64xf32>
    tpu.vector_store %arg23[%277, %c0_109, %c0_110], %280 {strides = array<i32>} : memref<8x64x64xf32, #tpu.memory_space<vmem>>, vector<1x64x64xf32>,
    %c3_i32_111 = arith.constant 3 : i32
    %281 = arith.index_cast %c3_i32_111 : i32 to index
    %c0_112 = arith.constant 0 : index
    %c0_113 = arith.constant 0 : index
    %282 = vector.load %arg22[%281, %c0_112, %c0_113] : memref<8x64x64xf32, #tpu.memory_space<vmem>>, vector<1x64x64xf32>
    %283 = vector.shape_cast %282 : vector<1x64x64xf32> to vector<64x64xf32>
    %284 = arith.mulf %283, %276 : vector<64x64xf32>
    %285 = arith.index_cast %c3_i32_111 : i32 to index
    %c0_114 = arith.constant 0 : index
    %c0_115 = arith.constant 0 : index
    %286 = vector.load %arg23[%285, %c0_114, %c0_115] : memref<8x64x64xf32, #tpu.memory_space<vmem>>, vector<1x64x64xf32>
    %287 = vector.shape_cast %286 : vector<1x64x64xf32> to vector<64x64xf32>
    %288 = arith.addf %284, %287 : vector<64x64xf32>
    %289 = arith.index_cast %c3_i32_111 : i32 to index
    %c0_116 = arith.constant 0 : index
    %c0_117 = arith.constant 0 : index
    %290 = vector.load %arg23[%289, %c0_116, %c0_117] : memref<8x64x64xf32, #tpu.memory_space<vmem>>, vector<1x64x64xf32>
    %291 = vector.shape_cast %290 : vector<1x64x64xf32> to vector<64x64xf32>
    %292 = vector.shape_cast %288 : vector<64x64xf32> to vector<1x64x64xf32>
    tpu.vector_store %arg23[%289, %c0_116, %c0_117], %292 {strides = array<i32>} : memref<8x64x64xf32, #tpu.memory_space<vmem>>, vector<1x64x64xf32>,
    %c4_i32 = arith.constant 4 : i32
    %293 = arith.index_cast %c4_i32 : i32 to index
    %c0_118 = arith.constant 0 : index
    %c0_119 = arith.constant 0 : index
    %294 = vector.load %arg22[%293, %c0_118, %c0_119] : memref<8x64x64xf32, #tpu.memory_space<vmem>>, vector<1x64x64xf32>
    %295 = vector.shape_cast %294 : vector<1x64x64xf32> to vector<64x64xf32>
    %296 = arith.mulf %295, %288 : vector<64x64xf32>
    %297 = arith.index_cast %c4_i32 : i32 to index
    %c0_120 = arith.constant 0 : index
    %c0_121 = arith.constant 0 : index
    %298 = vector.load %arg23[%297, %c0_120, %c0_121] : memref<8x64x64xf32, #tpu.memory_space<vmem>>, vector<1x64x64xf32>
    %299 = vector.shape_cast %298 : vector<1x64x64xf32> to vector<64x64xf32>
    %300 = arith.addf %296, %299 : vector<64x64xf32>
    %301 = arith.index_cast %c4_i32 : i32 to index
    %c0_122 = arith.constant 0 : index
    %c0_123 = arith.constant 0 : index
    %302 = vector.load %arg23[%301, %c0_122, %c0_123] : memref<8x64x64xf32, #tpu.memory_space<vmem>>, vector<1x64x64xf32>
    %303 = vector.shape_cast %302 : vector<1x64x64xf32> to vector<64x64xf32>
    %304 = vector.shape_cast %300 : vector<64x64xf32> to vector<1x64x64xf32>
    tpu.vector_store %arg23[%301, %c0_122, %c0_123], %304 {strides = array<i32>} : memref<8x64x64xf32, #tpu.memory_space<vmem>>, vector<1x64x64xf32>,
    %c5_i32 = arith.constant 5 : i32
    %305 = arith.index_cast %c5_i32 : i32 to index
    %c0_124 = arith.constant 0 : index
    %c0_125 = arith.constant 0 : index
    %306 = vector.load %arg22[%305, %c0_124, %c0_125] : memref<8x64x64xf32, #tpu.memory_space<vmem>>, vector<1x64x64xf32>
    %307 = vector.shape_cast %306 : vector<1x64x64xf32> to vector<64x64xf32>
    %308 = arith.mulf %307, %300 : vector<64x64xf32>
    %309 = arith.index_cast %c5_i32 : i32 to index
    %c0_126 = arith.constant 0 : index
    %c0_127 = arith.constant 0 : index
    %310 = vector.load %arg23[%309, %c0_126, %c0_127] : memref<8x64x64xf32, #tpu.memory_space<vmem>>, vector<1x64x64xf32>
    %311 = vector.shape_cast %310 : vector<1x64x64xf32> to vector<64x64xf32>
    %312 = arith.addf %308, %311 : vector<64x64xf32>
    %313 = arith.index_cast %c5_i32 : i32 to index
    %c0_128 = arith.constant 0 : index
    %c0_129 = arith.constant 0 : index
    %314 = vector.load %arg23[%313, %c0_128, %c0_129] : memref<8x64x64xf32, #tpu.memory_space<vmem>>, vector<1x64x64xf32>
    %315 = vector.shape_cast %314 : vector<1x64x64xf32> to vector<64x64xf32>
    %316 = vector.shape_cast %312 : vector<64x64xf32> to vector<1x64x64xf32>
    tpu.vector_store %arg23[%313, %c0_128, %c0_129], %316 {strides = array<i32>} : memref<8x64x64xf32, #tpu.memory_space<vmem>>, vector<1x64x64xf32>,
    %c6_i32 = arith.constant 6 : i32
    %317 = arith.index_cast %c6_i32 : i32 to index
    %c0_130 = arith.constant 0 : index
    %c0_131 = arith.constant 0 : index
    %318 = vector.load %arg22[%317, %c0_130, %c0_131] : memref<8x64x64xf32, #tpu.memory_space<vmem>>, vector<1x64x64xf32>
    %319 = vector.shape_cast %318 : vector<1x64x64xf32> to vector<64x64xf32>
    %320 = arith.mulf %319, %312 : vector<64x64xf32>
    %321 = arith.index_cast %c6_i32 : i32 to index
    %c0_132 = arith.constant 0 : index
    %c0_133 = arith.constant 0 : index
    %322 = vector.load %arg23[%321, %c0_132, %c0_133] : memref<8x64x64xf32, #tpu.memory_space<vmem>>, vector<1x64x64xf32>
    %323 = vector.shape_cast %322 : vector<1x64x64xf32> to vector<64x64xf32>
    %324 = arith.addf %320, %323 : vector<64x64xf32>
    %325 = arith.index_cast %c6_i32 : i32 to index
    %c0_134 = arith.constant 0 : index
    %c0_135 = arith.constant 0 : index
    %326 = vector.load %arg23[%325, %c0_134, %c0_135] : memref<8x64x64xf32, #tpu.memory_space<vmem>>, vector<1x64x64xf32>
    %327 = vector.shape_cast %326 : vector<1x64x64xf32> to vector<64x64xf32>
    %328 = vector.shape_cast %324 : vector<64x64xf32> to vector<1x64x64xf32>
    tpu.vector_store %arg23[%325, %c0_134, %c0_135], %328 {strides = array<i32>} : memref<8x64x64xf32, #tpu.memory_space<vmem>>, vector<1x64x64xf32>,
    %c7_i32 = arith.constant 7 : i32
    %329 = arith.index_cast %c7_i32 : i32 to index
    %c0_136 = arith.constant 0 : index
    %c0_137 = arith.constant 0 : index
    %330 = vector.load %arg22[%329, %c0_136, %c0_137] : memref<8x64x64xf32, #tpu.memory_space<vmem>>, vector<1x64x64xf32>
    %331 = vector.shape_cast %330 : vector<1x64x64xf32> to vector<64x64xf32>
    %332 = arith.mulf %331, %324 : vector<64x64xf32>
    %333 = arith.index_cast %c7_i32 : i32 to index
    %c0_138 = arith.constant 0 : index
    %c0_139 = arith.constant 0 : index
    %334 = vector.load %arg23[%333, %c0_138, %c0_139] : memref<8x64x64xf32, #tpu.memory_space<vmem>>, vector<1x64x64xf32>
    %335 = vector.shape_cast %334 : vector<1x64x64xf32> to vector<64x64xf32>
    %336 = arith.addf %332, %335 : vector<64x64xf32>
    %337 = arith.index_cast %c7_i32 : i32 to index
    %c0_140 = arith.constant 0 : index
    %c0_141 = arith.constant 0 : index
    %338 = vector.load %arg23[%337, %c0_140, %c0_141] : memref<8x64x64xf32, #tpu.memory_space<vmem>>, vector<1x64x64xf32>
    %339 = vector.shape_cast %338 : vector<1x64x64xf32> to vector<64x64xf32>
    %340 = vector.shape_cast %336 : vector<64x64xf32> to vector<1x64x64xf32>
    tpu.vector_store %arg23[%337, %c0_140, %c0_141], %340 {strides = array<i32>} : memref<8x64x64xf32, #tpu.memory_space<vmem>>, vector<1x64x64xf32>,
    %c8_i32_142 = arith.constant 8 : i32
    %c0_143 = arith.constant 0 : index
    %c0_144 = arith.constant 0 : index
    %c0_145 = arith.constant 0 : index
    %341 = vector.load %arg23[%c0_143, %c0_144, %c0_145] : memref<8x64x64xf32, #tpu.memory_space<vmem>>, vector<1x64x64xf32>
    %342 = vector.shape_cast %341 : vector<1x64x64xf32> to vector<64x64xf32>
    %343 = vector.extract_strided_slice %118 {offsets = [0, 0], sizes = [64, 1], strides = [1, 1]} : vector<64x8xf32> to vector<64x1xf32>
    %344 = vector.broadcast %343 : vector<64x1xf32> to vector<64x64xf32>
    %345 = arith.mulf %342, %344 : vector<64x64xf32>
    %cst_146 = arith.constant dense<0.000000e+00> : vector<64xf32>
    %346 = vector.multi_reduction <add>, %345, %cst_146 [0] : vector<64x64xf32> to vector<64xf32>
    %347 = vector.shape_cast %346 : vector<64xf32> to vector<1x64xf32>
    %c1_147 = arith.constant 1 : index
    %c0_148 = arith.constant 0 : index
    %c0_149 = arith.constant 0 : index
    %348 = vector.load %arg23[%c1_147, %c0_148, %c0_149] : memref<8x64x64xf32, #tpu.memory_space<vmem>>, vector<1x64x64xf32>
    %349 = vector.shape_cast %348 : vector<1x64x64xf32> to vector<64x64xf32>
    %350 = vector.extract_strided_slice %118 {offsets = [0, 1], sizes = [64, 1], strides = [1, 1]} : vector<64x8xf32> to vector<64x1xf32>
    %351 = vector.broadcast %350 : vector<64x1xf32> to vector<64x64xf32>
    %352 = arith.mulf %349, %351 : vector<64x64xf32>
    %cst_150 = arith.constant dense<0.000000e+00> : vector<64xf32>
    %353 = vector.multi_reduction <add>, %352, %cst_150 [0] : vector<64x64xf32> to vector<64xf32>
    %354 = vector.shape_cast %353 : vector<64xf32> to vector<1x64xf32>
    %c2_151 = arith.constant 2 : index
    %c0_152 = arith.constant 0 : index
    %c0_153 = arith.constant 0 : index
    %355 = vector.load %arg23[%c2_151, %c0_152, %c0_153] : memref<8x64x64xf32, #tpu.memory_space<vmem>>, vector<1x64x64xf32>
    %356 = vector.shape_cast %355 : vector<1x64x64xf32> to vector<64x64xf32>
    %357 = vector.extract_strided_slice %118 {offsets = [0, 2], sizes = [64, 1], strides = [1, 1]} : vector<64x8xf32> to vector<64x1xf32>
    %358 = vector.broadcast %357 : vector<64x1xf32> to vector<64x64xf32>
    %359 = arith.mulf %356, %358 : vector<64x64xf32>
    %cst_154 = arith.constant dense<0.000000e+00> : vector<64xf32>
    %360 = vector.multi_reduction <add>, %359, %cst_154 [0] : vector<64x64xf32> to vector<64xf32>
    %361 = vector.shape_cast %360 : vector<64xf32> to vector<1x64xf32>
    %c3_155 = arith.constant 3 : index
    %c0_156 = arith.constant 0 : index
    %c0_157 = arith.constant 0 : index
    %362 = vector.load %arg23[%c3_155, %c0_156, %c0_157] : memref<8x64x64xf32, #tpu.memory_space<vmem>>, vector<1x64x64xf32>
    %363 = vector.shape_cast %362 : vector<1x64x64xf32> to vector<64x64xf32>
    %364 = vector.extract_strided_slice %118 {offsets = [0, 3], sizes = [64, 1], strides = [1, 1]} : vector<64x8xf32> to vector<64x1xf32>
    %365 = vector.broadcast %364 : vector<64x1xf32> to vector<64x64xf32>
    %366 = arith.mulf %363, %365 : vector<64x64xf32>
    %cst_158 = arith.constant dense<0.000000e+00> : vector<64xf32>
    %367 = vector.multi_reduction <add>, %366, %cst_158 [0] : vector<64x64xf32> to vector<64xf32>
    %368 = vector.shape_cast %367 : vector<64xf32> to vector<1x64xf32>
    %c4_159 = arith.constant 4 : index
    %c0_160 = arith.constant 0 : index
    %c0_161 = arith.constant 0 : index
    %369 = vector.load %arg23[%c4_159, %c0_160, %c0_161] : memref<8x64x64xf32, #tpu.memory_space<vmem>>, vector<1x64x64xf32>
    %370 = vector.shape_cast %369 : vector<1x64x64xf32> to vector<64x64xf32>
    %371 = vector.extract_strided_slice %118 {offsets = [0, 4], sizes = [64, 1], strides = [1, 1]} : vector<64x8xf32> to vector<64x1xf32>
    %372 = vector.broadcast %371 : vector<64x1xf32> to vector<64x64xf32>
    %373 = arith.mulf %370, %372 : vector<64x64xf32>
    %cst_162 = arith.constant dense<0.000000e+00> : vector<64xf32>
    %374 = vector.multi_reduction <add>, %373, %cst_162 [0] : vector<64x64xf32> to vector<64xf32>
    %375 = vector.shape_cast %374 : vector<64xf32> to vector<1x64xf32>
    %c5_163 = arith.constant 5 : index
    %c0_164 = arith.constant 0 : index
    %c0_165 = arith.constant 0 : index
    %376 = vector.load %arg23[%c5_163, %c0_164, %c0_165] : memref<8x64x64xf32, #tpu.memory_space<vmem>>, vector<1x64x64xf32>
    %377 = vector.shape_cast %376 : vector<1x64x64xf32> to vector<64x64xf32>
    %378 = vector.extract_strided_slice %118 {offsets = [0, 5], sizes = [64, 1], strides = [1, 1]} : vector<64x8xf32> to vector<64x1xf32>
    %379 = vector.broadcast %378 : vector<64x1xf32> to vector<64x64xf32>
    %380 = arith.mulf %377, %379 : vector<64x64xf32>
    %cst_166 = arith.constant dense<0.000000e+00> : vector<64xf32>
    %381 = vector.multi_reduction <add>, %380, %cst_166 [0] : vector<64x64xf32> to vector<64xf32>
    %382 = vector.shape_cast %381 : vector<64xf32> to vector<1x64xf32>
    %c6_167 = arith.constant 6 : index
    %c0_168 = arith.constant 0 : index
    %c0_169 = arith.constant 0 : index
    %383 = vector.load %arg23[%c6_167, %c0_168, %c0_169] : memref<8x64x64xf32, #tpu.memory_space<vmem>>, vector<1x64x64xf32>
    %384 = vector.shape_cast %383 : vector<1x64x64xf32> to vector<64x64xf32>
    %385 = vector.extract_strided_slice %118 {offsets = [0, 6], sizes = [64, 1], strides = [1, 1]} : vector<64x8xf32> to vector<64x1xf32>
    %386 = vector.broadcast %385 : vector<64x1xf32> to vector<64x64xf32>
    %387 = arith.mulf %384, %386 : vector<64x64xf32>
    %cst_170 = arith.constant dense<0.000000e+00> : vector<64xf32>
    %388 = vector.multi_reduction <add>, %387, %cst_170 [0] : vector<64x64xf32> to vector<64xf32>
    %389 = vector.shape_cast %388 : vector<64xf32> to vector<1x64xf32>
    %c7_171 = arith.constant 7 : index
    %c0_172 = arith.constant 0 : index
    %c0_173 = arith.constant 0 : index
    %390 = vector.load %arg23[%c7_171, %c0_172, %c0_173] : memref<8x64x64xf32, #tpu.memory_space<vmem>>, vector<1x64x64xf32>
    %391 = vector.shape_cast %390 : vector<1x64x64xf32> to vector<64x64xf32>
    %392 = vector.extract_strided_slice %118 {offsets = [0, 7], sizes = [64, 1], strides = [1, 1]} : vector<64x8xf32> to vector<64x1xf32>
    %393 = vector.broadcast %392 : vector<64x1xf32> to vector<64x64xf32>
    %394 = arith.mulf %391, %393 : vector<64x64xf32>
    %cst_174 = arith.constant dense<0.000000e+00> : vector<64xf32>
    %395 = vector.multi_reduction <add>, %394, %cst_174 [0] : vector<64x64xf32> to vector<64xf32>
    %396 = vector.shape_cast %395 : vector<64xf32> to vector<1x64xf32>
    %397 = tpu.concatenate %347, %354, %361, %368, %375, %382, %389, %396 in 0 : vector<1x64xf32>, vector<1x64xf32>, vector<1x64xf32>, vector<1x64xf32>, vector<1x64xf32>, vector<1x64xf32>, vector<1x64xf32>, vector<1x64xf32> -> vector<8x64xf32>
    %c0_175 = arith.constant 0 : index
    %c0_176 = arith.constant 0 : index
    %398 = vector.load %arg21[%c0_175, %c0_176] : memref<8x64xf32, #tpu.memory_space<vmem>>, vector<8x64xf32>
    tpu.vector_store %arg21[%c0_175, %c0_176], %397 {strides = array<i32>} : memref<8x64xf32, #tpu.memory_space<vmem>>, vector<8x64xf32>,
    %c0_177 = arith.constant 0 : index
    %c0_178 = arith.constant 0 : index
    %399 = vector.load %arg21[%c0_177, %c0_178] : memref<8x64xf32, #tpu.memory_space<vmem>>, vector<8x64xf32>
    %c0_179 = arith.constant 0 : index
    %c0_180 = arith.constant 0 : index
    %400 = vector.load %arg12[%c0_179, %c0_180] : memref<1x64xf32, #tpu.memory_space<vmem>>, vector<1x64xf32>
    %401 = vector.broadcast %400 : vector<1x64xf32> to vector<8x64xf32>
    %402 = arith.mulf %87, %401 : vector<8x64xf32>
    %403 = arith.addf %399, %402 : vector<8x64xf32>
    %404 = arith.negf %27 : vector<8x64xf32>
    %405 = math.exp %404 : vector<8x64xf32>
    %cst_181 = arith.constant 1.000000e+00 : f32
    %406 = vector.broadcast %cst_181 : f32 to vector<8x64xf32>
    %407 = arith.addf %406, %405 : vector<8x64xf32>
    %408 = arith.divf %406, %407 : vector<8x64xf32>
    %409 = arith.mulf %27, %408 : vector<8x64xf32>
    %410 = arith.mulf %403, %409 : vector<8x64xf32>
    %411 = arith.truncf %410 : vector<8x64xf32> to vector<8x64xbf16>
    %c0_182 = arith.constant 0 : index
    %c0_183 = arith.constant 0 : index
    %412 = vector.load %arg13[%c0_182, %c0_183] : memref<64x32xbf16, #tpu.memory_space<vmem>>, vector<64x32xbf16>
    %cst_184 = arith.constant dense<0.000000e+00> : vector<8x32xf32>
    %413 = tpu.matmul %411, %412, %cst_184 {dimension_numbers = #tpu.dot_dimension_numbers<[1], [0], [0], [1], [0, 0, 1, 1], [], []>} : vector<8x64xbf16>, vector<64x32xbf16>, vector<8x32xf32> -> vector<8x32xf32>
    %414 = arith.addf %0, %413 : vector<8x32xf32>
    %c0_185 = arith.constant 0 : index
    %c0_186 = arith.constant 0 : index
    %415 = vector.load %arg14[%c0_185, %c0_186] : memref<1x32xf32, #tpu.memory_space<vmem>>, vector<1x32xf32>
    %c0_187 = arith.constant 0 : index
    %c0_188 = arith.constant 0 : index
    %416 = vector.load %arg15[%c0_187, %c0_188] : memref<1x32xf32, #tpu.memory_space<vmem>>, vector<1x32xf32>
    %cst_189 = arith.constant dense<0.000000e+00> : vector<8xf32>
    %417 = vector.multi_reduction <add>, %414, %cst_189 [1] : vector<8x32xf32> to vector<8xf32>
    %418 = vector.shape_cast %417 : vector<8xf32> to vector<8x1xf32>
    %cst_190 = arith.constant 3.200000e+01 : f32
    %419 = vector.broadcast %cst_190 : f32 to vector<8x1xf32>
    %420 = arith.divf %418, %419 : vector<8x1xf32>
    %421 = vector.broadcast %420 : vector<8x1xf32> to vector<8x32xf32>
    %422 = arith.subf %414, %421 : vector<8x32xf32>
    %423 = arith.mulf %422, %422 : vector<8x32xf32>
    %cst_191 = arith.constant dense<0.000000e+00> : vector<8xf32>
    %424 = vector.multi_reduction <add>, %423, %cst_191 [1] : vector<8x32xf32> to vector<8xf32>
    %425 = vector.shape_cast %424 : vector<8xf32> to vector<8x1xf32>
    %cst_192 = arith.constant 3.200000e+01 : f32
    %426 = vector.broadcast %cst_192 : f32 to vector<8x1xf32>
    %427 = arith.divf %425, %426 : vector<8x1xf32>
    %cst_193 = arith.constant 9.99999974E-6 : f32
    %428 = vector.broadcast %cst_193 : f32 to vector<8x1xf32>
    %429 = arith.addf %427, %428 : vector<8x1xf32>
    %430 = math.rsqrt %429 : vector<8x1xf32>
    %431 = vector.broadcast %430 : vector<8x1xf32> to vector<8x32xf32>
    %432 = arith.mulf %422, %431 : vector<8x32xf32>
    %433 = vector.broadcast %415 : vector<1x32xf32> to vector<8x32xf32>
    %434 = arith.mulf %432, %433 : vector<8x32xf32>
    %435 = vector.broadcast %416 : vector<1x32xf32> to vector<8x32xf32>
    %436 = arith.addf %434, %435 : vector<8x32xf32>
    %437 = arith.truncf %436 : vector<8x32xf32> to vector<8x32xbf16>
    %c0_194 = arith.constant 0 : index
    %c0_195 = arith.constant 0 : index
    %438 = vector.load %arg16[%c0_194, %c0_195] : memref<32x32xbf16, #tpu.memory_space<vmem>>, vector<32x32xbf16>
    %cst_196 = arith.constant dense<0.000000e+00> : vector<8x32xf32>
    %439 = tpu.matmul %437, %438, %cst_196 {dimension_numbers = #tpu.dot_dimension_numbers<[1], [0], [0], [1], [0, 0, 1, 1], [], []>} : vector<8x32xbf16>, vector<32x32xbf16>, vector<8x32xf32> -> vector<8x32xf32>
    %c0_197 = arith.constant 0 : index
    %c0_198 = arith.constant 0 : index
    %440 = vector.load %arg17[%c0_197, %c0_198] : memref<1x32xf32, #tpu.memory_space<vmem>>, vector<1x32xf32>
    %441 = vector.broadcast %440 : vector<1x32xf32> to vector<8x32xf32>
    %442 = arith.addf %439, %441 : vector<8x32xf32>
    %cst_199 = arith.constant 5.000000e-01 : f32
    %443 = vector.broadcast %cst_199 : f32 to vector<8x32xf32>
    %444 = arith.mulf %443, %442 : vector<8x32xf32>
    %cst_200 = arith.constant 4.471500e-02 : f32
    %445 = vector.broadcast %cst_200 : f32 to vector<8x32xf32>
    %446 = arith.mulf %445, %442 : vector<8x32xf32>
    %447 = arith.mulf %446, %442 : vector<8x32xf32>
    %448 = arith.mulf %447, %442 : vector<8x32xf32>
    %449 = arith.addf %442, %448 : vector<8x32xf32>
    %cst_201 = arith.constant 0.797884583 : f32
    %450 = vector.broadcast %cst_201 : f32 to vector<8x32xf32>
    %451 = arith.mulf %450, %449 : vector<8x32xf32>
    %452 = math.tanh %451 : vector<8x32xf32>
    %cst_202 = arith.constant 1.000000e+00 : f32
    %453 = vector.broadcast %cst_202 : f32 to vector<8x32xf32>
    %454 = arith.addf %453, %452 : vector<8x32xf32>
    %455 = arith.mulf %444, %454 : vector<8x32xf32>
    %456 = arith.truncf %455 : vector<8x32xf32> to vector<8x32xbf16>
    %c0_203 = arith.constant 0 : index
    %c0_204 = arith.constant 0 : index
    %457 = vector.load %arg18[%c0_203, %c0_204] : memref<32x32xbf16, #tpu.memory_space<vmem>>, vector<32x32xbf16>
    %cst_205 = arith.constant dense<0.000000e+00> : vector<8x32xf32>
    %458 = tpu.matmul %456, %457, %cst_205 {dimension_numbers = #tpu.dot_dimension_numbers<[1], [0], [0], [1], [0, 0, 1, 1], [], []>} : vector<8x32xbf16>, vector<32x32xbf16>, vector<8x32xf32> -> vector<8x32xf32>
    %c0_206 = arith.constant 0 : index
    %c0_207 = arith.constant 0 : index
    %459 = vector.load %arg19[%c0_206, %c0_207] : memref<1x32xf32, #tpu.memory_space<vmem>>, vector<1x32xf32>
    %460 = vector.broadcast %459 : vector<1x32xf32> to vector<8x32xf32>
    %461 = arith.addf %458, %460 : vector<8x32xf32>
    %c0_208 = arith.constant 0 : index
    %c0_209 = arith.constant 0 : index
    %462 = vector.load %arg20[%c0_208, %c0_209] : memref<8x32xf32, #tpu.memory_space<vmem>>, vector<8x32xf32>
    tpu.vector_store %arg20[%c0_208, %c0_209], %461 {strides = array<i32>} : memref<8x32xf32, #tpu.memory_space<vmem>>, vector<8x32xf32>,
    return
  }
  func.func @transform_0(%arg0: i32) -> (i32, i32) {
    %c0_i32 = arith.constant 0 : i32
    %c0_i32_0 = arith.constant 0 : i32
    return %arg0, %c0_i32 : i32, i32
  }
  func.func @transform_1(%arg0: i32) -> (i32, i32) {
    %c0_i32 = arith.constant 0 : i32
    %c0_i32_0 = arith.constant 0 : i32
    %c0_i32_1 = arith.constant 0 : i32
    return %c0_i32, %c0_i32_0 : i32, i32
  }
  func.func @transform_2(%arg0: i32) -> (i32, i32) {
    %c0_i32 = arith.constant 0 : i32
    %c0_i32_0 = arith.constant 0 : i32
    %c0_i32_1 = arith.constant 0 : i32
    return %c0_i32, %c0_i32_0 : i32, i32
  }
  func.func @transform_3(%arg0: i32) -> (i32, i32) {
    %c0_i32 = arith.constant 0 : i32
    %c0_i32_0 = arith.constant 0 : i32
    %c0_i32_1 = arith.constant 0 : i32
    return %c0_i32, %c0_i32_0 : i32, i32
  }
  func.func @transform_4(%arg0: i32) -> (i32, i32) {
    %c0_i32 = arith.constant 0 : i32
    %c0_i32_0 = arith.constant 0 : i32
    %c0_i32_1 = arith.constant 0 : i32
    return %c0_i32, %c0_i32_0 : i32, i32
  }
  func.func @transform_5(%arg0: i32) -> (i32, i32) {
    %c0_i32 = arith.constant 0 : i32
    %c0_i32_0 = arith.constant 0 : i32
    %c0_i32_1 = arith.constant 0 : i32
    return %c0_i32, %c0_i32_0 : i32, i32
  }
  func.func @transform_6(%arg0: i32) -> (i32, i32) {
    %c0_i32 = arith.constant 0 : i32
    %c0_i32_0 = arith.constant 0 : i32
    %c0_i32_1 = arith.constant 0 : i32
    return %c0_i32, %c0_i32_0 : i32, i32
  }
  func.func @transform_7(%arg0: i32) -> (i32, i32) {
    %c0_i32 = arith.constant 0 : i32
    %c0_i32_0 = arith.constant 0 : i32
    %c0_i32_1 = arith.constant 0 : i32
    return %c0_i32, %c0_i32_0 : i32, i32
  }
  func.func @transform_8(%arg0: i32) -> (i32, i32) {
    %c0_i32 = arith.constant 0 : i32
    %c0_i32_0 = arith.constant 0 : i32
    %c0_i32_1 = arith.constant 0 : i32
    return %c0_i32, %c0_i32_0 : i32, i32
  }
  func.func @transform_9(%arg0: i32) -> (i32, i32) {
    %c0_i32 = arith.constant 0 : i32
    %c0_i32_0 = arith.constant 0 : i32
    %c0_i32_1 = arith.constant 0 : i32
    return %c0_i32, %c0_i32_0 : i32, i32
  }
  func.func @transform_10(%arg0: i32) -> (i32, i32) {
    %c0_i32 = arith.constant 0 : i32
    %c0_i32_0 = arith.constant 0 : i32
    %c0_i32_1 = arith.constant 0 : i32
    return %c0_i32, %c0_i32_0 : i32, i32
  }
  func.func @transform_11(%arg0: i32) -> (i32, i32) {
    %c0_i32 = arith.constant 0 : i32
    %c0_i32_0 = arith.constant 0 : i32
    %c0_i32_1 = arith.constant 0 : i32
    return %c0_i32, %c0_i32_0 : i32, i32
  }
  func.func @transform_12(%arg0: i32) -> (i32, i32) {
    %c0_i32 = arith.constant 0 : i32
    %c0_i32_0 = arith.constant 0 : i32
    %c0_i32_1 = arith.constant 0 : i32
    return %c0_i32, %c0_i32_0 : i32, i32
  }
  func.func @transform_13(%arg0: i32) -> (i32, i32) {
    %c0_i32 = arith.constant 0 : i32
    %c0_i32_0 = arith.constant 0 : i32
    %c0_i32_1 = arith.constant 0 : i32
    return %c0_i32, %c0_i32_0 : i32, i32
  }
  func.func @transform_14(%arg0: i32) -> (i32, i32) {
    %c0_i32 = arith.constant 0 : i32
    %c0_i32_0 = arith.constant 0 : i32
    %c0_i32_1 = arith.constant 0 : i32
    return %c0_i32, %c0_i32_0 : i32, i32
  }
  func.func @transform_15(%arg0: i32) -> (i32, i32) {
    %c0_i32 = arith.constant 0 : i32
    %c0_i32_0 = arith.constant 0 : i32
    %c0_i32_1 = arith.constant 0 : i32
    return %c0_i32, %c0_i32_0 : i32, i32
  }
  func.func @transform_16(%arg0: i32) -> (i32, i32) {
    %c0_i32 = arith.constant 0 : i32
    %c0_i32_0 = arith.constant 0 : i32
    %c0_i32_1 = arith.constant 0 : i32
    return %c0_i32, %c0_i32_0 : i32, i32
  }
  func.func @transform_17(%arg0: i32) -> (i32, i32) {
    %c0_i32 = arith.constant 0 : i32
    %c0_i32_0 = arith.constant 0 : i32
    %c0_i32_1 = arith.constant 0 : i32
    return %c0_i32, %c0_i32_0 : i32, i32
  }
  func.func @transform_18(%arg0: i32) -> (i32, i32) {
    %c0_i32 = arith.constant 0 : i32
    %c0_i32_0 = arith.constant 0 : i32
    %c0_i32_1 = arith.constant 0 : i32
    return %c0_i32, %c0_i32_0 : i32, i32
  }
  func.func @transform_19(%arg0: i32) -> (i32, i32) {
    %c0_i32 = arith.constant 0 : i32
    %c0_i32_0 = arith.constant 0 : i32
    return %arg0, %c0_i32 : i32, i32
  }
}

</mosaic_0001>

<bundles_post_ra>
// kernel: tpu_custom_call.1
= control target key start
LH: loop header
LB: loop body
LE: loop exit
PB: predicated region body
PF: predicated region fallthrough
CT: control target
= control target key end

     0   :  { %s4938_s0 = inlined_call_operand.vmem [shape: f32[16,32], index: 0, kind: input, shape index: {}]   ;;  %s4939_s1 = inlined_call_operand.hbm [shape: f32[1,32], index: 1, kind: input, shape index: {}]   ;;  %s4940_s2 = inlined_call_operand.vmem [shape: f32[1,32], index: 2, kind: input, shape index: {}]   ;;  %s4941_s3 = inlined_call_operand.vmem [shape: bf16[32,128], index: 3, kind: input, shape index: {}]   ;;  %s4942_s4 = inlined_call_operand.vmem [shape: f32[4,64], index: 4, kind: input, shape index: {}]   ;;  %s4943_s5 = inlined_call_operand.hbm [shape: f32[1,64], index: 5, kind: input, shape index: {}]   ;;  %s4944_s6 = inlined_call_operand.vmem [shape: bf16[64,8], index: 6, kind: input, shape index: {}]   ;;  %s4945_s7 = inlined_call_operand.vmem [shape: bf16[128,64], index: 7, kind: input, shape index: {}]   ;;  %s4946_s8 = inlined_call_operand.hbm [shape: f32[8,64], index: 8, kind: input, shape index: {}]   ;;  %s4947_s9 = inlined_call_operand.vmem [shape: f32[1,64], index: 9, kind: input, shape index: {}]   ;;  %s4948_s10 = inlined_call_operand.vmem [shape: f32[64,64], index: 10, kind: input, shape index: {}]   ;;  %s4949_s11 = inlined_call_operand.vmem [shape: f32[1,64], index: 11, kind: input, shape index: {}]   ;;  %s4950_s12 = inlined_call_operand.vmem [shape: bf16[64,32], index: 12, kind: input, shape index: {}]   ;;  %s4951_s13 = inlined_call_operand.vmem [shape: f32[1,32], index: 13, kind: input, shape index: {}]   ;;  %s4952_s14 = inlined_call_operand.vmem [shape: f32[1,32], index: 14, kind: input, shape index: {}]   ;;  %s4953_s15 = inlined_call_operand.vmem [shape: bf16[32,32], index: 15, kind: input, shape index: {}]   ;;  %s4954_s16 = inlined_call_operand.vmem [shape: f32[1,32], index: 16, kind: input, shape index: {}]   ;;  %s4955_s17 = inlined_call_operand.vmem [shape: bf16[32,32], index: 17, kind: input, shape index: {}]   ;;  %s4956_s18 = inlined_call_operand.vmem [shape: f32[1,32], index: 18, kind: input, shape index: {}]   ;;  %s4957_s19 = inlined_call_operand.hbm [shape: f32[16,32], index: 19, kind: output, shape index: {}]  }
   0x1   :  { %4971 = sst [smem:[#allocation22_spill]] %s4938_s0 }
   0x2   :  { %4972 = sst [smem:[#allocation23_spill]] %s4939_s1 }
   0x3   :  { %4973 = sst [smem:[#allocation24_spill]] %s4940_s2 }
   0x4   :  { %4974 = sst [smem:[#allocation25_spill]] %s4941_s3 }
   0x5   :  { %4975 = sst [smem:[#allocation26_spill]] %s4942_s4 }
   0x6   :  { %4976 = sst [smem:[#allocation27_spill]] %s4943_s5 }
   0x7   :  { %4977 = sst [smem:[#allocation28_spill]] %s4956_s18 }
   0x8   :  { %24 = vsyncpa [#allocation6], 0 }
   0x9   :  { %25 = vsyncpa [#allocation9], 0 }
   0xa   :  { %26 = vsyncpa [#allocation7], 0 }
   0xb   :  { %28 = vsyncpa [#allocation7 + $0x1], 0  ;;  %s3719_s0 = smov 0   ;;  %s3721_s30 = smov 0  }
   0xc   :  { %s3723_s20 = smov 0   ;;  %s3725_s21 = smov 0  }
   0xd LB: > { %4978 = sst [smem:[#allocation15_spill]] %s3592_s0  ;;  %s3740_s1 = sadd.s32 4294967295, %s3604_s21   ;;  %s3604_s21 = sphi %s3725_s21, %s5002_s21   ;;  %s3600_s20 = sphi %s3723_s20, %s5004_s20   ;;  %s3596_s30 = sphi %s3721_s30, %s5006_s30   ;;  %s3592_s0 = sphi %s3719_s0, %s5005_s0  }
   0xe   : > { %4979 = sst [smem:[#allocation16_spill]] %s3600_s20  ;;  %s2915_s22 = sadd.s32 4294967294, %s3604_s21  }
   0xf   : > { %4980 = sst [smem:[#allocation17_spill]] %s3604_s21  ;;  %s3744_s2 = sadd.s32 1, %s3604_s21  }
  0x10   : > { %4981 = sst [smem:[#allocation18_spill]] %s3744_s2  ;;  %s445_s23 = sadd.s32 1, %s3600_s20 }
  0x11   : > { %s442_s24 = ssub.s32 %s3604_s21, %s3744_s2  ;;  %p455_p0 = scmp.ne.s32.totalorder %s3600_s20, %s3596_s30 }
  0x12   : > { %p443_p1 = scmp.eq.s32.totalorder %s442_s24, 0  ;;  %p456_p2 = scmp.eq.s32.totalorder %s3740_s1, 1 }
  0x13   : > { %p461_p3 = scmp.ne.s32.totalorder %s3596_s30, %s3592_s0  ;;  %p462_p4 = scmp.eq.s32.totalorder %s2915_s22, 1 }
  0x14   : > { %s3755_s25 = scalar_select %p443_p1, %s3600_s20, %s445_s23  }
  0x15   : > { %p3757_p5 = por %p456_p2, %p455_p0  ;;  %p3761_p6 = por %p462_p4, %p461_p3 }
  0x16   : > { %4982 = sst [smem:[#allocation19_spill]] %s3755_s25  ;;  %p2916_p7 = scmp.ge.s32.totalorder %s3604_s21, 1 }
  0x17   : > { %s4984_s26 = scalar_select %p3761_p6, 1, 0 }
  0x18   : > { %p469_p8 = scmp.lt.s32.totalorder %s3604_s21, 3  ;;  %p3086_p9 = scmp.eq.s32.totalorder %s3740_s1, 0 }
  0x19   : > { %4985 = sst [smem:[#allocation20_spill]] %s4984_s26  ;;  %s3606_s23 = smov [#allocation8]  }
  0x1a   : > { %p3768_p10 = pnand %p2916_p7, %p469_p8  ;;  %s4987_s5 = sld [smem:[#allocation27_spill]] }
  0x1b   : > { %s504_s24 = sshll.u32 %s3606_s23, 4  ;;  %s4988_s2 = sld [smem:[#allocation23_spill]]  ;;  %s505_s24 = int_to_ptr.vmem [resolvable:$true] %s504_s24 }
  0x1c   : > { %p3072_p11 = pneg %p3768_p10  ;;  %s520_s18 = sshll.u32 %s4946_s8, 4  ;;  %s521_s18 = int_to_ptr.hbm [resolvable:$true] %s520_s18 }
  0x1d   : > { %s3607_s28 = smov [#allocation5]  }
  0x1e   : > { %p3073_p12 = pnand %p3086_p9, %p3072_p11  ;;  %s483_s29 = sshll.u32 %s3607_s28, 4  ;;  %s484_s29 = int_to_ptr.vmem [resolvable:$true] %s483_s29 }
  0x20   : > { %s502_s22 = sshll.u32 %s4987_s5, 4  ;;  %s3608_s5 = smov [#allocation10]   ;;  %s503_s22 = int_to_ptr.hbm [resolvable:$true] %s502_s22 }
  0x21   : > { %s481_s26 = sshll.u32 %s4988_s2, 4  ;;  %s522_s23 = sshll.u32 %s3608_s5, 4  ;;  %s482_s26 = int_to_ptr.hbm [resolvable:$true] %s481_s26  ;;  %s523_s23 = int_to_ptr.vmem [resolvable:$true] %s522_s23 }
  0x22   : > { %3078 = dma.hbm_to_vmem [thread:$0]  (!%p3073_p12), %s503_s22, 16, %s505_s24, [#allocation9]  }
  0x23   : > { %3075 = dma.hbm_to_vmem [thread:$0]  (!%p3073_p12), %s482_s26, 16, %s484_s29, [#allocation6]  }
  0x24   : > { %3081 = dma.hbm_to_vmem [thread:$0]  (!%p3073_p12), %s521_s18, 128, %s523_s23, [#allocation9]  }
  0x25   : > { %572 = sbr.rel (%p3768_p10) target bundleno = 1939 (0x793), region = 96 }
  0x2a   : > { %3579 = dma.done.wait (%p3086_p9), [#allocation6], 16  }
  0x2b   : > { %3581 = vsyncadd (%p3086_p9), [#allocation6], 4294967280 }
  0x2c   : > { %3583 = dma.done.wait (%p3086_p9), [#allocation9], 144  }
  0x2d   : > { %3585 = vsyncadd (%p3086_p9), [#allocation9], 4294967152  ;;  %p638_p13 = scmp.lt.s32.totalorder %s3740_s1, 1  ;;  %s4989_s21 = sld [smem:[#allocation22_spill]]  ;;  %vm646_vm0 = vcmask 261120   ;;  %v3609_v2 = vmov 32.0   ;;  %v722_v32 = vlaneseq }
  0x2e   : > { %3279 = vrcp.f32 %v3609_v2  ;;  %s4991_s27 = sld [smem:[#allocation25_spill]]  ;;  %v3266_v25 = vld [vmem:[#allocation5] ss:$0 sm:$0xff]  ;;  %v3039_v36 = vld [vmem:[%s4944_s6 + $0x18] sm:$0xff]  ;;  %vm720_vm5 = vcmask 1042432   ;;  %v3038_v38 = vld [vmem:[%s4944_s6 + $0x10] sm:$0xff] }
  0x2f   : > { %s639_s5 = scalar_select %p638_p13, %s3740_s1, 1  ;;  %v723_v33 = vshrl.u32 %v722_v32, 7  ;;  %835 = vmatpush.bf16.msra.mxu1 %v3039_v36  ;;  %v3268_v40 = vld [vmem:[#allocation8] ss:$0 sm:$0xff]  ;;  %vm753_vm8 = vcmask 1046528   ;;  %vm764_vm9 = vcmask 1045504  }
  0x30   : > { %s4992_s23 = sld [smem:[#allocation24_spill]]  ;;  %v3037_v50 = vld [vmem:[%s4944_s6 + $0x8] sm:$0xff]  ;;  %v3036_v61 = vld [vmem:[%s4944_s6] sm:$0xff]  ;;  %vm827_vm15 = vcmask 523264   ;;  %v3047_v32 = vld [vmem:[%s4945_s7 + $0x38] sm:$0xff]  ;;  %v4968_v36 = vmov 7  }
  0x31   : > { %s2926_s18 = sshll.u32 %s639_s5, 3  ;;  %v728_v34 = vand.u32 7, %v723_v33  ;;  %s4993_s4 = sld [smem:[#allocation26_spill]]  ;;  %v3614_v33 = vmov 4  }
  0x32   : > { %s3618_s0 = smov 64   ;;  %s3031_s20 = sshll.u32 %s3740_s1, 3 }
  0x33   : > { %s3800_s2 = scalar_lea.vmem %s4989_s21, %s2926_s18  ;;  %vm745_vm6 = vcmp.ge.s32.totalorder %v728_v34, 3  ;;  %vm751_vm7 = vcmp.ge.s32.totalorder %v728_v34, 2  ;;  %836 = vmatpush.bf16.msra.mxu1 %v3038_v38  ;;  %vm763_vm10 = vcmp.ge.s32.totalorder %v728_v34, 1  ;;  %v3615_v34 = vmov 5   ;;  %s2820_s26 = scalar_lea.hbm %s4957_s19, %s3031_s20 }
  0x34   : > { %v643_v0 = vld [vmem:[%s3800_s2] sm:$0xff]  ;;  %v3280_v3 = vpop.eup %3279  ;;  %v3035_v14 = vld [vmem:[%s4991_s27 + $0x8] sm:$0xff]  ;;  %s4998_s28 = sld [smem:[#allocation28_spill]]  ;;  %s2824_s5 = sshll.u32 %s2820_s26, 4  ;;  %s2825_s5 = int_to_ptr.hbm [resolvable:$true] %s2824_s5 }
  0x35   : > { %v647_v1 = vsel %vm646_vm0, %v643_v0, 0.0  ;;  %v651_v4 = vmul.f32 32.0, %v3280_v3  ;;  %vm655_vm1 = vweird.f32 %v3280_v3  ;;  %710 = vmatpush.bf16.msra.mxu0 %v3035_v14  ;;  %v3034_v15 = vld [vmem:[%s4991_s27] sm:$0xff]  ;;  %s3548_s18 = sshra.s32 %s2825_s5, 4  ;;  %s3549_s18 = int_to_ptr.hbm [resolvable:$true] %s3548_s18 }
  0x36   : > { %648 = vadd.xlane.f32.xlu0 %v647_v1  ;;  %v3267_v28 = vld [vmem:[%s4992_s23] ss:$0 sm:$0xff]  ;;  %p3555_p3 = scmp.lt.s32.totalorder %s3549_s18, %s4957_s19 }
  0x37   : > { %v652_v5 = vsub.f32 1.0, %v651_v4  ;;  %v3269_v35 = vld [vmem:[%s4993_s4 + $0x3] ss:$0 sm:$0xff]  ;;  %v3270_v42 = vld [vmem:[%s4993_s4] ss:$0 sm:$0xff]  ;;  %837 = vmatpush.bf16.msra.mxu1 %v3037_v50 }
  0x38   : > { %v3271_v45 = vld [vmem:[%s4993_s4 + $0x1] ss:$0 sm:$0xff]  ;;  %v3272_v55 = vld [vmem:[%s4993_s4 + $0x2] ss:$0 sm:$0xff]  ;;  %s3550_s4 = scalar_lea.hbm %s3549_s18, 8 }
  0x39   : > { %v653_v6 = vmul.f32 %v3280_v3, %v652_v5  ;;  %711 = vmatpush.bf16.msra.mxu0 %v3034_v15  ;;  %p3551_p0 = scmp.ne.s32.totalorder %s3549_s18, %s3550_s4 }
  0x3b   : > { %v654_v7 = vadd.f32 %v3280_v3, %v653_v6  ;;  %838 = vmatpush.bf16.msra.mxu1 %v3036_v61  ;;  %v1012_v61 = vld [vmem:[%s4948_s10 + $0x20] sm:$0xff]  ;;  %p3552_p1 = pnand %p3551_p0, %p3757_p5 }
  0x3d   : > { %v3804_v8 = vsel %vm655_vm1, %v3280_v3, %v654_v7  ;;  %p3553_p2 = pneg %p3552_p1 }
  0x3e   : > { %4990 = vst [vmem:[#allocation21_spill] sm:$0xff] %v3804_v8 }
  0xa9   : > { %v649_v9 = vpop.xlane.xlu0 %648 }
  0xaa   : > { %v657_v10 = vmul.f32 %v3804_v8, %v649_v9 }
  0xac   : > { %v658_v11 = vsub.f32 %v643_v0, %v657_v10 }
  0xae   : > { %v659_v12 = vmul.f32 %v658_v11, %v658_v11 }
  0xb0   : > { %v660_v13 = vsel %vm646_vm0, %v659_v12, 0.0 }
  0xb1   : > { %661 = vadd.xlane.f32.xlu0 %v660_v13  ;;  %v3610_v13 = vmov 0  }
  0xb2   : > { %3138 = vset.pattern.permute.xlu1 %v3610_v13  ;;  %3140 = vset.pattern.permute.xlu2 %v3610_v13 }
 0x124   : > { %v662_v16 = vpop.xlane.xlu0 %661 }
 0x125   : > { %v663_v17 = vmul.f32 %v662_v16, %v3804_v8 }
 0x127   : > { %v664_v18 = vadd.f32 1e-05, %v663_v17 }
 0x129   : > { %3281 = vrsqrt.f32 %v664_v18  ;;  %vm671_vm3 = vweird.f32 %v664_v18 }
 0x12f   : > { %v3282_v19 = vpop.eup %3281 }
 0x130   : > { %v666_v20 = vmul.f32 %v3282_v19, %v664_v18  ;;  %vm672_vm2 = vweird.f32 %v3282_v19 }
 0x131   : > { %vm673_vm4 = vmor %vm671_vm3, %vm672_vm2 }
 0x132   : > { %v667_v21 = vmul.f32 %v3282_v19, %v666_v20  ;;  %v3041_v20 = vld [vmem:[%s4945_s7 + $0x8] sm:$0xff] }
 0x134   : > { %v668_v22 = vmul.f32 0.5, %v667_v21  ;;  %v3045_v21 = vld [vmem:[%s4945_s7 + $0x28] sm:$0xff] }
 0x136   : > { %v669_v23 = vsub.f32 1.5, %v668_v22  ;;  %v3042_v22 = vld [vmem:[%s4945_s7 + $0x10] sm:$0xff] }
 0x138   : > { %v670_v24 = vmul.f32 %v3282_v19, %v669_v23  ;;  %v3611_v23 = vmov 3  }
 0x139   : > { %3143 = vset.pattern.permute.xlu0 %v3611_v23 }
 0x13a   : > { %v674_v26 = vsel %vm673_vm4, %v3282_v19, %v670_v24  ;;  %v3040_v19 = vld [vmem:[%s4945_s7] sm:$0xff]  ;;  %v3046_v24 = vld [vmem:[%s4945_s7 + $0x30] sm:$0xff] }
 0x13b   : > { %v675_v27 = vmul.f32 %v674_v26, %v658_v11 }
 0x13d   : > { %v679_v29 = vmul.f32 %v3266_v25, %v675_v27 }
 0x13f   : > { %v683_v30 = vadd.f32 %v3267_v28, %v679_v29  ;;  %v3612_v28 = vmov 1  }
 0x141   : > { %v684_v31 = vpack.c.bf16 %v683_v30, %v683_v30  ;;  %v3043_v30 = vld [vmem:[%s4945_s7 + $0x18] sm:$0xff] }
 0x143   : > { %2935 = vmatmul.msk.bf16.vlgmr.msra.gmra.mxu0 %vm646_vm0, %v684_v31  ;;  %v4965_v31 = vmov 2  }
 0x1c0   : > { %v3825_v37 = vpop.f32.mrf.mxu0 }
 0x1c1   : > { %v718_v39 = vrot.slane %v3825_v37, 5  ;;  %v743_v41 = vmul.f32 %v3269_v35, %v3825_v37  ;;  %v4966_v35 = vmov 6  }
 0x1c3   : > { %v721_v43 = vsel %vm720_vm5, 0.0, %v718_v39  ;;  %v755_v44 = vrot.slane %v718_v39, 1  ;;  %v766_v46 = vrot.slane %v718_v39, 2  ;;  %v744_v51 = vadd.f32 %v3268_v40, %v743_v41  ;;  %v3044_v39 = vld [vmem:[%s4945_s7 + $0x20] sm:$0xff] }
 0x1c4   : > { %v746_v47 = vsel %vm745_vm6, %v721_v43, 0.0  ;;  %v754_v48 = vrot.slane %v721_v43, 1  ;;  %v765_v49 = vrot.slane %v721_v43, 2 }
 0x1c5   : > { %v749_v52 = vmul.f32 %v3270_v42, %v746_v47  ;;  %v849_v42 = vld [vmem:[#allocation10] sm:$0xff] }
 0x1c6   : > { %v756_v53 = vsel %vm753_vm8, %v754_v48, %v755_v44  ;;  %v767_v54 = vsel %vm764_vm9, %v765_v49, %v766_v46  ;;  %v855_v44 = vperm.slane %v849_v42, 0  ;;  %v862_v47 = vperm.slane %v849_v42, 1 }
 0x1c7   : > { %v750_v56 = vadd.f32 %v749_v52, %v744_v51  ;;  %v758_v57 = vsel %vm751_vm7, %v756_v53, 0.0  ;;  %v769_v58 = vsel %vm763_vm10, %v767_v54, 0.0  ;;  %v1008_v54 = vld [vmem:[%s4948_s10] sm:$0xff]  ;;  %vm2599_vm10 = vcmask 1040384  }
 0x1c8   : > { %v761_v59 = vmul.f32 %v3271_v45, %v758_v57  ;;  %v715_v60 = vpop.f32.mrf.mxu0  ;;  %v772_v63 = vmul.f32 %v3272_v55, %v769_v58  ;;  %v3273_v45 = vld [vmem:[%s4947_s9] ss:$0 sm:$0xff]  ;;  %v1010_v57 = vld [vmem:[%s4948_s10 + $0x10] sm:$0xff]  ;;  %v1011_v58 = vld [vmem:[%s4948_s10 + $0x18] sm:$0xff] }
 0x1ca   : > { %v762_v62 = vadd.f32 %v761_v59, %v750_v56  ;;  %v1009_v56 = vld [vmem:[%s4948_s10 + $0x8] sm:$0xff]  ;;  %v1016_v59 = vmul.f32 1.442695, %v1008_v54 }
 0x1cb   : > { %v1018_v60 = vmul.f32 1.442695, %v1009_v56 }
 0x1cc   : > { %v773_v0 = vadd.f32 %v772_v63, %v762_v62  ;;  %v1020_v62 = vmul.f32 1.442695, %v1010_v57  ;;  %v1013_v63 = vld [vmem:[%s4948_s10 + $0x28] sm:$0xff] }
 0x1ce   : > { %v2936_v1 = vmul.f32 -1.442695, %v773_v0 }
 0x1d0   : > { %3283 = vpow2.f32 %v2936_v1  ;;  %v1014_v1 = vld [vmem:[%s4948_s10 + $0x30] sm:$0xff] }
 0x1d6   : > { %v3284_v2 = vpop.eup %3283 }
 0x1d7   : > { %v777_v3 = vadd.f32 1.0, %v3284_v2 }
 0x1d9   : > { %3285 = vrcp.f32 %v777_v3  ;;  %v789_v7 = vand.u32 2147483648, %v777_v3  ;;  %v787_v10 = vand.u32 2147483647, %v777_v3  ;;  %vm783_vm12 = vweird.f32 %v777_v3 }
 0x1db   : > { %v790_v12 = vor.u32 1.1754944e-38, %v789_v7  ;;  %vm788_vm14 = vcmp.eq.f32.partialorder %v787_v10, 8.507059e+37  ;;  %v1028_v7 = vmul.f32 1.442695, %v1014_v1 }
 0x1df   : > { %v3286_v4 = vpop.eup %3285 }
 0x1e0   : > { %v779_v5 = vmul.f32 %v3286_v4, %v777_v3  ;;  %vm784_vm11 = vweird.f32 %v3286_v4  ;;  %v1024_v3 = vmul.f32 1.442695, %v1012_v61 }
 0x1e1   : > { %vm785_vm13 = vmor %vm783_vm12, %vm784_vm11  ;;  %vm2601_vm11 = vcmask 1041408   ;;  %vm2604_vm12 = vcmask 1043456  }
 0x1e2   : > { %v780_v6 = vsub.f32 1.0, %v779_v5  ;;  %v1026_v5 = vmul.f32 1.442695, %v1013_v63 }
 0x1e4   : > { %v781_v9 = vmul.f32 %v3286_v4, %v780_v6 }
 0x1e6   : > { %v782_v11 = vadd.f32 %v3286_v4, %v781_v9 }
 0x1e8   : > { %v786_v14 = vsel %vm785_vm13, %v3286_v4, %v782_v11  ;;  %v1015_v4 = vld [vmem:[%s4948_s10 + $0x38] sm:$0xff]  ;;  %vm2606_vm13 = vcmask 1044480  }
 0x1e9   : > { %v791_v15 = vsel %vm788_vm14, %v790_v12, %v786_v14  ;;  %v1030_v10 = vmul.f32 1.442695, %v1015_v4 }
 0x1ea   : > { %v3853_v16 = vmul.f32 %v791_v15, %v773_v0  ;;  %v1022_v0 = vmul.f32 1.442695, %v1011_v58 }
 0x1ec   : > { %v794_v17 = vpack.c.bf16 %v3853_v16, %v3853_v16 }
 0x1ee   : > { %2953 = vmatmul.msk.bf16.vlgmr.msra.gmra.mxu1 %vm827_vm15, %v794_v17  ;;  %v829_v18 = vsel %vm827_vm15, %v794_v17, 0 }
 0x1ef   : > { %966 = vmatpush.bf16.xpose.msrb.mxu0 %v829_v18  ;;  %3056 = vmatpush.bf16.xpose.msra.mxu2 %v829_v18 }
 0x1f0   : > { %3057 = vmatpush.bf16.xpose.msra.mxu3 %v829_v18 }
 0x1f6   : > { %2986 = vmatmul.msk.bf16.vlgmr.msrb.gmra.mxu0 %vm827_vm15, %v3040_v19  ;;  %2987 = vmatmul.msk.bf16.vlgmr.msra.gmra.mxu2 %vm827_vm15, %v3041_v20 }
 0x1f7   : > { %2991 = vmatmul.msk.bf16.vlgmr.msra.gmra.mxu3 %vm827_vm15, %v3045_v21 }
 0x206   : > { %2988 = vmatmul.msk.bf16.gmra.mxu2 %vm827_vm15, %v3042_v22 }
 0x207   : > { %2992 = vmatmul.msk.bf16.gmra.mxu3 %vm827_vm15, %v3046_v24 }
 0x216   : > { %2989 = vmatmul.msk.bf16.gmra.mxu2 %vm827_vm15, %v3043_v30 }
 0x217   : > { %2993 = vmatmul.msk.bf16.gmra.mxu3 %vm827_vm15, %v3047_v32 }
 0x226   : > { %2990 = vmatmul.msk.bf16.gmra.mxu2 %vm827_vm15, %v3044_v39 }
 0x26b   : > { %v840_v25 = vpop.f32.mrf.mxu1 }
 0x26c   : > { %852 = vperm.xlu1 %3138, %v840_v25  }
 0x273   : > { %v842_v26 = vpop.f32.mrf.mxu1  ;;  %v968_v27 = vpop.f32.mrf.mxu0 }
 0x274   : > { %3139 = vset.pattern.permute.xlu1 %v3612_v28  ;;  %1335 = vperm.xlu0 %3143, %v968_v27  }
 0x275   : > { %1077 = vperm.xlu2 %3140, %v968_v27   ;;  %859 = vperm.xlu1 %3139, %v840_v25  }
 0x279   : > { %v973_v29 = vpop.f32.mrf.mxu2 }
 0x27a   : > { %v993_v38 = vpop.f32.mrf.mxu3 }
 0x27b   : > { %v970_v40 = vpop.f32.mrf.mxu0 }
 0x27c   : > { %3148 = vset.pattern.permute.xlu0 %v3610_v13 }
 0x27d   : > { %3141 = vset.pattern.permute.xlu2 %v3612_v28  ;;  %3142 = vset.pattern.permute.xlu1 %v4965_v31 }
 0x27e   : > { %1087 = vperm.xlu0 %3148, %v973_v29   ;;  %1167 = vperm.xlu2 %3141, %v968_v27  }
 0x27f   : > { %1251 = vperm.xlu1 %3142, %v968_v27  }
 0x281   : > { %v975_v41 = vpop.f32.mrf.mxu2 }
 0x282   : > { %v3936_v52 = vpop.f32.mrf.mxu3 }
 0x286   : > { %3150 = vset.pattern.permute.xlu0 %v4965_v31  ;;  %3144 = vset.pattern.permute.xlu2 %v3614_v33 }
 0x287   : > { %1259 = vperm.xlu0 %3150, %v973_v29   ;;  %3145 = vset.pattern.permute.xlu1 %v3615_v34 }
 0x288   : > { %1419 = vperm.xlu2 %3144, %v968_v27   ;;  %1503 = vperm.xlu1 %3145, %v968_v27  }
 0x28f   : > { %3154 = vset.pattern.permute.xlu0 %v4966_v35 }
 0x290   : > { %3147 = vset.pattern.permute.xlu2 %v4968_v36  ;;  %1595 = vperm.xlu0 %3154, %v973_v29  }
 0x291   : > { %3146 = vset.pattern.permute.xlu1 %v4966_v35  ;;  %1671 = vperm.xlu2 %3147, %v968_v27  }
 0x292   : > { %1587 = vperm.xlu1 %3146, %v968_v27  }
 0x298   : > { %3157 = vset.pattern.permute.xlu0 %v3612_v28 }
 0x299   : > { %3149 = vset.pattern.permute.xlu2 %v3612_v28  ;;  %2133 = vperm.xlu0 %3157, %v993_v38  }
 0x29a   : > { %3155 = vset.pattern.permute.xlu1 %v4968_v36  ;;  %1175 = vperm.xlu2 %3149, %v973_v29  }
 0x29b   : > { %1679 = vperm.xlu1 %3155, %v973_v29  }
 0x2a1   : > { %3158 = vset.pattern.permute.xlu0 %v4965_v31 }
 0x2a2   : > { %3151 = vset.pattern.permute.xlu2 %v3611_v23  ;;  %2202 = vperm.xlu0 %3158, %v993_v38  }
 0x2a3   : > { %3165 = vset.pattern.permute.xlu1 %v3612_v28  ;;  %1343 = vperm.xlu2 %3151, %v973_v29  }
 0x2a4   : > { %1171 = vperm.xlu1 %3165, %v970_v40  }
 0x2aa   : > { %3159 = vset.pattern.permute.xlu0 %v3611_v23 }
 0x2ab   : > { %3152 = vset.pattern.permute.xlu2 %v3614_v33  ;;  %2271 = vperm.xlu0 %3159, %v993_v38  }
 0x2ac   : > { %1427 = vperm.xlu2 %3152, %v973_v29   ;;  %3167 = vset.pattern.permute.xlu1 %v3611_v23 }
 0x2ad   : > { %1339 = vperm.xlu1 %3167, %v970_v40  }
 0x2b3   : > { %3161 = vset.pattern.permute.xlu0 %v3615_v34 }
 0x2b4   : > { %3153 = vset.pattern.permute.xlu2 %v3615_v34  ;;  %2409 = vperm.xlu0 %3161, %v993_v38  }
 0x2b5   : > { %1511 = vperm.xlu2 %3153, %v973_v29   ;;  %3172 = vset.pattern.permute.xlu1 %v3610_v13 }
 0x2b6   : > { %1092 = vperm.xlu1 %3172, %v975_v41  }
 0x2bc   : > { %3162 = vset.pattern.permute.xlu0 %v4966_v35 }
 0x2bd   : > { %3156 = vset.pattern.permute.xlu2 %v3610_v13  ;;  %2478 = vperm.xlu0 %3162, %v993_v38  }
 0x2be   : > { %2059 = vperm.xlu2 %3156, %v993_v38   ;;  %3173 = vset.pattern.permute.xlu1 %v3612_v28 }
 0x2bf   : > { %1179 = vperm.xlu1 %3173, %v975_v41  }
 0x2c5   : > { %3163 = vset.pattern.permute.xlu0 %v4968_v36 }
 0x2c6   : > { %3160 = vset.pattern.permute.xlu2 %v3614_v33  ;;  %2547 = vperm.xlu0 %3163, %v993_v38  }
 0x2c7   : > { %2340 = vperm.xlu2 %3160, %v993_v38   ;;  %3174 = vset.pattern.permute.xlu1 %v4965_v31 }
 0x2c8   : > { %1263 = vperm.xlu1 %3174, %v975_v41  }
 0x2ce   : > { %3168 = vset.pattern.permute.xlu0 %v3614_v33 }
 0x2cf   : > { %3164 = vset.pattern.permute.xlu2 %v3610_v13  ;;  %1423 = vperm.xlu0 %3168, %v970_v40   ;;  %v4009_v61 = vpop.permute.xlu2 %1077 }
 0x2d0   : > { %3175 = vset.pattern.permute.xlu1 %v3611_v23  ;;  %1082 = vperm.xlu2 %3164, %v970_v40  }
 0x2d1   : > { %1347 = vperm.xlu1 %3175, %v975_v41  }
 0x2d7   : > { %3171 = vset.pattern.permute.xlu0 %v4968_v36 }
 0x2d8   : > { %3166 = vset.pattern.permute.xlu2 %v4965_v31  ;;  %1675 = vperm.xlu0 %3171, %v970_v40  }
 0x2d9   : > { %3178 = vset.pattern.permute.xlu1 %v4966_v35  ;;  %1255 = vperm.xlu2 %3166, %v970_v40  }
 0x2da   : > { %1599 = vperm.xlu1 %3178, %v975_v41  }
 0x2de   : > { %v853_v43 = vpop.permute.xlu1 %852 }
 0x2df   : > { %v856_v46 = vmul.f32 %v855_v44, %v853_v43 }
 0x2e0   : > { %3176 = vset.pattern.permute.xlu0 %v3614_v33 }
 0x2e1   : > { %3169 = vset.pattern.permute.xlu2 %v3615_v34  ;;  %1431 = vperm.xlu0 %3176, %v975_v41   ;;  %v857_v49 = vadd.f32 %v3273_v45, %v856_v46 }
 0x2e2   : > { %3179 = vset.pattern.permute.xlu1 %v4968_v36  ;;  %1507 = vperm.xlu2 %3169, %v970_v40  }
 0x2e3   : > { %1683 = vperm.xlu1 %3179, %v975_v41  }
 0x2e7   : > { %v860_v48 = vpop.permute.xlu1 %859 }
 0x2e8   : > { %v863_v50 = vmul.f32 %v862_v47, %v860_v48 }
 0x2e9   : > { %3177 = vset.pattern.permute.xlu0 %v3615_v34 }
 0x2ea   : > { %v3933_v51 = vadd.f32 %v863_v50, %v857_v49  ;;  %3170 = vset.pattern.permute.xlu2 %v4966_v35  ;;  %1515 = vperm.xlu0 %3177, %v975_v41  }
 0x2eb   : > { %3180 = vset.pattern.permute.xlu1 %v3610_v13  ;;  %1591 = vperm.xlu2 %3170, %v970_v40  }
 0x2ec   : > { %v865_v53 = vmin.f32 %v3933_v51, 20.0  ;;  %2064 = vperm.xlu1 %3180, %v3936_v52   ;;  %vm866_vm2 = vcmp.gt.f32.partialorder %v3933_v51, 20.0 }
 0x2ee   : > { %v867_v55 = vmul.f32 1.442695, %v865_v53 }
 0x2f0   : > { %3287 = vpow2.f32 %v867_v55 }
 0x2f1   : > { %3289 = vpow2.f32 %v1016_v59 }
 0x2f2   : > { %3205 = vset.pattern.permute.xlu0 %v3612_v28  ;;  %3291 = vpow2.f32 %v1018_v60 }
 0x2f3   : > { %3181 = vset.pattern.permute.xlu2 %v3612_v28  ;;  %3293 = vpow2.f32 %v1020_v62 }
 0x2f4   : > { %3182 = vset.pattern.permute.xlu1 %v4965_v31  ;;  %2137 = vperm.xlu2 %3181, %v3936_v52   ;;  %3295 = vpow2.f32 %v1022_v0 }
 0x2f5   : > { %2206 = vperm.xlu1 %3182, %v3936_v52  }
 0x2f6   : > { %v3288_v2 = vpop.eup %3287 }
 0x2f7   : > { %v869_v6 = vadd.f32 1.0, %v3288_v2  ;;  %v872_v9 = vmul.f32 -0.5, %v3288_v2  ;;  %v3290_v11 = vpop.eup %3289  ;;  %v875_v17 = vand.u32 2147483647, %v3288_v2 }
 0x2f8   : > { %v3292_v12 = vpop.eup %3291  ;;  %v3974_v25 = vsub.f32 0.0, %v3290_v11 }
 0x2f9   : > { %3297 = vlog2.f32 %v869_v6  ;;  %v873_v14 = vadd.f32 1.0, %v872_v9  ;;  %v3294_v15 = vpop.eup %3293  ;;  %v3976_v26 = vsub.f32 0.0, %v3292_v12  ;;  %vm876_vm1 = vcmp.lt.f32.partialorder %v875_v17, 0.0004427343  ;;  %v4022_v17 = vpop.f32.mrf.mxu2 }
 0x2fa   : > { %3299 = vpow2.f32 %v1024_v3  ;;  %v3296_v18 = vpop.eup %3295  ;;  %v3978_v29 = vsub.f32 0.0, %v3294_v15 }
 0x2fb   : > { %3301 = vpow2.f32 %v1026_v5  ;;  %v874_v22 = vmul.f32 %v3288_v2, %v873_v14  ;;  %v3980_v30 = vsub.f32 0.0, %v3296_v18 }
 0x2fc   : > { %3303 = vpow2.f32 %v1028_v7  ;;  %3183 = vset.pattern.permute.xlu2 %v3611_v23 }
 0x2fd   : > { %3186 = vset.pattern.permute.xlu1 %v4966_v35  ;;  %2275 = vperm.xlu2 %3183, %v3936_v52   ;;  %3305 = vpow2.f32 %v1030_v10 }
 0x2fe   : > { %2482 = vperm.xlu1 %3186, %v3936_v52  }
 0x2ff   : > { %v3298_v19 = vpop.eup %3297 }
 0x300   : > { %v3300_v20 = vpop.eup %3299  ;;  %v871_v21 = vmul.f32 0.6931472, %v3298_v19 }
 0x301   : > { %v3302_v24 = vpop.eup %3301  ;;  %v3983_v38 = vsub.f32 0.0, %v3300_v20 }
 0x302   : > { %v3304_v27 = vpop.eup %3303  ;;  %v877_v32 = vsel %vm876_vm1, %v874_v22, %v871_v21  ;;  %v3989_v42 = vsub.f32 0.0, %v3302_v24  ;;  %v4028_v22 = vpop.permute.xlu2 %1167 }
 0x303   : > { %v3986_v39 = vsel %vm866_vm2, %v3933_v51, %v877_v32  ;;  %v3306_v40 = vpop.eup %3305  ;;  %v3991_v43 = vsub.f32 0.0, %v3304_v27 }
 0x304   : > { %v1041_v41 = vperm.slane %v3986_v39, 0  ;;  %v3999_v48 = vsub.f32 0.0, %v3306_v40  ;;  %v1131_v50 = vperm.slane %v3986_v39, 1  ;;  %v1215_v15 = vperm.slane %v3986_v39, 2 }
 0x305   : > { %3184 = vset.pattern.permute.xlu2 %v3614_v33 }
 0x306   : > { %v1042_v44 = vmul.f32 %v1041_v41, %v3974_v25  ;;  %v1043_v45 = vmul.f32 %v1041_v41, %v3976_v26  ;;  %v1044_v46 = vmul.f32 %v1041_v41, %v3978_v29  ;;  %v1045_v47 = vmul.f32 %v1041_v41, %v3980_v30  ;;  %3187 = vset.pattern.permute.xlu1 %v4968_v36 }
 0x307   : > { %v1046_v49 = vmul.f32 %v1041_v41, %v3983_v38  ;;  %2344 = vperm.xlu2 %3184, %v3936_v52   ;;  %2551 = vperm.xlu1 %3187, %v3936_v52   ;;  %v1047_v55 = vmul.f32 %v1041_v41, %v3989_v42  ;;  %v1048_v57 = vmul.f32 %v1041_v41, %v3991_v43 }
 0x308   : > { %v1050_v51 = vmul.f32 1.442695, %v1042_v44  ;;  %v1052_v53 = vmul.f32 1.442695, %v1043_v45  ;;  %v1054_v54 = vmul.f32 1.442695, %v1044_v46  ;;  %v1049_v59 = vmul.f32 %v1041_v41, %v3999_v48 }
 0x309   : > { %v1056_v56 = vmul.f32 1.442695, %v1045_v47  ;;  %v1058_v58 = vmul.f32 1.442695, %v1046_v49  ;;  %v1132_v60 = vmul.f32 %v1131_v50, %v3974_v25  ;;  %v1060_v62 = vmul.f32 1.442695, %v1047_v55 }
 0x30a   : > { %3307 = vpow2.f32 %v1050_v51  ;;  %v1062_v63 = vmul.f32 1.442695, %v1048_v57  ;;  %v1064_v0 = vmul.f32 1.442695, %v1049_v59  ;;  %v1133_v1 = vmul.f32 %v1131_v50, %v3976_v26 }
 0x30b   : > { %3309 = vpow2.f32 %v1052_v53  ;;  %v1134_v3 = vmul.f32 %v1131_v50, %v3978_v29  ;;  %v1140_v4 = vmul.f32 1.442695, %v1132_v60  ;;  %v1135_v6 = vmul.f32 %v1131_v50, %v3980_v30 }
 0x30c   : > { %3311 = vpow2.f32 %v1054_v54  ;;  %v1136_v9 = vmul.f32 %v1131_v50, %v3983_v38  ;;  %v1137_v11 = vmul.f32 %v1131_v50, %v3989_v42  ;;  %v1142_v12 = vmul.f32 1.442695, %v1133_v1 }
 0x30d   : > { %3313 = vpow2.f32 %v1056_v56  ;;  %v1146_v18 = vmul.f32 1.442695, %v1135_v6  ;;  %v1138_v19 = vmul.f32 %v1131_v50, %v3991_v43  ;;  %v1139_v24 = vmul.f32 %v1131_v50, %v3999_v48 }
 0x30e   : > { %3315 = vpow2.f32 %v1058_v58  ;;  %v1148_v20 = vmul.f32 1.442695, %v1136_v9  ;;  %v1150_v27 = vmul.f32 1.442695, %v1137_v11  ;;  %v1216_v40 = vmul.f32 %v1215_v15, %v3974_v25 }
 0x30f   : > { %3185 = vset.pattern.permute.xlu2 %v3615_v34  ;;  %3191 = vset.pattern.permute.xlu1 %v3611_v23  ;;  %3317 = vpow2.f32 %v1060_v62  ;;  %v1152_v45 = vmul.f32 1.442695, %v1138_v19  ;;  %v1154_v46 = vmul.f32 1.442695, %v1139_v24  ;;  %v1217_v47 = vmul.f32 %v1215_v15, %v3976_v26 }
 0x310   : > { %v3308_v2 = vpop.eup %3307  ;;  %2413 = vperm.xlu2 %3185, %v3936_v52   ;;  %3319 = vpow2.f32 %v1062_v63  ;;  %v1144_v52 = vmul.f32 1.442695, %v1134_v3  ;;  %1351 = vperm.xlu1 %3191, %v4022_v17   ;;  %v1218_v49 = vmul.f32 %v1215_v15, %v3978_v29  ;;  %v1224_v50 = vmul.f32 1.442695, %v1216_v40  ;;  %v4047_v63 = vpop.permute.xlu2 %1419 }
 0x311   : > { %v3310_v5 = vpop.eup %3309  ;;  %1066 = vst.msk [vmem:[#allocation3] sm:$0xff] %vm827_vm15, %v3308_v2  ;;  %3321 = vpow2.f32 %v1064_v0  ;;  %v1219_v53 = vmul.f32 %v1215_v15, %v3980_v30  ;;  %v1220_v55 = vmul.f32 %v1215_v15, %v3983_v38  ;;  %v1226_v57 = vmul.f32 1.442695, %v1217_v47 }
 0x312   : > { %v3312_v7 = vpop.eup %3311  ;;  %1067 = vst.msk [vmem:[#allocation3 + $0x8] sm:$0xff] %vm827_vm15, %v3310_v5  ;;  %3323 = vpow2.f32 %v1140_v4  ;;  %v1228_v59 = vmul.f32 1.442695, %v1218_v49  ;;  %v1299_v60 = vperm.slane %v3986_v39, 3  ;;  %v1221_v0 = vmul.f32 %v1215_v15, %v3989_v42 }
 0x313   : > { %v3314_v10 = vpop.eup %3313  ;;  %1068 = vst.msk [vmem:[#allocation3 + $0x10] sm:$0xff] %vm827_vm15, %v3312_v7  ;;  %3325 = vpow2.f32 %v1142_v12  ;;  %v1222_v1 = vmul.f32 %v1215_v15, %v3991_v43  ;;  %v1230_v2 = vmul.f32 1.442695, %v1219_v53  ;;  %v1232_v3 = vmul.f32 1.442695, %v1220_v55 }
 0x314   : > { %v3316_v14 = vpop.eup %3315  ;;  %1069 = vst.msk [vmem:[#allocation3 + $0x18] sm:$0xff] %vm827_vm15, %v3314_v10  ;;  %3327 = vpow2.f32 %v1144_v52  ;;  %v1223_v4 = vmul.f32 %v1215_v15, %v3999_v48  ;;  %v1300_v6 = vmul.f32 %v1299_v60, %v3974_v25  ;;  %v1234_v9 = vmul.f32 1.442695, %v1221_v0 }
 0x315   : > { %v3318_v21 = vpop.eup %3317  ;;  %1070 = vst.msk [vmem:[#allocation3 + $0x20] sm:$0xff] %vm827_vm15, %v3316_v14  ;;  %3329 = vpow2.f32 %v1146_v18  ;;  %v1236_v10 = vmul.f32 1.442695, %v1222_v1  ;;  %v1301_v11 = vmul.f32 %v1299_v60, %v3976_v26  ;;  %v1302_v14 = vmul.f32 %v1299_v60, %v3978_v29 }
 0x316   : > { %v3320_v32 = vpop.eup %3319  ;;  %3331 = vpow2.f32 %v1148_v20  ;;  %1071 = vst.msk [vmem:[#allocation3 + $0x28] sm:$0xff] %vm827_vm15, %v3318_v21  ;;  %v1303_v52 = vmul.f32 %v1299_v60, %v3980_v30  ;;  %v1304_v15 = vmul.f32 %v1299_v60, %v3983_v38  ;;  %v1238_v18 = vmul.f32 1.442695, %v1223_v4 }
 0x317   : > { %v3322_v41 = vpop.eup %3321  ;;  %3333 = vpow2.f32 %v1150_v27  ;;  %1072 = vst.msk [vmem:[#allocation3 + $0x30] sm:$0xff] %vm827_vm15, %v3320_v32  ;;  %v1305_v19 = vmul.f32 %v1299_v60, %v3989_v42  ;;  %v1306_v20 = vmul.f32 %v1299_v60, %v3991_v43  ;;  %v4067_v21 = vperm.slane %v3986_v39, 4  ;;  %v4073_v32 = vpop.f32.mrf.mxu2 }
 0x318   : > { %3188 = vset.pattern.permute.xlu2 %v3610_v13  ;;  %v3324_v44 = vpop.eup %3323  ;;  %1073 = vst.msk [vmem:[#allocation3 + $0x38] sm:$0xff] %vm827_vm15, %v3322_v41  ;;  %3192 = vset.pattern.permute.xlu1 %v3614_v33  ;;  %3335 = vpow2.f32 %v1152_v45  ;;  %v1308_v24 = vmul.f32 1.442695, %v1300_v6  ;;  %v1635_v27 = vperm.slane %v3986_v39, 7  ;;  %v1307_v41 = vmul.f32 %v1299_v60, %v3999_v48  ;;  %v4077_v45 = vpop.permute.xlu0 %1335 }
 0x319   : > { %1097 = vperm.xlu2 %3188, %v4022_v17   ;;  %v3326_v51 = vpop.eup %3325  ;;  %1157 = vst.msk [vmem:[#allocation3 + $0x40] sm:$0xff] %vm827_vm15, %v3324_v44  ;;  %1435 = vperm.xlu1 %3192, %v4022_v17   ;;  %3337 = vpow2.f32 %v1154_v46  ;;  %v1310_v44 = vmul.f32 1.442695, %v1301_v11  ;;  %v1312_v47 = vmul.f32 1.442695, %v1302_v14  ;;  %v1384_v55 = vmul.f32 %v4067_v21, %v3974_v25 }
 0x31a   : > { %v3328_v54 = vpop.eup %3327  ;;  %3339 = vpow2.f32 %v1224_v50  ;;  %1158 = vst.msk [vmem:[#allocation3 + $0x48] sm:$0xff] %vm827_vm15, %v3326_v51  ;;  %1187 = vperm.xlu0 %3205, %v4073_v32   ;;  %v1314_v49 = vmul.f32 1.442695, %v1303_v52  ;;  %v1316_v50 = vmul.f32 1.442695, %v1304_v15  ;;  %v4091_v60 = vmul.f32 %v1635_v27, %v3974_v25 }
 0x31b   : > { %v3330_v56 = vpop.eup %3329  ;;  %1159 = vst.msk [vmem:[#allocation3 + $0x50] sm:$0xff] %vm827_vm15, %v3328_v54  ;;  %3341 = vpow2.f32 %v1226_v57  ;;  %v1318_v53 = vmul.f32 1.442695, %v1305_v19  ;;  %v1320_v54 = vmul.f32 1.442695, %v1306_v20  ;;  %v4098_v0 = vmul.f32 %v1635_v27, %v3978_v29 }
 0x31c   : > { %v3332_v58 = vpop.eup %3331  ;;  %1160 = vst.msk [vmem:[#allocation3 + $0x58] sm:$0xff] %vm827_vm15, %v3330_v56  ;;  %3343 = vpow2.f32 %v1228_v59  ;;  %v4083_v56 = vpop.permute.xlu2 %1671  ;;  %v1386_v59 = vmul.f32 %v4067_v21, %v3978_v29  ;;  %v4101_v1 = vmul.f32 %v1635_v27, %v3980_v30  ;;  %v4111_v4 = vmul.f32 %v1635_v27, %v3991_v43 }
 0x31d   : > { %v3334_v62 = vpop.eup %3333  ;;  %1161 = vst.msk [vmem:[#allocation3 + $0x60] sm:$0xff] %vm827_vm15, %v3332_v58  ;;  %3345 = vpow2.f32 %v1230_v2  ;;  %v1385_v58 = vmul.f32 %v4067_v21, %v3976_v26  ;;  %v4105_v2 = vmul.f32 %v1635_v27, %v3983_v38  ;;  %v1392_v14 = vmul.f32 1.442695, %v1384_v55 }
 0x31e   : > { %v3336_v5 = vpop.eup %3335  ;;  %1162 = vst.msk [vmem:[#allocation3 + $0x68] sm:$0xff] %vm827_vm15, %v3334_v62  ;;  %3347 = vpow2.f32 %v1232_v3  ;;  %v4095_v62 = vmul.f32 %v1635_v27, %v3976_v26  ;;  %v4108_v3 = vmul.f32 %v1635_v27, %v3989_v42  ;;  %v1467_v52 = vperm.slane %v3986_v39, 5 }
 0x31f   : > { %v3338_v7 = vpop.eup %3337  ;;  %1163 = vst.msk [vmem:[#allocation3 + $0x70] sm:$0xff] %vm827_vm15, %v3336_v5  ;;  %3349 = vpow2.f32 %v1234_v9  ;;  %v4114_v5 = vpop.permute.xlu1 %1251  ;;  %v1387_v9 = vmul.f32 %v4067_v21, %v3980_v30  ;;  %v1394_v19 = vmul.f32 1.442695, %v1385_v58 }
 0x320   : > { %v3340_v12 = vpop.eup %3339  ;;  %1164 = vst.msk [vmem:[#allocation3 + $0x78] sm:$0xff] %vm827_vm15, %v3338_v7  ;;  %3351 = vpow2.f32 %v1236_v10  ;;  %v1322_v7 = vmul.f32 1.442695, %v1307_v41  ;;  %v4119_v10 = vmul.f32 %v1635_v27, %v3999_v48  ;;  %v1396_v27 = vmul.f32 1.442695, %v1386_v59 }
 0x321   : > { %3189 = vset.pattern.permute.xlu2 %v3612_v28  ;;  %3195 = vset.pattern.permute.xlu1 %v4968_v36  ;;  %v3342_v40 = vpop.eup %3341  ;;  %1241 = vst.msk [vmem:[#allocation3 + $0x80] sm:$0xff] %vm827_vm15, %v3340_v12  ;;  %3353 = vpow2.f32 %v1238_v18  ;;  %v1388_v12 = vmul.f32 %v4067_v21, %v3983_v38  ;;  %v1389_v18 = vmul.f32 %v4067_v21, %v3989_v42 }
 0x322   : > { %1183 = vperm.xlu2 %3189, %v4022_v17   ;;  %1687 = vperm.xlu1 %3195, %v4022_v17   ;;  %v3344_v46 = vpop.eup %3343  ;;  %3355 = vpow2.f32 %v1308_v24  ;;  %1242 = vst.msk [vmem:[#allocation3 + $0x88] sm:$0xff] %vm827_vm15, %v3342_v40  ;;  %v1390_v24 = vmul.f32 %v4067_v21, %v3991_v43  ;;  %v1391_v41 = vmul.f32 %v4067_v21, %v3999_v48 }
 0x323   : > { %v3346_v51 = vpop.eup %3345  ;;  %3357 = vpow2.f32 %v1310_v44  ;;  %1243 = vst.msk [vmem:[#allocation3 + $0x90] sm:$0xff] %vm827_vm15, %v3344_v46  ;;  %3210 = vset.pattern.permute.xlu0 %v4966_v35  ;;  %v1398_v44 = vmul.f32 1.442695, %v1387_v9  ;;  %v1402_v21 = vmul.f32 1.442695, %v1389_v18  ;;  %v1470_v58 = vmul.f32 %v1467_v52, %v3978_v29 }
 0x324   : > { %v3348_v57 = vpop.eup %3347  ;;  %3359 = vpow2.f32 %v1312_v47  ;;  %1244 = vst.msk [vmem:[#allocation3 + $0x98] sm:$0xff] %vm827_vm15, %v3346_v51  ;;  %1607 = vperm.xlu0 %3210, %v4073_v32   ;;  %v4136_v46 = vpop.permute.xlu2 %1175  ;;  %v1468_v51 = vmul.f32 %v1467_v52, %v3974_v25 }
 0x325   : > { %v3350_v6 = vpop.eup %3349  ;;  %3361 = vpow2.f32 %v1314_v49  ;;  %1245 = vst.msk [vmem:[#allocation3 + $0xa0] sm:$0xff] %vm827_vm15, %v3348_v57  ;;  %v4138_v47 = vpop.permute.xlu0 %1087  ;;  %v1404_v57 = vmul.f32 1.442695, %v1390_v24 }
 0x326   : > { %v3352_v11 = vpop.eup %3351  ;;  %3363 = vpow2.f32 %v1316_v50  ;;  %1246 = vst.msk [vmem:[#allocation3 + $0xa8] sm:$0xff] %vm827_vm15, %v3350_v6  ;;  %v1400_v50 = vmul.f32 1.442695, %v1388_v12  ;;  %v1406_v6 = vmul.f32 1.442695, %v1391_v41 }
 0x327   : > { %v3354_v15 = vpop.eup %3353  ;;  %3365 = vpow2.f32 %v1318_v53  ;;  %1247 = vst.msk [vmem:[#allocation3 + $0xb0] sm:$0xff] %vm827_vm15, %v3352_v11  ;;  %v1472_v11 = vmul.f32 %v1467_v52, %v3983_v38  ;;  %v1476_v12 = vmul.f32 1.442695, %v1468_v51 }
 0x328   : > { %v3356_v20 = vpop.eup %3355  ;;  %3367 = vpow2.f32 %v1320_v54  ;;  %1248 = vst.msk [vmem:[#allocation3 + $0xb8] sm:$0xff] %vm827_vm15, %v3354_v15  ;;  %v1469_v54 = vmul.f32 %v1467_v52, %v3976_v26  ;;  %v4155_v15 = vpop.permute.xlu1 %1503 }
 0x329   : > { %v3358_v40 = vpop.eup %3357  ;;  %3369 = vpow2.f32 %v1322_v7  ;;  %1325 = vst.msk [vmem:[#allocation3 + $0xc0] sm:$0xff] %vm827_vm15, %v3356_v20  ;;  %v1471_v7 = vmul.f32 %v1467_v52, %v3980_v30  ;;  %v1484_v51 = vmul.f32 1.442695, %v1472_v11 }
 0x32a   : > { %3190 = vset.pattern.permute.xlu2 %v4965_v31  ;;  %3197 = vset.pattern.permute.xlu1 %v3612_v28  ;;  %v3360_v49 = vpop.eup %3359  ;;  %3371 = vpow2.f32 %v1392_v14  ;;  %1326 = vst.msk [vmem:[#allocation3 + $0xc8] sm:$0xff] %vm827_vm15, %v3358_v40  ;;  %v4152_v14 = vperm.slane %v3986_v39, 6  ;;  %v1478_v20 = vmul.f32 1.442695, %v1469_v54  ;;  %v1480_v40 = vmul.f32 1.442695, %v1470_v58 }
 0x32b   : > { %1267 = vperm.xlu2 %3190, %v4022_v17   ;;  %v3362_v53 = vpop.eup %3361  ;;  %3373 = vpow2.f32 %v1394_v19  ;;  %1327 = vst.msk [vmem:[#allocation3 + $0xd0] sm:$0xff] %vm827_vm15, %v3360_v49  ;;  %v1473_v19 = vmul.f32 %v1467_v52, %v3989_v42  ;;  %v1482_v49 = vmul.f32 1.442695, %v1471_v7 }
 0x32c   : > { %v3364_v55 = vpop.eup %3363  ;;  %3375 = vpow2.f32 %v1396_v27  ;;  %1328 = vst.msk [vmem:[#allocation3 + $0xd8] sm:$0xff] %vm827_vm15, %v3362_v53  ;;  %v1474_v27 = vmul.f32 %v1467_v52, %v3991_v43  ;;  %3211 = vset.pattern.permute.xlu0 %v4968_v36  ;;  %v1552_v53 = vmul.f32 %v4152_v14, %v3974_v25 }
 0x32d   : > { %v3366_v59 = vpop.eup %3365  ;;  %3377 = vpow2.f32 %v1398_v44  ;;  %1329 = vst.msk [vmem:[#allocation3 + $0xe0] sm:$0xff] %vm827_vm15, %v3364_v55  ;;  %v1475_v44 = vmul.f32 %v1467_v52, %v3999_v48  ;;  %1691 = vperm.xlu0 %3211, %v4073_v32   ;;  %v1486_v54 = vmul.f32 1.442695, %v1473_v19  ;;  %v1553_v52 = vmul.f32 %v4152_v14, %v3976_v26  ;;  %v4172_v55 = vpop.permute.xlu2 %1343 }
 0x32e   : > { %v3368_v9 = vpop.eup %3367  ;;  %3379 = vpow2.f32 %v1400_v50  ;;  %1330 = vst.msk [vmem:[#allocation3 + $0xe8] sm:$0xff] %vm827_vm15, %v3366_v59  ;;  %v1488_v25 = vmul.f32 1.442695, %v1474_v27  ;;  %v1554_v59 = vmul.f32 %v4152_v14, %v3978_v29  ;;  %v1555_v26 = vmul.f32 %v4152_v14, %v3980_v30 }
 0x32f   : > { %v3370_v18 = vpop.eup %3369  ;;  %3381 = vpow2.f32 %v1402_v21  ;;  %1331 = vst.msk [vmem:[#allocation3 + $0xf0] sm:$0xff] %vm827_vm15, %v3368_v9  ;;  %v1490_v7 = vmul.f32 1.442695, %v1475_v44  ;;  %v1560_v11 = vmul.f32 1.442695, %v1552_v53  ;;  %v1557_v29 = vmul.f32 %v4152_v14, %v3989_v42 }
 0x330   : > { %v3372_v24 = vpop.eup %3371  ;;  %3383 = vpow2.f32 %v1404_v57  ;;  %1332 = vst.msk [vmem:[#allocation3 + $0xf8] sm:$0xff] %vm827_vm15, %v3370_v18  ;;  %v4174_v57 = vpop.permute.xlu0 %1259  ;;  %v1562_v18 = vmul.f32 1.442695, %v1553_v52  ;;  %v1558_v30 = vmul.f32 %v4152_v14, %v3991_v43  ;;  %v1559_v42 = vmul.f32 %v4152_v14, %v3999_v48 }
 0x331   : > { %v3374_v41 = vpop.eup %3373  ;;  %3385 = vpow2.f32 %v1406_v6  ;;  %1409 = vst.msk [vmem:[#allocation3 + $0x100] sm:$0xff] %vm827_vm15, %v3372_v24  ;;  %v4194_v24 = vpop.f32.mrf.mxu3  ;;  %v1644_v52 = vmul.f32 1.442695, %v4091_v60 }
 0x332   : > { %v3376_v50 = vpop.eup %3375  ;;  %3387 = vpow2.f32 %v1476_v12  ;;  %1410 = vst.msk [vmem:[#allocation3 + $0x108] sm:$0xff] %vm827_vm15, %v3374_v41  ;;  %2141 = vperm.xlu1 %3197, %v4194_v24  }
 0x333   : > { %3193 = vset.pattern.permute.xlu2 %v3615_v34  ;;  %v3378_v21 = vpop.eup %3377  ;;  %3389 = vpow2.f32 %v1478_v20  ;;  %1411 = vst.msk [vmem:[#allocation3 + $0x110] sm:$0xff] %vm827_vm15, %v3376_v50  ;;  %v1564_v20 = vmul.f32 1.442695, %v1554_v59 }
 0x334   : > { %1519 = vperm.xlu2 %3193, %v4022_v17   ;;  %v3380_v58 = vpop.eup %3379  ;;  %3391 = vpow2.f32 %v1480_v40  ;;  %1412 = vst.msk [vmem:[#allocation3 + $0x118] sm:$0xff] %vm827_vm15, %v3378_v21  ;;  %v1566_v40 = vmul.f32 1.442695, %v1555_v26  ;;  %v1650_v26 = vmul.f32 1.442695, %v4101_v1 }
 0x335   : > { %v3382_v6 = vpop.eup %3381  ;;  %3393 = vpow2.f32 %v1482_v49  ;;  %1413 = vst.msk [vmem:[#allocation3 + $0x120] sm:$0xff] %vm827_vm15, %v3380_v58  ;;  %3216 = vset.pattern.permute.xlu0 %v3614_v33  ;;  %v1570_v49 = vmul.f32 1.442695, %v1557_v29  ;;  %v4207_v53 = vpop.permute.xlu2 %1427  ;;  %v1658_v29 = vmul.f32 1.442695, %v4119_v10 }
 0x336   : > { %v3384_v9 = vpop.eup %3383  ;;  %3395 = vpow2.f32 %v1484_v51  ;;  %1414 = vst.msk [vmem:[#allocation3 + $0x128] sm:$0xff] %vm827_vm15, %v3382_v6  ;;  %v1574_v51 = vmul.f32 1.442695, %v1559_v42  ;;  %v1648_v6 = vmul.f32 1.442695, %v4098_v0 }
 0x337   : > { %v3386_v12 = vpop.eup %3385  ;;  %3397 = vpow2.f32 %v1486_v54  ;;  %1415 = vst.msk [vmem:[#allocation3 + $0x130] sm:$0xff] %vm827_vm15, %v3384_v9 }
 0x338   : > { %v3388_v19 = vpop.eup %3387  ;;  %3399 = vpow2.f32 %v1488_v25  ;;  %1416 = vst.msk [vmem:[#allocation3 + $0x138] sm:$0xff] %vm827_vm15, %v3386_v12  ;;  %v4209_v21 = vpop.permute.xlu0 %1595  ;;  %v1646_v25 = vmul.f32 1.442695, %v4095_v62  ;;  %v1652_v62 = vmul.f32 1.442695, %v4105_v2 }
 0x339   : > { %v3390_v27 = vpop.eup %3389  ;;  %3401 = vpow2.f32 %v1490_v7  ;;  %1493 = vst.msk [vmem:[#allocation3 + $0x140] sm:$0xff] %vm827_vm15, %v3388_v19  ;;  %v4227_v1 = vpop.f32.mrf.mxu3  ;;  %v1656_v12 = vmul.f32 1.442695, %v4111_v4  ;;  %v1040_v4 = vmul.f32 %v3986_v39, %v3853_v16 }
 0x33a   : > { %v3392_v43 = vpop.eup %3391  ;;  %3403 = vpow2.f32 %v1560_v11  ;;  %1494 = vst.msk [vmem:[#allocation3 + $0x148] sm:$0xff] %vm827_vm15, %v3390_v27  ;;  %3198 = vset.pattern.permute.xlu1 %v4965_v31  ;;  %2352 = vperm.xlu0 %3216, %v4227_v1  }
 0x33b   : > { %v3394_v44 = vpop.eup %3393  ;;  %3405 = vpow2.f32 %v1562_v18  ;;  %1495 = vst.msk [vmem:[#allocation3 + $0x150] sm:$0xff] %vm827_vm15, %v3392_v43  ;;  %2210 = vperm.xlu1 %3198, %v4194_v24   ;;  %v4249_v42 = vperm.slane %v1040_v4, 7 }
 0x33c   : > { %3194 = vset.pattern.permute.xlu2 %v4966_v35  ;;  %v3396_v48 = vpop.eup %3395  ;;  %3407 = vpow2.f32 %v1564_v20  ;;  %1496 = vst.msk [vmem:[#allocation3 + $0x158] sm:$0xff] %vm827_vm15, %v3394_v44 }
 0x33d   : > { %1603 = vperm.xlu2 %3194, %v4022_v17   ;;  %v1556_v17 = vmul.f32 %v4152_v14, %v3983_v38  ;;  %v4192_v38 = vpop.permute.xlu1 %1587  ;;  %v1572_v14 = vmul.f32 1.442695, %v1558_v30  ;;  %v3398_v50 = vpop.eup %3397  ;;  %3409 = vpow2.f32 %v1566_v40  ;;  %1497 = vst.msk [vmem:[#allocation3 + $0x160] sm:$0xff] %vm827_vm15, %v3396_v48 }
 0x33e   : > { %v3400_v54 = vpop.eup %3399  ;;  %1498 = vst.msk [vmem:[#allocation3 + $0x168] sm:$0xff] %vm827_vm15, %v3398_v50  ;;  %v4240_v19 = vpop.permute.xlu2 %1511 }
 0x33f   : > { %v1568_v41 = vmul.f32 1.442695, %v1556_v17  ;;  %v3402_v58 = vpop.eup %3401  ;;  %1499 = vst.msk [vmem:[#allocation3 + $0x170] sm:$0xff] %vm827_vm15, %v3400_v54  ;;  %v1654_v17 = vmul.f32 1.442695, %v4108_v3  ;;  %v4270_v54 = vperm.slane %v1040_v4, 2 }
 0x340   : > { %v3404_v59 = vpop.eup %3403  ;;  %1500 = vst.msk [vmem:[#allocation3 + $0x178] sm:$0xff] %vm827_vm15, %v3402_v58  ;;  %v4242_v30 = vpop.permute.xlu0 %2133 }
 0x341   : > { %3411 = vpow2.f32 %v1568_v41  ;;  %v3406_v7 = vpop.eup %3405  ;;  %1577 = vst.msk [vmem:[#allocation3 + $0x180] sm:$0xff] %vm827_vm15, %v3404_v59  ;;  %v4255_v41 = vperm.slane %v1040_v4, 3 }
 0x342   : > { %3413 = vpow2.f32 %v1570_v49  ;;  %v3408_v60 = vpop.eup %3407  ;;  %1578 = vst.msk [vmem:[#allocation3 + $0x188] sm:$0xff] %vm827_vm15, %v3406_v7  ;;  %3217 = vset.pattern.permute.xlu0 %v3615_v34  ;;  %v4258_v49 = vperm.slane %v1040_v4, 0  ;;  %v1282_v7 = vmul.f32 %v4114_v5, %v4270_v54  ;;  %v1719_v5 = vld [vmem:[#allocation3] sm:$0xff] }
 0x343   : > { %3415 = vpow2.f32 %v1572_v14  ;;  %v3410_v0 = vpop.eup %3409  ;;  %1579 = vst.msk [vmem:[#allocation3 + $0x190] sm:$0xff] %vm827_vm15, %v3408_v60  ;;  %3199 = vset.pattern.permute.xlu1 %v3611_v23  ;;  %2421 = vperm.xlu0 %3217, %v4227_v1   ;;  %v4263_v14 = vperm.slane %v1040_v4, 1  ;;  %v4302_v60 = vpop.f32.mrf.mxu2 }
 0x344   : > { %3417 = vpow2.f32 %v1574_v51  ;;  %1580 = vst.msk [vmem:[#allocation3 + $0x198] sm:$0xff] %vm827_vm15, %v3410_v0  ;;  %2279 = vperm.xlu1 %3199, %v4194_v24   ;;  %v1702_v51 = vmul.f32 %v4083_v56, %v4249_v42  ;;  %v1115_v59 = vmul.f32 %v4009_v61, %v4258_v49 }
 0x345   : > { %3196 = vset.pattern.permute.xlu2 %v3610_v13  ;;  %3419 = vpow2.f32 %v1644_v52  ;;  %v4222_v9 = vpop.permute.xlu1 %1679  ;;  %v1198_v56 = vmul.f32 %v4028_v22, %v4263_v14  ;;  %v1200_v61 = vmul.f32 %v4136_v46, %v4263_v14  ;;  %v1117_v22 = vmul.f32 %v4138_v47, %v4258_v49  ;;  %1291 = vst.msk [vmem:[#allocation4 + $0x80] sm:$0xff] %vm827_vm15, %v1282_v7 }
 0x346   : > { %2069 = vperm.xlu2 %3196, %v4194_v24   ;;  %3421 = vpow2.f32 %v1646_v25  ;;  %v4274_v58 = vpop.permute.xlu2 %2059  ;;  %v1366_v25 = vmul.f32 %v4077_v45, %v4255_v41  ;;  %1711 = vst.msk [vmem:[#allocation4 + $0x1c0] sm:$0xff] %vm827_vm15, %v1702_v51  ;;  %v4308_v46 = vperm.slane %v1040_v4, 6 }
 0x347   : > { %v3412_v11 = vpop.eup %3411  ;;  %3423 = vpow2.f32 %v1648_v6  ;;  %v4282_v6 = vperm.slane %v1040_v4, 4  ;;  %1123 = vst.msk [vmem:[#allocation4] sm:$0xff] %vm827_vm15, %v1115_v59 }
 0x348   : > { %v3414_v2 = vpop.eup %3413  ;;  %3425 = vpow2.f32 %v1650_v26  ;;  %1581 = vst.msk [vmem:[#allocation3 + $0x1a0] sm:$0xff] %vm827_vm15, %v3412_v11  ;;  %v4272_v52 = vpop.permute.xlu0 %2202  ;;  %v4290_v26 = vperm.slane %v1040_v4, 5  ;;  %v1727_v11 = vmul.f32 0.0, %v1719_v5 }
 0x349   : > { %v3416_v3 = vpop.eup %3415  ;;  %3427 = vpow2.f32 %v1652_v62  ;;  %1582 = vst.msk [vmem:[#allocation3 + $0x1a8] sm:$0xff] %vm827_vm15, %v3414_v2  ;;  %v1450_v62 = vmul.f32 %v4047_v63, %v4282_v6  ;;  %v1368_v63 = vmul.f32 %v4172_v55, %v4255_v41  ;;  %v1721_v2 = vld [vmem:[#allocation3 + $0x10] sm:$0xff]  ;;  %v1452_v55 = vmul.f32 %v4207_v53, %v4282_v6 }
 0x34a   : > { %v3418_v18 = vpop.eup %3417  ;;  %3429 = vpow2.f32 %v1654_v17  ;;  %1583 = vst.msk [vmem:[#allocation3 + $0x1b0] sm:$0xff] %vm827_vm15, %v3416_v3  ;;  %v1534_v47 = vmul.f32 %v4155_v15, %v4290_v26  ;;  %v1618_v15 = vmul.f32 %v4192_v38, %v4308_v46  ;;  %v1759_v38 = vld [vmem:[#allocation3 + $0x40] sm:$0xff] }
 0x34b   : > { %v3420_v10 = vpop.eup %3419  ;;  %3431 = vpow2.f32 %v1656_v12  ;;  %1584 = vst.msk [vmem:[#allocation3 + $0x1b8] sm:$0xff] %vm827_vm15, %v3418_v18  ;;  %3223 = vset.pattern.permute.xlu0 %v3611_v23  ;;  %v1284_v12 = vmul.f32 %v4174_v57, %v4270_v54  ;;  %v1729_v18 = vmul.f32 0.0, %v1721_v2  ;;  %v1620_v57 = vmul.f32 %v4209_v21, %v4308_v46 }
 0x34c   : > { %v3422_v20 = vpop.eup %3421  ;;  %3433 = vpow2.f32 %v1658_v29  ;;  %1661 = vst.msk [vmem:[#allocation3 + $0x1c0] sm:$0xff] %vm827_vm15, %v3420_v10  ;;  %3202 = vset.pattern.permute.xlu1 %v4966_v35  ;;  %1359 = vperm.xlu0 %3223, %v4302_v60   ;;  %v1704_v10 = vmul.f32 %v4222_v9, %v4249_v42 }
 0x34d   : > { %v3424_v27 = vpop.eup %3423  ;;  %v4251_v40 = vpop.permute.xlu1 %1171  ;;  %1662 = vst.msk [vmem:[#allocation3 + $0x1c8] sm:$0xff] %vm827_vm15, %v3422_v20  ;;  %2486 = vperm.xlu1 %3202, %v4194_v24  }
 0x34e   : > { %3200 = vset.pattern.permute.xlu2 %v3614_v33  ;;  %v3426_v39 = vpop.eup %3425  ;;  %1663 = vst.msk [vmem:[#allocation3 + $0x1d0] sm:$0xff] %vm827_vm15, %v3424_v27  ;;  %v4317_v17 = vpop.permute.xlu2 %2340  ;;  %v1735_v29 = vld [vmem:[#allocation4] sm:$0xff]  ;;  %v1199_v51 = vmul.f32 %v4251_v40, %v4263_v14  ;;  %v1801_v40 = vld [vmem:[#allocation3 + $0x90] sm:$0xff] }
 0x34f   : > { %2348 = vperm.xlu2 %3200, %v4194_v24   ;;  %v3428_v43 = vpop.eup %3427  ;;  %1664 = vst.msk [vmem:[#allocation3 + $0x1d8] sm:$0xff] %vm827_vm15, %v3426_v39  ;;  %v1743_v3 = vadd.f32 %v1735_v29, %v1727_v11  ;;  %v4341_v20 = vpop.f32.mrf.mxu3 }
 0x350   : > { %v3430_v44 = vpop.eup %3429  ;;  %1665 = vst.msk [vmem:[#allocation3 + $0x1e0] sm:$0xff] %vm827_vm15, %v3428_v43  ;;  %v4315_v0 = vpop.permute.xlu0 %2271 }
 0x351   : > { %v3432_v48 = vpop.eup %3431  ;;  %1666 = vst.msk [vmem:[#allocation3 + $0x1e8] sm:$0xff] %vm827_vm15, %v3430_v44  ;;  %v1767_v53 = vmul.f32 %v1759_v38, %v1743_v3  ;;  %v1536_v44 = vmul.f32 %v4240_v19, %v4290_v26  ;;  %v4367_v11 = vpop.f32.mrf.mxu2  ;;  %v1841_v38 = vld [vmem:[#allocation3 + $0xd0] sm:$0xff] }
 0x352   : > { %v3434_v50 = vpop.eup %3433  ;;  %1667 = vst.msk [vmem:[#allocation3 + $0x1f0] sm:$0xff] %vm827_vm15, %v3432_v48  ;;  %v1799_v48 = vld [vmem:[#allocation3 + $0x80] sm:$0xff] }
 0x353   : > { %1668 = vst.msk [vmem:[#allocation3 + $0x1f8] sm:$0xff] %vm827_vm15, %v3434_v50  ;;  %v1761_v50 = vld [vmem:[#allocation3 + $0x50] sm:$0xff] }
 0x354   : > { %1375 = vst.msk [vmem:[#allocation4 + $0xc0] sm:$0xff] %vm827_vm15, %v1366_v25  ;;  %3229 = vset.pattern.permute.xlu0 %v3612_v28 }
 0x355   : > { %v4296_v45 = vpop.permute.xlu1 %1339  ;;  %1207 = vst.msk [vmem:[#allocation4 + $0x40] sm:$0xff] %vm827_vm15, %v1198_v56  ;;  %3203 = vset.pattern.permute.xlu1 %v4968_v36  ;;  %2149 = vperm.xlu0 %3229, %v4341_v20   ;;  %v1815_v56 = vld [vmem:[#allocation4 + $0x80] sm:$0xff] }
 0x356   : > { %1209 = vst.msk [vmem:[#allocation4 + $0x50] sm:$0xff] %vm827_vm15, %v1200_v61  ;;  %2555 = vperm.xlu1 %3203, %v4194_v24   ;;  %v1083_v21 = vpop.permute.xlu2 %1082  ;;  %v1367_v19 = vmul.f32 %v4296_v45, %v4255_v41 }
 0x357   : > { %3201 = vset.pattern.permute.xlu2 %v3615_v34  ;;  %1125 = vst.msk [vmem:[#allocation4 + $0x10] sm:$0xff] %vm827_vm15, %v1117_v22 }
 0x358   : > { %2417 = vperm.xlu2 %3201, %v4194_v24   ;;  %1459 = vst.msk [vmem:[#allocation4 + $0x100] sm:$0xff] %vm827_vm15, %v1450_v62  ;;  %v4345_v27 = vpop.permute.xlu0 %2409  ;;  %v1839_v62 = vld [vmem:[#allocation3 + $0xc0] sm:$0xff] }
 0x359   : > { %1543 = vst.msk [vmem:[#allocation4 + $0x140] sm:$0xff] %vm827_vm15, %v1534_v47 }
 0x35a   : > { %1377 = vst.msk [vmem:[#allocation4 + $0xd0] sm:$0xff] %vm827_vm15, %v1368_v63  ;;  %v4365_v63 = vpop.f32.mrf.mxu3 }
 0x35b   : > { %1293 = vst.msk [vmem:[#allocation4 + $0x90] sm:$0xff] %vm827_vm15, %v1284_v12  ;;  %v1855_v29 = vld [vmem:[#allocation4 + $0xc0] sm:$0xff] }
 0x35c   : > { %1627 = vst.msk [vmem:[#allocation4 + $0x180] sm:$0xff] %vm827_vm15, %v1618_v15  ;;  %v1775_v24 = vld [vmem:[#allocation4 + $0x40] sm:$0xff] }
 0x35d   : > { %v1093_v4 = vpop.permute.xlu1 %1092  ;;  %1751 = vst.msk [vmem:[#allocation4] sm:$0xff] %vm827_vm15, %v1743_v3  ;;  %v1783_v9 = vadd.f32 %v1775_v24, %v1767_v53  ;;  %v1777_v7 = vld [vmem:[#allocation4 + $0x50] sm:$0xff]  ;;  %3245 = vset.pattern.permute.xlu0 %v3611_v23 }
 0x35e   : > { %v1737_v39 = vld [vmem:[#allocation4 + $0x10] sm:$0xff]  ;;  %1461 = vst.msk [vmem:[#allocation4 + $0x110] sm:$0xff] %vm827_vm15, %v1452_v55  ;;  %3204 = vset.pattern.permute.xlu1 %v3610_v13  ;;  %v1118_v47 = vmul.f32 %v1093_v4, %v4258_v49  ;;  %v1256_v15 = vpop.permute.xlu2 %1255  ;;  %2291 = vperm.xlu0 %3245, %v4365_v63   ;;  %v1879_v4 = vld [vmem:[#allocation3 + $0x100] sm:$0xff] }
 0x35f   : > { %v1745_v43 = vadd.f32 %v1737_v39, %v1729_v18  ;;  %1629 = vst.msk [vmem:[#allocation4 + $0x190] sm:$0xff] %vm827_vm15, %v1620_v57  ;;  %v1807_v25 = vmul.f32 %v1799_v48, %v1783_v9  ;;  %1102 = vperm.xlu1 %3204, %v4073_v32   ;;  %v1116_v57 = vmul.f32 %v1083_v21, %v4258_v49  ;;  %v1895_v39 = vld [vmem:[#allocation4 + $0x100] sm:$0xff]  ;;  %v1722_v48 = vld [vmem:[#allocation3 + $0x18] sm:$0xff] }
 0x360   : > { %3207 = vset.pattern.permute.xlu2 %v3611_v23  ;;  %1713 = vst.msk [vmem:[#allocation4 + $0x1d0] sm:$0xff] %vm827_vm15, %v1704_v10  ;;  %v4371_v45 = vpop.permute.xlu0 %2478  ;;  %v1283_v21 = vmul.f32 %v1256_v15, %v4270_v54 }
 0x361   : > { %1355 = vperm.xlu2 %3207, %v4073_v32   ;;  %1791 = vst.msk [vmem:[#allocation4 + $0x40] sm:$0xff] %vm827_vm15, %v1783_v9  ;;  %v1769_v59 = vmul.f32 %v1761_v50, %v1745_v43  ;;  %v1823_v61 = vadd.f32 %v1815_v56, %v1807_v25  ;;  %v1857_v9 = vld [vmem:[#allocation4 + $0xd0] sm:$0xff]  ;;  %v4388_v56 = vpop.f32.mrf.mxu2 }
 0x362   : > { %1753 = vst.msk [vmem:[#allocation4 + $0x10] sm:$0xff] %vm827_vm15, %v1745_v43  ;;  %v1817_v55 = vld [vmem:[#allocation4 + $0x90] sm:$0xff] }
 0x363   : > { %v1785_v22 = vadd.f32 %v1777_v7, %v1769_v59  ;;  %1545 = vst.msk [vmem:[#allocation4 + $0x150] sm:$0xff] %vm827_vm15, %v1536_v44  ;;  %v1847_v12 = vmul.f32 %v1839_v62, %v1823_v61  ;;  %v1881_v25 = vld [vmem:[#allocation3 + $0x110] sm:$0xff] }
 0x364   : > { %1208 = vst.msk [vmem:[#allocation4 + $0x48] sm:$0xff] %vm827_vm15, %v1199_v51  ;;  %v1919_v51 = vld [vmem:[#allocation3 + $0x140] sm:$0xff] }
 0x365   : > { %v1180_v5 = vpop.permute.xlu1 %1179  ;;  %1831 = vst.msk [vmem:[#allocation4 + $0x80] sm:$0xff] %vm827_vm15, %v1823_v61  ;;  %v1809_v2 = vmul.f32 %v1801_v40, %v1785_v22  ;;  %v1863_v3 = vadd.f32 %v1855_v29, %v1847_v12  ;;  %v1897_v62 = vld [vmem:[#allocation4 + $0x110] sm:$0xff]  ;;  %v1730_v40 = vmul.f32 0.0, %v1722_v48  ;;  %v1959_v29 = vld [vmem:[#allocation3 + $0x180] sm:$0xff] }
 0x366   : > { %1793 = vst.msk [vmem:[#allocation4 + $0x50] sm:$0xff] %vm827_vm15, %v1785_v22  ;;  %v1201_v10 = vmul.f32 %v1180_v5, %v4263_v14  ;;  %v1935_v5 = vld [vmem:[#allocation4 + $0x140] sm:$0xff]  ;;  %3248 = vset.pattern.permute.xlu0 %v3612_v28 }
 0x367   : > { %v1825_v18 = vadd.f32 %v1817_v55, %v1809_v2  ;;  %1376 = vst.msk [vmem:[#allocation4 + $0xc8] sm:$0xff] %vm827_vm15, %v1367_v19  ;;  %v1887_v53 = vmul.f32 %v1879_v4, %v1863_v3  ;;  %3206 = vset.pattern.permute.xlu1 %v4965_v31  ;;  %v1508_v19 = vpop.permute.xlu2 %1507  ;;  %2125 = vperm.xlu0 %3248, %v4388_v56   ;;  %v1921_v55 = vld [vmem:[#allocation3 + $0x150] sm:$0xff] }
 0x368   : > { %1126 = vst.msk [vmem:[#allocation4 + $0x18] sm:$0xff] %vm827_vm15, %v1118_v47  ;;  %v4392_v22 = vpop.permute.xlu0 %2547  ;;  %1271 = vperm.xlu1 %3206, %v4073_v32   ;;  %v1720_v47 = vld [vmem:[#allocation3 + $0x8] sm:$0xff] }
 0x369   : > { %3208 = vset.pattern.permute.xlu2 %v3614_v33  ;;  %1871 = vst.msk [vmem:[#allocation4 + $0xc0] sm:$0xff] %vm827_vm15, %v1863_v3  ;;  %v1849_v24 = vmul.f32 %v1841_v38, %v1825_v18  ;;  %v1903_v43 = vadd.f32 %v1895_v39, %v1887_v53  ;;  %v1535_v3 = vmul.f32 %v1508_v19, %v4290_v26  ;;  %v1728_v4 = vmul.f32 0.0, %v1720_v47  ;;  %v1762_v38 = vld [vmem:[#allocation3 + $0x58] sm:$0xff]  ;;  %v2015_v47 = vld [vmem:[#allocation4 + $0x1c0] sm:$0xff] }
 0x36a   : > { %1439 = vperm.xlu2 %3208, %v4073_v32   ;;  %1833 = vst.msk [vmem:[#allocation4 + $0x90] sm:$0xff] %vm827_vm15, %v1825_v18  ;;  %v1937_v53 = vld [vmem:[#allocation4 + $0x150] sm:$0xff] }
 0x36b   : > { %v1865_v44 = vadd.f32 %v1857_v9, %v1849_v24  ;;  %1124 = vst.msk [vmem:[#allocation4 + $0x8] sm:$0xff] %vm827_vm15, %v1116_v57  ;;  %v1927_v7 = vmul.f32 %v1919_v51, %v1903_v43  ;;  %v1961_v51 = vld [vmem:[#allocation3 + $0x190] sm:$0xff] }
 0x36c   : > { %1210 = vst.msk [vmem:[#allocation4 + $0x58] sm:$0xff] %vm827_vm15, %v1201_v10  ;;  %v1975_v10 = vld [vmem:[#allocation4 + $0x180] sm:$0xff] }
 0x36d   : > { %v1264_v50 = vpop.permute.xlu1 %1263  ;;  %1911 = vst.msk [vmem:[#allocation4 + $0x100] sm:$0xff] %vm827_vm15, %v1903_v43  ;;  %v1889_v61 = vmul.f32 %v1881_v25, %v1865_v44  ;;  %v1943_v12 = vadd.f32 %v1935_v5, %v1927_v7  ;;  %v1760_v25 = vld [vmem:[#allocation3 + $0x48] sm:$0xff]  ;;  %v1802_v5 = vld [vmem:[#allocation3 + $0x98] sm:$0xff] }
 0x36e   : > { %v1285_v59 = vmul.f32 %v1264_v50, %v4270_v54  ;;  %1873 = vst.msk [vmem:[#allocation4 + $0xd0] sm:$0xff] %vm827_vm15, %v1865_v44  ;;  %v1999_v50 = vld [vmem:[#allocation3 + $0x1c0] sm:$0xff] }
 0x36f   : > { %v1905_v2 = vadd.f32 %v1897_v62, %v1889_v61  ;;  %v1738_v15 = vld [vmem:[#allocation4 + $0x18] sm:$0xff]  ;;  %1292 = vst.msk [vmem:[#allocation4 + $0x88] sm:$0xff] %vm827_vm15, %v1283_v21  ;;  %v1967_v18 = vmul.f32 %v1959_v29, %v1943_v12  ;;  %3252 = vset.pattern.permute.xlu0 %v4966_v35 }
 0x370   : > { %1294 = vst.msk [vmem:[#allocation4 + $0x98] sm:$0xff] %vm827_vm15, %v1285_v59  ;;  %v1424_v62 = vpop.permute.xlu0 %1423  ;;  %3212 = vset.pattern.permute.xlu1 %v3610_v13  ;;  %2470 = vperm.xlu0 %3252, %v4388_v56  }
 0x371   : > { %1951 = vst.msk [vmem:[#allocation4 + $0x140] sm:$0xff] %vm827_vm15, %v1943_v12  ;;  %v1929_v57 = vmul.f32 %v1921_v55, %v1905_v2  ;;  %v1983_v9 = vadd.f32 %v1975_v10, %v1967_v18  ;;  %v1977_v12 = vld [vmem:[#allocation4 + $0x190] sm:$0xff]  ;;  %2074 = vperm.xlu1 %3212, %v4227_v1  }
 0x372   : > { %3209 = vset.pattern.permute.xlu2 %v3615_v34  ;;  %1913 = vst.msk [vmem:[#allocation4 + $0x110] sm:$0xff] %vm827_vm15, %v1905_v2  ;;  %v1736_v24 = vld [vmem:[#allocation4 + $0x8] sm:$0xff]  ;;  %v2001_v18 = vld [vmem:[#allocation3 + $0x1d0] sm:$0xff] }
 0x373   : > { %1523 = vperm.xlu2 %3209, %v4073_v32   ;;  %v1746_v32 = vadd.f32 %v1738_v15, %v1730_v40  ;;  %v1945_v43 = vadd.f32 %v1937_v53, %v1929_v57  ;;  %v1744_v44 = vadd.f32 %v1736_v24, %v1728_v4  ;;  %v1778_v48 = vld [vmem:[#allocation4 + $0x58] sm:$0xff]  ;;  %1544 = vst.msk [vmem:[#allocation4 + $0x148] sm:$0xff] %vm827_vm15, %v1535_v3  ;;  %v1592_v40 = vpop.permute.xlu2 %1591  ;;  %v1776_v2 = vld [vmem:[#allocation4 + $0x48] sm:$0xff]  ;;  %v2017_v24 = vld [vmem:[#allocation4 + $0x1d0] sm:$0xff] }
 0x374   : > { %1991 = vst.msk [vmem:[#allocation4 + $0x180] sm:$0xff] %vm827_vm15, %v1983_v9  ;;  %v2007_v7 = vmul.f32 %v1999_v50, %v1983_v9  ;;  %v1800_v57 = vld [vmem:[#allocation3 + $0x88] sm:$0xff] }
 0x375   : > { %v1770_v39 = vmul.f32 %v1762_v38, %v1746_v32  ;;  %1754 = vst.msk [vmem:[#allocation4 + $0x18] sm:$0xff] %vm827_vm15, %v1746_v32  ;;  %v1348_v21 = vpop.permute.xlu1 %1347  ;;  %v1969_v61 = vmul.f32 %v1961_v51, %v1945_v43  ;;  %v1768_v19 = vmul.f32 %v1760_v25, %v1744_v44 }
 0x376   : > { %1953 = vst.msk [vmem:[#allocation4 + $0x150] sm:$0xff] %vm827_vm15, %v1945_v43  ;;  %v2023_v29 = vadd.f32 %v2015_v47, %v2007_v7  ;;  %v1816_v4 = vld [vmem:[#allocation4 + $0x88] sm:$0xff]  ;;  %v1451_v43 = vmul.f32 %v1424_v62, %v4282_v6  ;;  %v1369_v50 = vmul.f32 %v1348_v21, %v4255_v41 }
 0x377   : > { %v1786_v59 = vadd.f32 %v1778_v48, %v1770_v39  ;;  %v1985_v55 = vadd.f32 %v1977_v12, %v1969_v61  ;;  %1752 = vst.msk [vmem:[#allocation4 + $0x8] sm:$0xff] %vm827_vm15, %v1744_v44  ;;  %v1784_v32 = vadd.f32 %v1776_v2, %v1768_v19  ;;  %v1818_v3 = vld [vmem:[#allocation4 + $0x98] sm:$0xff]  ;;  %v1840_v48 = vld [vmem:[#allocation3 + $0xc8] sm:$0xff]  ;;  %v1619_v61 = vmul.f32 %v1592_v40, %v4308_v46 }
 0x378   : > { %2031 = vst.msk [vmem:[#allocation4 + $0x1c0] sm:$0xff] %vm827_vm15, %v2023_v29  ;;  %v1676_v25 = vpop.permute.xlu0 %1675  ;;  %v1856_v7 = vld [vmem:[#allocation4 + $0xc8] sm:$0xff]  ;;  %3263 = vset.pattern.permute.xlu0 %v3615_v34  ;;  %v1842_v2 = vld [vmem:[#allocation3 + $0xd8] sm:$0xff] }
 0x379   : > { %v1810_v15 = vmul.f32 %v1802_v5, %v1786_v59  ;;  %1794 = vst.msk [vmem:[#allocation4 + $0x58] sm:$0xff] %vm827_vm15, %v1786_v59  ;;  %v2009_v10 = vmul.f32 %v2001_v18, %v1985_v55  ;;  %v1808_v53 = vmul.f32 %v1800_v57, %v1784_v32  ;;  %v1703_v5 = vmul.f32 %v1676_v25, %v4249_v42  ;;  %v1880_v40 = vld [vmem:[#allocation3 + $0x108] sm:$0xff] }
 0x37a   : > { %1993 = vst.msk [vmem:[#allocation4 + $0x190] sm:$0xff] %vm827_vm15, %v1985_v55  ;;  %3214 = vset.pattern.permute.xlu1 %v4965_v31  ;;  %2429 = vperm.xlu0 %3263, %v4365_v63  }
 0x37b   : > { %3213 = vset.pattern.permute.xlu2 %v3612_v28  ;;  %v1826_v38 = vadd.f32 %v1818_v3, %v1810_v15  ;;  %v2025_v39 = vadd.f32 %v2017_v24, %v2009_v10  ;;  %1792 = vst.msk [vmem:[#allocation4 + $0x48] sm:$0xff] %vm827_vm15, %v1784_v32  ;;  %v1824_v9 = vadd.f32 %v1816_v4, %v1808_v53  ;;  %v4424_v59 = vpop.permute.xlu2 %2137  ;;  %v1920_v4 = vld [vmem:[#allocation3 + $0x148] sm:$0xff] }
 0x37c   : > { %2145 = vperm.xlu2 %3213, %v4227_v1   ;;  %1460 = vst.msk [vmem:[#allocation4 + $0x108] sm:$0xff] %vm827_vm15, %v1451_v43  ;;  %2214 = vperm.xlu1 %3214, %v4227_v1  }
 0x37d   : > { %v1600_v44 = vpop.permute.xlu1 %1599  ;;  %1834 = vst.msk [vmem:[#allocation4 + $0x98] sm:$0xff] %vm827_vm15, %v1826_v38  ;;  %v1848_v51 = vmul.f32 %v1840_v48, %v1824_v9  ;;  %v1850_v32 = vmul.f32 %v1842_v2, %v1826_v38  ;;  %v1936_v38 = vld [vmem:[#allocation4 + $0x148] sm:$0xff] }
 0x37e   : > { %2033 = vst.msk [vmem:[#allocation4 + $0x1d0] sm:$0xff] %vm827_vm15, %v2025_v39  ;;  %v1621_v21 = vmul.f32 %v1600_v44, %v4308_v46  ;;  %v1882_v44 = vld [vmem:[#allocation3 + $0x118] sm:$0xff] }
 0x37f   : > { %1832 = vst.msk [vmem:[#allocation4 + $0x88] sm:$0xff] %vm827_vm15, %v1824_v9  ;;  %v1864_v19 = vadd.f32 %v1856_v7, %v1848_v51  ;;  %v1960_v9 = vld [vmem:[#allocation3 + $0x188] sm:$0xff] }
 0x380   : > { %1378 = vst.msk [vmem:[#allocation4 + $0xd8] sm:$0xff] %vm827_vm15, %v1369_v50  ;;  %v1432_v15 = vpop.permute.xlu0 %1431 }
 0x381   : > { %1872 = vst.msk [vmem:[#allocation4 + $0xc8] sm:$0xff] %vm827_vm15, %v1864_v19  ;;  %v1888_v12 = vmul.f32 %v1880_v40, %v1864_v19  ;;  %v1453_v3 = vmul.f32 %v1432_v15, %v4282_v6  ;;  %v2000_v19 = vld [vmem:[#allocation3 + $0x1c8] sm:$0xff] }
 0x382   : > { %1628 = vst.msk [vmem:[#allocation4 + $0x188] sm:$0xff] %vm827_vm15, %v1619_v61  ;;  %3265 = vset.pattern.permute.xlu0 %v4968_v36 }
 0x383   : > { %1712 = vst.msk [vmem:[#allocation4 + $0x1c8] sm:$0xff] %vm827_vm15, %v1703_v5  ;;  %v4443_v29 = vpop.permute.xlu2 %2275  ;;  %v1896_v55 = vld [vmem:[#allocation4 + $0x108] sm:$0xff] }
 0x384   : > { %3218 = vset.pattern.permute.xlu2 %v4966_v35  ;;  %1630 = vst.msk [vmem:[#allocation4 + $0x198] sm:$0xff] %vm827_vm15, %v1621_v21  ;;  %v1904_v18 = vadd.f32 %v1896_v55, %v1888_v12  ;;  %3215 = vset.pattern.permute.xlu1 %v3611_v23  ;;  %v1922_v12 = vld [vmem:[#allocation3 + $0x158] sm:$0xff] }
 0x385   : > { %2490 = vperm.xlu2 %3218, %v4227_v1   ;;  %v1684_v62 = vpop.permute.xlu1 %1683  ;;  %1462 = vst.msk [vmem:[#allocation4 + $0x118] sm:$0xff] %vm827_vm15, %v1453_v3  ;;  %2283 = vperm.xlu1 %3215, %v4227_v1  }
 0x386   : > { %v1705_v47 = vmul.f32 %v1684_v62, %v4249_v42  ;;  %1912 = vst.msk [vmem:[#allocation4 + $0x108] sm:$0xff] %vm827_vm15, %v1904_v18  ;;  %v1928_v53 = vmul.f32 %v1920_v4, %v1904_v18 }
 0x387   : > { %v1858_v57 = vld [vmem:[#allocation4 + $0xd8] sm:$0xff] }
 0x388   : > { %1714 = vst.msk [vmem:[#allocation4 + $0x1d8] sm:$0xff] %vm827_vm15, %v1705_v47  ;;  %v1866_v10 = vadd.f32 %v1858_v57, %v1850_v32  ;;  %v1944_v24 = vadd.f32 %v1936_v38, %v1928_v53  ;;  %v1516_v48 = vpop.permute.xlu0 %1515  ;;  %v1962_v57 = vld [vmem:[#allocation3 + $0x198] sm:$0xff] }
 0x389   : > { %v1537_v25 = vmul.f32 %v1516_v48, %v4290_v26 }
 0x38a   : > { %1874 = vst.msk [vmem:[#allocation4 + $0xd8] sm:$0xff] %vm827_vm15, %v1866_v10  ;;  %v1968_v43 = vmul.f32 %v1960_v9, %v1944_v24  ;;  %v1890_v51 = vmul.f32 %v1882_v44, %v1866_v10  ;;  %v2016_v62 = vld [vmem:[#allocation4 + $0x1c8] sm:$0xff] }
 0x38b   : > { %1952 = vst.msk [vmem:[#allocation4 + $0x148] sm:$0xff] %vm827_vm15, %v1944_v24  ;;  %v4458_v50 = vpop.permute.xlu2 %2344  ;;  %v1978_v10 = vld [vmem:[#allocation4 + $0x198] sm:$0xff] }
 0x38c   : > { %v1898_v61 = vld [vmem:[#allocation4 + $0x118] sm:$0xff]  ;;  %1546 = vst.msk [vmem:[#allocation4 + $0x158] sm:$0xff] %vm827_vm15, %v1537_v25 }
 0x38d   : > { %3219 = vset.pattern.permute.xlu2 %v4968_v36  ;;  %v4454_v39 = vpop.permute.xlu1 %2064  ;;  %v1906_v5 = vadd.f32 %v1898_v61, %v1890_v51  ;;  %3221 = vset.pattern.permute.xlu1 %v3612_v28  ;;  %v2002_v24 = vld [vmem:[#allocation3 + $0x1d8] sm:$0xff]  ;;  %v1723_v61 = vld [vmem:[#allocation3 + $0x20] sm:$0xff] }
 0x38e   : > { %2559 = vperm.xlu2 %3219, %v4227_v1   ;;  %v1976_v1 = vld [vmem:[#allocation4 + $0x188] sm:$0xff]  ;;  %1191 = vperm.xlu1 %3221, %v4302_v60  }
 0x38f   : > { %v1984_v7 = vadd.f32 %v1976_v1, %v1968_v43  ;;  %1914 = vst.msk [vmem:[#allocation4 + $0x118] sm:$0xff] %vm827_vm15, %v1906_v5  ;;  %v1930_v55 = vmul.f32 %v1922_v12, %v1906_v5  ;;  %v2018_v51 = vld [vmem:[#allocation4 + $0x1d8] sm:$0xff] }
 0x390   : > { %v1188_v2 = vpop.permute.xlu0 %1187 }
 0x391   : > { %1992 = vst.msk [vmem:[#allocation4 + $0x188] sm:$0xff] %vm827_vm15, %v1984_v7  ;;  %v2008_v21 = vmul.f32 %v2000_v19, %v1984_v7  ;;  %v1203_v32 = vmul.f32 %v1188_v2, %v4263_v14 }
 0x393   : > { %v2024_v40 = vadd.f32 %v2016_v62, %v2008_v21  ;;  %v4471_v15 = vpop.permute.xlu2 %2413  ;;  %v1938_v3 = vld [vmem:[#allocation4 + $0x158] sm:$0xff]  ;;  %1212 = vst.msk [vmem:[#allocation4 + $0x68] sm:$0xff] %vm827_vm15, %v1203_v32 }
 0x394   : > { %v1946_v18 = vadd.f32 %v1938_v3, %v1930_v55 }
 0x395   : > { %v4466_v47 = vpop.permute.xlu1 %2206  ;;  %2032 = vst.msk [vmem:[#allocation4 + $0x1c8] sm:$0xff] %vm827_vm15, %v2024_v40  ;;  %v1731_v40 = vmul.f32 0.0, %v1723_v61  ;;  %v1843_v61 = vld [vmem:[#allocation3 + $0xe0] sm:$0xff] }
 0x396   : > { %3220 = vset.pattern.permute.xlu2 %v3610_v13  ;;  %1954 = vst.msk [vmem:[#allocation4 + $0x158] sm:$0xff] %vm827_vm15, %v1946_v18  ;;  %v1970_v4 = vmul.f32 %v1962_v57, %v1946_v18  ;;  %3224 = vset.pattern.permute.xlu1 %v3614_v33  ;;  %v1763_v18 = vld [vmem:[#allocation3 + $0x60] sm:$0xff] }
 0x397   : > { %1107 = vperm.xlu2 %3220, %v4302_v60   ;;  %1443 = vperm.xlu1 %3224, %v4302_v60  }
 0x398   : > { %v1986_v38 = vadd.f32 %v1978_v10, %v1970_v4  ;;  %v1608_v9 = vpop.permute.xlu0 %1607 }
 0x399   : > { %v1623_v48 = vmul.f32 %v1608_v9, %v4308_v46 }
 0x39a   : > { %1994 = vst.msk [vmem:[#allocation4 + $0x198] sm:$0xff] %vm827_vm15, %v1986_v38  ;;  %v2010_v44 = vmul.f32 %v2002_v24, %v1986_v38 }
 0x39b   : > { %v1098_v43 = vpop.permute.xlu2 %1097  ;;  %1632 = vst.msk [vmem:[#allocation4 + $0x1a8] sm:$0xff] %vm827_vm15, %v1623_v48 }
 0x39c   : > { %v1119_v1 = vmul.f32 %v1098_v43, %v4258_v49  ;;  %v2026_v25 = vadd.f32 %v2018_v51, %v2010_v44  ;;  %v1803_v43 = vld [vmem:[#allocation3 + $0xa0] sm:$0xff] }
 0x39d   : > { %v4477_v53 = vpop.permute.xlu1 %2482 }
 0x39e   : > { %1127 = vst.msk [vmem:[#allocation4 + $0x20] sm:$0xff] %vm827_vm15, %v1119_v1 }
 0x39f   : > { %3222 = vset.pattern.permute.xlu2 %v4965_v31  ;;  %2034 = vst.msk [vmem:[#allocation4 + $0x1d8] sm:$0xff] %vm827_vm15, %v2026_v25  ;;  %3225 = vset.pattern.permute.xlu1 %v3615_v34 }
 0x3a0   : > { %1275 = vperm.xlu2 %3222, %v4302_v60   ;;  %1527 = vperm.xlu1 %3225, %v4302_v60   ;;  %v1692_v19 = vpop.permute.xlu0 %1691 }
 0x3a1   : > { %v1707_v21 = vmul.f32 %v1692_v19, %v4249_v42 }
 0x3a3   : > { %v1184_v5 = vpop.permute.xlu2 %1183  ;;  %1716 = vst.msk [vmem:[#allocation4 + $0x1e8] sm:$0xff] %vm827_vm15, %v1707_v21 }
 0x3a4   : > { %v1202_v62 = vmul.f32 %v1184_v5, %v4263_v14 }
 0x3a5   : > { %v4488_v7 = vpop.permute.xlu1 %2551  ;;  %v1739_v12 = vld [vmem:[#allocation4 + $0x20] sm:$0xff] }
 0x3a6   : > { %v1747_v2 = vadd.f32 %v1739_v12, %v1731_v40  ;;  %1211 = vst.msk [vmem:[#allocation4 + $0x60] sm:$0xff] %vm827_vm15, %v1202_v62 }
 0x3a8   : > { %3226 = vset.pattern.permute.xlu2 %v4966_v35  ;;  %1755 = vst.msk [vmem:[#allocation4 + $0x20] sm:$0xff] %vm827_vm15, %v1747_v2  ;;  %3227 = vset.pattern.permute.xlu1 %v4968_v36  ;;  %v1771_v4 = vmul.f32 %v1763_v18, %v1747_v2  ;;  %v1883_v2 = vld [vmem:[#allocation3 + $0x120] sm:$0xff] }
 0x3a9   : > { %1611 = vperm.xlu2 %3226, %v4302_v60   ;;  %1695 = vperm.xlu1 %3227, %v4302_v60  }
 0x3ab   : > { %v1268_v3 = vpop.permute.xlu2 %1267 }
 0x3ac   : > { %v1286_v57 = vmul.f32 %v1268_v3, %v4270_v54  ;;  %v4508_v9 = vpop.permute.xlu0 %2352 }
 0x3ad   : > { %v1352_v55 = vpop.permute.xlu1 %1351  ;;  %v1779_v10 = vld [vmem:[#allocation4 + $0x60] sm:$0xff] }
 0x3ae   : > { %v1370_v32 = vmul.f32 %v1352_v55, %v4255_v41  ;;  %1295 = vst.msk [vmem:[#allocation4 + $0xa0] sm:$0xff] %vm827_vm15, %v1286_v57  ;;  %v1787_v38 = vadd.f32 %v1779_v10, %v1771_v4  ;;  %v1923_v4 = vld [vmem:[#allocation3 + $0x160] sm:$0xff] }
 0x3b0   : > { %1379 = vst.msk [vmem:[#allocation4 + $0xe0] sm:$0xff] %vm827_vm15, %v1370_v32  ;;  %v1811_v48 = vmul.f32 %v1803_v43, %v1787_v38  ;;  %v1963_v43 = vld [vmem:[#allocation3 + $0x1a0] sm:$0xff] }
 0x3b1   : > { %3228 = vset.pattern.permute.xlu2 %v3610_v13  ;;  %1795 = vst.msk [vmem:[#allocation4 + $0x60] sm:$0xff] %vm827_vm15, %v1787_v38  ;;  %3232 = vset.pattern.permute.xlu1 %v3614_v33 }
 0x3b2   : > { %2079 = vperm.xlu2 %3228, %v4341_v20   ;;  %2356 = vperm.xlu1 %3232, %v4341_v20  }
 0x3b3   : > { %v1520_v44 = vpop.permute.xlu2 %1519 }
 0x3b4   : > { %v1538_v1 = vmul.f32 %v1520_v44, %v4290_v26 }
 0x3b5   : > { %v1436_v24 = vpop.permute.xlu1 %1435  ;;  %v1819_v51 = vld [vmem:[#allocation4 + $0xa0] sm:$0xff]  ;;  %v4520_v12 = vpop.permute.xlu0 %2421 }
 0x3b6   : > { %v1454_v60 = vmul.f32 %v1436_v24, %v4282_v6  ;;  %v1827_v25 = vadd.f32 %v1819_v51, %v1811_v48  ;;  %1547 = vst.msk [vmem:[#allocation4 + $0x160] sm:$0xff] %vm827_vm15, %v1538_v1 }
 0x3b7   : > { %v1859_v5 = vld [vmem:[#allocation4 + $0xe0] sm:$0xff] }
 0x3b8   : > { %1463 = vst.msk [vmem:[#allocation4 + $0x120] sm:$0xff] %vm827_vm15, %v1454_v60  ;;  %v1851_v19 = vmul.f32 %v1843_v61, %v1827_v25 }
 0x3b9   : > { %1835 = vst.msk [vmem:[#allocation4 + $0xa0] sm:$0xff] %vm827_vm15, %v1827_v25 }
 0x3ba   : > { %3230 = vset.pattern.permute.xlu2 %v4965_v31  ;;  %v1867_v62 = vadd.f32 %v1859_v5, %v1851_v19  ;;  %3233 = vset.pattern.permute.xlu1 %v3615_v34  ;;  %v2003_v19 = vld [vmem:[#allocation3 + $0x1e0] sm:$0xff] }
 0x3bb   : > { %2218 = vperm.xlu2 %3230, %v4341_v20   ;;  %v1604_v32 = vpop.permute.xlu2 %1603  ;;  %2425 = vperm.xlu1 %3233, %v4341_v20  }
 0x3bc   : > { %1875 = vst.msk [vmem:[#allocation4 + $0xe0] sm:$0xff] %vm827_vm15, %v1867_v62  ;;  %v1891_v3 = vmul.f32 %v1883_v2, %v1867_v62  ;;  %v1622_v18 = vmul.f32 %v1604_v32, %v4308_v46 }
 0x3bd   : > { %v1688_v21 = vpop.permute.xlu1 %1687  ;;  %v1939_v38 = vld [vmem:[#allocation4 + $0x160] sm:$0xff] }
 0x3be   : > { %v1706_v40 = vmul.f32 %v1688_v21, %v4249_v42  ;;  %1631 = vst.msk [vmem:[#allocation4 + $0x1a0] sm:$0xff] %vm827_vm15, %v1622_v18  ;;  %v1360_v48 = vpop.permute.xlu0 %1359 }
 0x3bf   : > { %v1899_v55 = vld [vmem:[#allocation4 + $0x120] sm:$0xff]  ;;  %v1372_v51 = vmul.f32 %v1360_v48, %v4255_v41 }
 0x3c0   : > { %1715 = vst.msk [vmem:[#allocation4 + $0x1e0] sm:$0xff] %vm827_vm15, %v1706_v40  ;;  %v1907_v57 = vadd.f32 %v1899_v55, %v1891_v3 }
 0x3c1   : > { %1381 = vst.msk [vmem:[#allocation4 + $0xf0] sm:$0xff] %vm827_vm15, %v1372_v51 }
 0x3c2   : > { %1915 = vst.msk [vmem:[#allocation4 + $0x120] sm:$0xff] %vm827_vm15, %v1907_v57  ;;  %v1931_v10 = vmul.f32 %v1923_v4, %v1907_v57 }
 0x3c3   : > { %3231 = vset.pattern.permute.xlu2 %v3611_v23  ;;  %v4533_v44 = vpop.permute.xlu2 %2069  ;;  %3234 = vset.pattern.permute.xlu1 %v3610_v13 }
 0x3c4   : > { %2287 = vperm.xlu2 %3231, %v4341_v20   ;;  %v1947_v60 = vadd.f32 %v1939_v38, %v1931_v10  ;;  %1112 = vperm.xlu1 %3234, %v4367_v11  }
 0x3c5   : > { %v4531_v24 = vpop.permute.xlu1 %2141  ;;  %v1979_v25 = vld [vmem:[#allocation4 + $0x1a0] sm:$0xff] }
 0x3c6   : > { %1955 = vst.msk [vmem:[#allocation4 + $0x160] sm:$0xff] %vm827_vm15, %v1947_v60  ;;  %v1971_v1 = vmul.f32 %v1963_v43, %v1947_v60 }
 0x3c7   : > { %v2019_v21 = vld [vmem:[#allocation4 + $0x1e0] sm:$0xff] }
 0x3c8   : > { %v1987_v61 = vadd.f32 %v1979_v25, %v1971_v1  ;;  %v1724_v1 = vld [vmem:[#allocation3 + $0x28] sm:$0xff] }
 0x3c9   : > { %v1732_v25 = vmul.f32 0.0, %v1724_v1 }
 0x3ca   : > { %1995 = vst.msk [vmem:[#allocation4 + $0x1a0] sm:$0xff] %vm827_vm15, %v1987_v61  ;;  %v2011_v5 = vmul.f32 %v2003_v19, %v1987_v61 }
 0x3cb   : > { %v4545_v2 = vpop.permute.xlu2 %2348 }
 0x3cc   : > { %3235 = vset.pattern.permute.xlu2 %v3612_v28  ;;  %v2027_v40 = vadd.f32 %v2019_v21, %v2011_v5  ;;  %3236 = vset.pattern.permute.xlu1 %v4965_v31 }
 0x3cd   : > { %1195 = vperm.xlu2 %3235, %v4367_v11   ;;  %v4543_v62 = vpop.permute.xlu1 %2210  ;;  %1279 = vperm.xlu1 %3236, %v4367_v11  }
 0x3ce   : > { %2035 = vst.msk [vmem:[#allocation4 + $0x1e0] sm:$0xff] %vm827_vm15, %v2027_v40  ;;  %v1764_v40 = vld [vmem:[#allocation3 + $0x68] sm:$0xff] }
 0x3d3   : > { %v4554_v32 = vpop.permute.xlu2 %2417 }
 0x3d5   : > { %3239 = vset.pattern.permute.xlu2 %v3615_v34  ;;  %v4551_v55 = vpop.permute.xlu1 %2279  ;;  %3237 = vset.pattern.permute.xlu1 %v3611_v23 }
 0x3d6   : > { %1531 = vperm.xlu2 %3239, %v4367_v11   ;;  %1363 = vperm.xlu1 %3237, %v4367_v11  }
 0x3db   : > { %v1356_v18 = vpop.permute.xlu2 %1355 }
 0x3dc   : > { %v1371_v57 = vmul.f32 %v1356_v18, %v4255_v41 }
 0x3dd   : > { %v4558_v3 = vpop.permute.xlu1 %2486 }
 0x3de   : > { %3240 = vset.pattern.permute.xlu2 %v4966_v35  ;;  %1380 = vst.msk [vmem:[#allocation4 + $0xe8] sm:$0xff] %vm827_vm15, %v1371_v57  ;;  %3238 = vset.pattern.permute.xlu1 %v3614_v33  ;;  %v1780_v57 = vld [vmem:[#allocation4 + $0x68] sm:$0xff] }
 0x3df   : > { %1615 = vperm.xlu2 %3240, %v4367_v11   ;;  %1447 = vperm.xlu1 %3238, %v4367_v11   ;;  %v2004_v35 = vld [vmem:[#allocation3 + $0x1e8] sm:$0xff] }
 0x3e3   : > { %v1440_v10 = vpop.permute.xlu2 %1439 }
 0x3e4   : > { %v1455_v38 = vmul.f32 %v1440_v10, %v4282_v6 }
 0x3e5   : > { %v4565_v4 = vpop.permute.xlu1 %2555 }
 0x3e6   : > { %1464 = vst.msk [vmem:[#allocation4 + $0x128] sm:$0xff] %vm827_vm15, %v1455_v38  ;;  %v1804_v38 = vld [vmem:[#allocation3 + $0xa8] sm:$0xff] }
 0x3e7   : > { %3241 = vset.pattern.permute.xlu2 %v4968_v36  ;;  %3243 = vset.pattern.permute.xlu1 %v3612_v28 }
 0x3e8   : > { %1699 = vperm.xlu2 %3241, %v4367_v11   ;;  %2153 = vperm.xlu1 %3243, %v4365_v63  }
 0x3eb   : > { %v1524_v48 = vpop.permute.xlu2 %1523 }
 0x3ec   : > { %v1539_v11 = vmul.f32 %v1524_v48, %v4290_v26 }
 0x3ed   : > { %v1103_v60 = vpop.permute.xlu1 %1102 }
 0x3ee   : > { %v1120_v43 = vmul.f32 %v1103_v60, %v4258_v49  ;;  %1548 = vst.msk [vmem:[#allocation4 + $0x168] sm:$0xff] %vm827_vm15, %v1539_v11 }
 0x3f0   : > { %3242 = vset.pattern.permute.xlu2 %v3610_v13  ;;  %1128 = vst.msk [vmem:[#allocation4 + $0x28] sm:$0xff] %vm827_vm15, %v1120_v43  ;;  %3246 = vset.pattern.permute.xlu1 %v3614_v33 }
 0x3f1   : > { %2084 = vperm.xlu2 %3242, %v4365_v63   ;;  %2360 = vperm.xlu1 %3246, %v4365_v63  }
 0x3f3   : > { %v4582_v5 = vpop.permute.xlu2 %2145 }
 0x3f5   : > { %v1272_v51 = vpop.permute.xlu1 %1271 }
 0x3f6   : > { %v1287_v61 = vmul.f32 %v1272_v51, %v4270_v54  ;;  %v4594_v51 = vpop.f32.mrf.mxu2 }
 0x3f7   : > { %v1740_v19 = vld [vmem:[#allocation4 + $0x28] sm:$0xff] }
 0x3f8   : > { %v1748_v21 = vadd.f32 %v1740_v19, %v1732_v25  ;;  %1296 = vst.msk [vmem:[#allocation4 + $0xa8] sm:$0xff] %vm827_vm15, %v1287_v61  ;;  %v1844_v25 = vld [vmem:[#allocation3 + $0xe8] sm:$0xff] }
 0x3f9   : > { %3244 = vset.pattern.permute.xlu2 %v4965_v31  ;;  %3247 = vset.pattern.permute.xlu1 %v3610_v13  ;;  %v1860_v19 = vld [vmem:[#allocation4 + $0xe8] sm:$0xff] }
 0x3fa   : > { %2222 = vperm.xlu2 %3244, %v4365_v63   ;;  %1756 = vst.msk [vmem:[#allocation4 + $0x28] sm:$0xff] %vm827_vm15, %v1748_v21  ;;  %v1772_v18 = vmul.f32 %v1764_v40, %v1748_v21  ;;  %2049 = vperm.xlu1 %3247, %v4388_v56   ;;  %v1884_v40 = vld [vmem:[#allocation3 + $0x128] sm:$0xff] }
 0x3fb   : > { %v4591_v11 = vpop.permute.xlu2 %2490 }
 0x3fc   : > { %v1788_v10 = vadd.f32 %v1780_v57, %v1772_v18 }
 0x3fd   : > { %v4588_v60 = vpop.permute.xlu1 %2074 }
 0x3fe   : > { %1796 = vst.msk [vmem:[#allocation4 + $0x68] sm:$0xff] %vm827_vm15, %v1788_v10  ;;  %v1812_v43 = vmul.f32 %v1804_v38, %v1788_v10  ;;  %v1900_v10 = vld [vmem:[#allocation4 + $0x128] sm:$0xff] }
 0x3ff   : > { %v1820_v48 = vld [vmem:[#allocation4 + $0xa8] sm:$0xff] }
 0x400   : > { %v1828_v1 = vadd.f32 %v1820_v48, %v1812_v43 }
 0x402   : > { %2194 = vperm.xlu2 %3244, %v4388_v56   ;;  %1836 = vst.msk [vmem:[#allocation4 + $0xa8] sm:$0xff] %vm827_vm15, %v1828_v1  ;;  %v1852_v61 = vmul.f32 %v1844_v25, %v1828_v1  ;;  %3249 = vset.pattern.permute.xlu1 %v3611_v23  ;;  %v1940_v1 = vld [vmem:[#allocation4 + $0x168] sm:$0xff]  ;;  %v2994_v25 = vmul.f32 -1.442695, %v3825_v37 }
 0x403   : > { %v4603_v38 = vpop.permute.xlu2 %2559  ;;  %2263 = vperm.xlu1 %3249, %v4388_v56  }
 0x404   : > { %v1868_v21 = vadd.f32 %v1860_v19, %v1852_v61  ;;  %v1964_v19 = vld [vmem:[#allocation3 + $0x1a8] sm:$0xff]  ;;  %3435 = vpow2.f32 %v2994_v25 }
 0x405   : > { %v4600_v18 = vpop.permute.xlu1 %2214 }
 0x406   : > { %1876 = vst.msk [vmem:[#allocation4 + $0xe8] sm:$0xff] %vm827_vm15, %v1868_v21  ;;  %v1892_v57 = vmul.f32 %v1884_v40, %v1868_v21 }
 0x408   : > { %v1908_v43 = vadd.f32 %v1900_v10, %v1892_v57  ;;  %v1980_v57 = vld [vmem:[#allocation4 + $0x1a8] sm:$0xff] }
 0x40a   : > { %3254 = vset.pattern.permute.xlu2 %v3610_v13  ;;  %v1924_v13 = vld [vmem:[#allocation3 + $0x168] sm:$0xff]  ;;  %1916 = vst.msk [vmem:[#allocation4 + $0x128] sm:$0xff] %vm827_vm15, %v1908_v43  ;;  %v3436_v25 = vpop.eup %3435 }
 0x40b   : > { %2054 = vperm.xlu2 %3254, %v4594_v51   ;;  %v1932_v48 = vmul.f32 %v1924_v13, %v1908_v43  ;;  %v1108_v10 = vpop.permute.xlu2 %1107  ;;  %3250 = vset.pattern.permute.xlu1 %v3614_v33  ;;  %v2020_v13 = vld [vmem:[#allocation4 + $0x1e8] sm:$0xff] }
 0x40c   : > { %2332 = vperm.xlu1 %3250, %v4388_v56  }
 0x40d   : > { %v1948_v61 = vadd.f32 %v1940_v1, %v1932_v48  ;;  %v4611_v21 = vpop.permute.xlu1 %2283 }
 0x40f   : > { %1956 = vst.msk [vmem:[#allocation4 + $0x168] sm:$0xff] %vm827_vm15, %v1948_v61  ;;  %v1972_v40 = vmul.f32 %v1964_v19, %v1948_v61  ;;  %v1725_v61 = vld [vmem:[#allocation3 + $0x30] sm:$0xff] }
 0x411   : > { %v1988_v31 = vadd.f32 %v1980_v57, %v1972_v40  ;;  %v4625_v40 = vadd.f32 1.0, %v3436_v25 }
 0x413   : > { %3257 = vset.pattern.permute.xlu2 %v3611_v23  ;;  %v1121_v23 = vmul.f32 %v1108_v10, %v4258_v49  ;;  %v2012_v43 = vmul.f32 %v2004_v35, %v1988_v31  ;;  %1996 = vst.msk [vmem:[#allocation4 + $0x1a8] sm:$0xff] %vm827_vm15, %v1988_v31  ;;  %v1276_v35 = vpop.permute.xlu2 %1275  ;;  %3437 = vrcp.f32 %v4625_v40  ;;  %vm2627_vm4 = vweird.f32 %v4625_v40 }
 0x414   : > { %2267 = vperm.xlu2 %3257, %v4594_v51   ;;  %v1288_v31 = vmul.f32 %v1276_v35, %v4270_v54  ;;  %3251 = vset.pattern.permute.xlu1 %v3615_v34  ;;  %v1805_v35 = vld [vmem:[#allocation3 + $0xb0] sm:$0xff] }
 0x415   : > { %1129 = vst.msk [vmem:[#allocation4 + $0x30] sm:$0xff] %vm827_vm15, %v1121_v23  ;;  %v2028_v48 = vadd.f32 %v2020_v13, %v2012_v43  ;;  %v1192_v1 = vpop.permute.xlu1 %1191  ;;  %2401 = vperm.xlu1 %3251, %v4388_v56   ;;  %v1765_v23 = vld [vmem:[#allocation3 + $0x70] sm:$0xff] }
 0x416   : > { %v1204_v19 = vmul.f32 %v1192_v1, %v4263_v14  ;;  %1297 = vst.msk [vmem:[#allocation4 + $0xb0] sm:$0xff] %vm827_vm15, %v1288_v31 }
 0x417   : > { %2036 = vst.msk [vmem:[#allocation4 + $0x1e8] sm:$0xff] %vm827_vm15, %v2028_v48 }
 0x418   : > { %1213 = vst.msk [vmem:[#allocation4 + $0x70] sm:$0xff] %vm827_vm15, %v1204_v19 }
 0x419   : > { %v4638_v31 = vpop.eup %3437 }
 0x41a   : > { %vm2628_vm3 = vweird.f32 %v4638_v31 }
 0x41b   : > { %v1612_v25 = vpop.permute.xlu2 %1611  ;;  %vm2629_vm6 = vmor %vm2627_vm4, %vm2628_vm3 }
 0x41c   : > { %3258 = vset.pattern.permute.xlu2 %v3614_v33  ;;  %v1733_v33 = vmul.f32 0.0, %v1725_v61  ;;  %v1741_v57 = vld [vmem:[#allocation4 + $0x30] sm:$0xff]  ;;  %v1624_v19 = vmul.f32 %v1612_v25, %v4308_v46 }
 0x41d   : > { %2336 = vperm.xlu2 %3258, %v4594_v51   ;;  %v1444_v43 = vpop.permute.xlu1 %1443  ;;  %3253 = vset.pattern.permute.xlu1 %v4968_v36 }
 0x41e   : > { %v1749_v10 = vadd.f32 %v1741_v57, %v1733_v33  ;;  %v1456_v48 = vmul.f32 %v1444_v43, %v4282_v6  ;;  %v1821_v33 = vld [vmem:[#allocation4 + $0xb0] sm:$0xff]  ;;  %1633 = vst.msk [vmem:[#allocation4 + $0x1b0] sm:$0xff] %vm827_vm15, %v1624_v19  ;;  %2539 = vperm.xlu1 %3253, %v4388_v56   ;;  %v2623_v43 = vmul.f32 %v4638_v31, %v4625_v40 }
 0x41f   : > { %v1781_v1 = vld [vmem:[#allocation4 + $0x70] sm:$0xff] }
 0x420   : > { %1757 = vst.msk [vmem:[#allocation4 + $0x30] sm:$0xff] %vm827_vm15, %v1749_v10  ;;  %v1773_v13 = vmul.f32 %v1765_v23, %v1749_v10  ;;  %v1845_v10 = vld [vmem:[#allocation3 + $0xf0] sm:$0xff]  ;;  %v2624_v19 = vsub.f32 1.0, %v2623_v43 }
 0x421   : > { %1465 = vst.msk [vmem:[#allocation4 + $0x130] sm:$0xff] %vm827_vm15, %v1456_v48  ;;  %v1885_v56 = vld [vmem:[#allocation3 + $0x130] sm:$0xff] }
 0x422   : > { %v1789_v61 = vadd.f32 %v1781_v1, %v1773_v13  ;;  %v1861_v1 = vld [vmem:[#allocation4 + $0xf0] sm:$0xff] }
 0x423   : > { %v4649_v25 = vpop.permute.xlu2 %2079 }
 0x424   : > { %1797 = vst.msk [vmem:[#allocation4 + $0x70] sm:$0xff] %vm827_vm15, %v1789_v61 }
 0x425   : > { %3259 = vset.pattern.permute.xlu2 %v3615_v34  ;;  %v1813_v34 = vmul.f32 %v1805_v35, %v1789_v61  ;;  %v1528_v23 = vpop.permute.xlu1 %1527 }
 0x426   : > { %2405 = vperm.xlu2 %3259, %v4594_v51   ;;  %v1540_v48 = vmul.f32 %v1528_v23, %v4290_v26  ;;  %3255 = vset.pattern.permute.xlu1 %v3612_v28  ;;  %v1965_v28 = vld [vmem:[#allocation3 + $0x1b0] sm:$0xff] }
 0x427   : > { %v1829_v57 = vadd.f32 %v1821_v33, %v1813_v34  ;;  %2129 = vperm.xlu1 %3255, %v4594_v51  }
 0x428   : > { %1549 = vst.msk [vmem:[#allocation4 + $0x170] sm:$0xff] %vm827_vm15, %v1540_v48  ;;  %v1901_v34 = vld [vmem:[#allocation4 + $0x130] sm:$0xff] }
 0x429   : > { %1837 = vst.msk [vmem:[#allocation4 + $0xb0] sm:$0xff] %vm827_vm15, %v1829_v57  ;;  %v1853_v13 = vmul.f32 %v1845_v10, %v1829_v57  ;;  %v4994_v57 = vmov 6   ;;  %v2625_v10 = vmul.f32 %v4638_v31, %v2624_v19  ;;  %v1981_v19 = vld [vmem:[#allocation4 + $0x1b0] sm:$0xff] }
 0x42b   : > { %v1869_v61 = vadd.f32 %v1861_v1, %v1853_v13  ;;  %v4660_v48 = vpop.permute.xlu2 %2218 }
 0x42d   : > { %1877 = vst.msk [vmem:[#allocation4 + $0xf0] sm:$0xff] %vm827_vm15, %v1869_v61  ;;  %v1893_v35 = vmul.f32 %v1885_v56, %v1869_v61  ;;  %v1696_v8 = vpop.permute.xlu1 %1695  ;;  %v2626_v61 = vadd.f32 %v4638_v31, %v2625_v10 }
 0x42e   : > { %3261 = vset.pattern.permute.xlu2 %v4968_v36  ;;  %v1925_v36 = vld [vmem:[#allocation3 + $0x170] sm:$0xff]  ;;  %v1708_v43 = vmul.f32 %v1696_v8, %v4249_v42  ;;  %v2631_v8 = vand.u32 2147483647, %v4625_v40 }
 0x42f   : > { %2543 = vperm.xlu2 %3261, %v4594_v51   ;;  %v1909_v33 = vadd.f32 %v1901_v34, %v1893_v35  ;;  %v1941_v13 = vld [vmem:[#allocation4 + $0x170] sm:$0xff]  ;;  %v2630_v10 = vsel %vm2629_vm6, %v4638_v31, %v2626_v61 }
 0x430   : > { %1717 = vst.msk [vmem:[#allocation4 + $0x1f0] sm:$0xff] %vm827_vm15, %v1708_v43  ;;  %v2005_v34 = vld [vmem:[#allocation3 + $0x1f0] sm:$0xff]  ;;  %vm2632_vm7 = vcmp.eq.f32.partialorder %v2631_v8, 8.507059e+37 }
 0x431   : > { %1917 = vst.msk [vmem:[#allocation4 + $0x130] sm:$0xff] %vm827_vm15, %v1909_v33  ;;  %v1933_v23 = vmul.f32 %v1925_v36, %v1909_v33  ;;  %v2633_v36 = vand.u32 2147483648, %v4625_v40 }
 0x433   : > { %v1949_v1 = vadd.f32 %v1941_v13, %v1933_v23  ;;  %v4995_v23 = vmov 2   ;;  %v2634_v13 = vor.u32 1.1754944e-38, %v2633_v36 }
 0x434   : > { %3256 = vset.pattern.permute.xlu1 %v4995_v23 }
 0x435   : > { %1957 = vst.msk [vmem:[#allocation4 + $0x170] sm:$0xff] %vm827_vm15, %v1949_v1  ;;  %v1973_v56 = vmul.f32 %v1965_v28, %v1949_v1  ;;  %v4669_v33 = vpop.permute.xlu1 %2356  ;;  %2198 = vperm.xlu1 %3256, %v4594_v51   ;;  %v4676_v28 = vpop.permute.xlu2 %2287 }
 0x437   : > { %3262 = vset.pattern.permute.xlu2 %v4994_v57  ;;  %v1989_v35 = vadd.f32 %v1981_v19, %v1973_v56  ;;  %v2021_v1 = vld [vmem:[#allocation4 + $0x1f0] sm:$0xff]  ;;  %v2635_v56 = vsel %vm2632_vm7, %v2634_v13, %v2630_v10 }
 0x438   : > { %2494 = vperm.xlu2 %3262, %v4341_v20   ;;  %v2637_v19 = vmul.f32 %v2635_v56, %v3825_v37 }
 0x439   : > { %1997 = vst.msk [vmem:[#allocation4 + $0x1b0] sm:$0xff] %vm827_vm15, %v1989_v35  ;;  %v2013_v43 = vmul.f32 %v2005_v34, %v1989_v35  ;;  %v4996_v34 = vmov 7  }
 0x43b   : > { %v2029_v40 = vadd.f32 %v2021_v1, %v2013_v43 }
 0x43d   : > { %2037 = vst.msk [vmem:[#allocation4 + $0x1f0] sm:$0xff] %vm827_vm15, %v2029_v40  ;;  %v4680_v23 = vpop.permute.xlu1 %2425  ;;  %3260 = vset.pattern.permute.xlu1 %v4994_v57  ;;  %v1196_v31 = vpop.permute.xlu2 %1195  ;;  %v1726_v57 = vld [vmem:[#allocation3 + $0x38] sm:$0xff] }
 0x43e   : > { %2474 = vperm.xlu1 %3260, %v4594_v51   ;;  %v1205_v61 = vmul.f32 %v1196_v31, %v4263_v14  ;;  %v1734_v10 = vmul.f32 0.0, %v1726_v57  ;;  %v1766_v40 = vld [vmem:[#allocation3 + $0x78] sm:$0xff] }
 0x440   : > { %2498 = vperm.xlu2 %3262, %v4365_v63   ;;  %1214 = vst.msk [vmem:[#allocation4 + $0x78] sm:$0xff] %vm827_vm15, %v1205_v61 }
 0x445   : > { %v1113_v36 = vpop.permute.xlu1 %1112  ;;  %v1532_v35 = vpop.permute.xlu2 %1531 }
 0x446   : > { %v1122_v8 = vmul.f32 %v1113_v36, %v4258_v49  ;;  %3264 = vset.pattern.permute.xlu1 %v4996_v34  ;;  %v1541_v37 = vmul.f32 %v1532_v35, %v4290_v26  ;;  %v1846_v35 = vld [vmem:[#allocation3 + $0xf8] sm:$0xff] }
 0x447   : > { %2563 = vperm.xlu1 %3264, %v4341_v20   ;;  %v1782_v20 = vld [vmem:[#allocation4 + $0x78] sm:$0xff] }
 0x448   : > { %2639 = vrot.lane.b32.xlu2 %v2637_v19, %s3618_s0  ;;  %1130 = vst.msk [vmem:[#allocation4 + $0x38] sm:$0xff] %vm827_vm15, %v1122_v8  ;;  %v1806_v19 = vld [vmem:[#allocation3 + $0xb8] sm:$0xff]  ;;  %s635_s0 = sand.u32 1, %s3596_s30  }
 0x449   : > { %1550 = vst.msk [vmem:[#allocation4 + $0x178] sm:$0xff] %vm827_vm15, %v1541_v37  ;;  %s2810_s1 = scalar_lea.sflag [#allocation7], %s635_s0 }
 0x44d   : > { %v1280_v51 = vpop.permute.xlu1 %1279  ;;  %v1616_v13 = vpop.permute.xlu2 %1615 }
 0x44e   : > { %v1289_v14 = vmul.f32 %v1280_v51, %v4270_v54  ;;  %v1625_v49 = vmul.f32 %v1616_v13, %v4308_v46 }
 0x44f   : > { %v1742_v43 = vld [vmem:[#allocation4 + $0x38] sm:$0xff]  ;;  %2567 = vperm.xlu1 %3264, %v4365_v63  }
 0x450   : > { %v1750_v1 = vadd.f32 %v1742_v43, %v1734_v10  ;;  %1298 = vst.msk [vmem:[#allocation4 + $0xb8] sm:$0xff] %vm827_vm15, %v1289_v14  ;;  %v1886_v14 = vld [vmem:[#allocation3 + $0x138] sm:$0xff] }
 0x451   : > { %1634 = vst.msk [vmem:[#allocation4 + $0x1b8] sm:$0xff] %vm827_vm15, %v1625_v49 }
 0x452   : > { %1758 = vst.msk [vmem:[#allocation4 + $0x38] sm:$0xff] %vm827_vm15, %v1750_v1  ;;  %v1774_v26 = vmul.f32 %v1766_v40, %v1750_v1  ;;  %v1926_v40 = vld [vmem:[#allocation3 + $0x178] sm:$0xff] }
 0x454   : > { %v1790_v56 = vadd.f32 %v1782_v20, %v1774_v26  ;;  %v1942_v26 = vld [vmem:[#allocation4 + $0x178] sm:$0xff] }
 0x455   : > { %v1364_v31 = vpop.permute.xlu1 %1363  ;;  %v1700_v8 = vpop.permute.xlu2 %1699 }
 0x456   : > { %1798 = vst.msk [vmem:[#allocation4 + $0x78] sm:$0xff] %vm827_vm15, %v1790_v56  ;;  %v1814_v54 = vmul.f32 %v1806_v19, %v1790_v56  ;;  %v1373_v61 = vmul.f32 %v1364_v31, %v4255_v41  ;;  %v1709_v63 = vmul.f32 %v1700_v8, %v4249_v42  ;;  %v1966_v56 = vld [vmem:[#allocation3 + $0x1b8] sm:$0xff] }
 0x457   : > { %v1822_v36 = vld [vmem:[#allocation4 + $0xb8] sm:$0xff] }
 0x458   : > { %v1830_v46 = vadd.f32 %v1822_v36, %v1814_v54  ;;  %1382 = vst.msk [vmem:[#allocation4 + $0xf8] sm:$0xff] %vm827_vm15, %v1373_v61  ;;  %v1982_v54 = vld [vmem:[#allocation4 + $0x1b8] sm:$0xff] }
 0x459   : > { %1718 = vst.msk [vmem:[#allocation4 + $0x1f8] sm:$0xff] %vm827_vm15, %v1709_v63  ;;  %v2006_v8 = vld [vmem:[#allocation3 + $0x1f8] sm:$0xff] }
 0x45a   : > { %1838 = vst.msk [vmem:[#allocation4 + $0xb8] sm:$0xff] %vm827_vm15, %v1830_v46  ;;  %v1854_v37 = vmul.f32 %v1846_v35, %v1830_v46 }
 0x45d   : > { %v1448_v34 = vpop.permute.xlu1 %1447  ;;  %v4705_v10 = vpop.permute.xlu2 %2084 }
 0x45e   : > { %v1457_v57 = vmul.f32 %v1448_v34, %v4282_v6  ;;  %v2041_v34 = vld [vmem:[#allocation4 + $0x10] sm:$0xff] }
 0x45f   : > { %v1862_v51 = vld [vmem:[#allocation4 + $0xf8] sm:$0xff] }
 0x460   : > { %v1870_v41 = vadd.f32 %v1862_v51, %v1854_v37  ;;  %1466 = vst.msk [vmem:[#allocation4 + $0x138] sm:$0xff] %vm827_vm15, %v1457_v57  ;;  %v2022_v63 = vld [vmem:[#allocation4 + $0x1f8] sm:$0xff]  ;;  %v2039_v37 = vld [vmem:[#allocation4] sm:$0xff] }
 0x462   : > { %1878 = vst.msk [vmem:[#allocation4 + $0xf8] sm:$0xff] %vm827_vm15, %v1870_v41  ;;  %v1894_v42 = vmul.f32 %v1886_v14, %v1870_v41  ;;  %v2040_v41 = vld [vmem:[#allocation4 + $0x8] sm:$0xff] }
 0x465   : > { %v4709_v43 = vpop.permute.xlu1 %2153  ;;  %v4711_v1 = vpop.permute.xlu2 %2222 }
 0x467   : > { %v1902_v13 = vld [vmem:[#allocation4 + $0x138] sm:$0xff] }
 0x468   : > { %v1910_v49 = vadd.f32 %v1902_v13, %v1894_v42  ;;  %v2089_v42 = vmul.f32 %v4274_v58, %v2041_v34 }
 0x46a   : > { %1918 = vst.msk [vmem:[#allocation4 + $0x138] sm:$0xff] %vm827_vm15, %v1910_v49  ;;  %v1934_v6 = vmul.f32 %v1926_v40, %v1910_v49  ;;  %v2042_v40 = vld [vmem:[#allocation4 + $0x18] sm:$0xff] }
 0x46c   : > { %v1950_v20 = vadd.f32 %v1942_v26, %v1934_v6  ;;  %v2090_v6 = vmul.f32 %v4454_v39, %v2042_v40 }
 0x46d   : > { %v4714_v19 = vpop.permute.xlu1 %2360  ;;  %v4717_v61 = vpop.permute.xlu2 %2194 }
 0x46e   : > { %1958 = vst.msk [vmem:[#allocation4 + $0x178] sm:$0xff] %vm827_vm15, %v1950_v20  ;;  %v1974_v31 = vmul.f32 %v1966_v56, %v1950_v20  ;;  %v2043_v20 = vld [vmem:[#allocation4 + $0x20] sm:$0xff]  ;;  %v2044_v56 = vld [vmem:[#allocation4 + $0x28] sm:$0xff]  ;;  %v2100_v58 = vsel %vm827_vm15, %v2090_v6, 0.0 }
 0x46f   : > { %v2092_v34 = vmul.f32 %v4588_v60, %v2044_v56 }
 0x470   : > { %v1990_v36 = vadd.f32 %v1982_v54, %v1974_v31  ;;  %v2098_v54 = vsel %vm827_vm15, %v2089_v42, 0.0 }
 0x471   : > { %v2104_v60 = vsel %vm827_vm15, %v2092_v34, 0.0  ;;  %v2323_v34 = vld [vmem:[#allocation4 + $0x100] sm:$0xff] }
 0x472   : > { %v2014_v46 = vmul.f32 %v2006_v8, %v1990_v36  ;;  %1998 = vst.msk [vmem:[#allocation4 + $0x1b8] sm:$0xff] %vm827_vm15, %v1990_v36  ;;  %v2256_v36 = vld [vmem:[#allocation4 + $0xd0] sm:$0xff]  ;;  %v2091_v8 = vmul.f32 %v4533_v44, %v2043_v20 }
 0x473   : > { %v2296_v39 = vmul.f32 %v4315_v0, %v2256_v36 }
 0x474   : > { %v2030_v35 = vadd.f32 %v2022_v63, %v2014_v46  ;;  %v2254_v63 = vld [vmem:[#allocation4 + $0xc0] sm:$0xff]  ;;  %v2102_v42 = vsel %vm827_vm15, %v2091_v8, 0.0 }
 0x475   : > { %v2050_v57 = vpop.permute.xlu1 %2049  ;;  %v2055_v14 = vpop.permute.xlu2 %2054 }
 0x476   : > { %2038 = vst.msk [vmem:[#allocation4 + $0x1f8] sm:$0xff] %vm827_vm15, %v2030_v35  ;;  %v2087_v51 = vmul.f32 %v2050_v57, %v2039_v37  ;;  %v2088_v49 = vmul.f32 %v2055_v14, %v2040_v41  ;;  %v2257_v57 = vld [vmem:[#allocation4 + $0xd8] sm:$0xff]  ;;  %v2255_v14 = vld [vmem:[#allocation4 + $0xc8] sm:$0xff] }
 0x477   : > { %v2297_v6 = vmul.f32 %v4443_v29, %v2257_v57 }
 0x478   : > { %v2095_v13 = vsel %vm827_vm15, %v2087_v51, 0.0  ;;  %v2096_v26 = vsel %vm827_vm15, %v2088_v49, 0.0  ;;  %v2045_v51 = vld [vmem:[#allocation4 + $0x30] sm:$0xff] }
 0x479   : > { %v2097_v31 = vadd.f32 %v2096_v26, %v2095_v13  ;;  %v2093_v49 = vmul.f32 %v4649_v25, %v2045_v51  ;;  %v2046_v26 = vld [vmem:[#allocation4 + $0x38] sm:$0xff]  ;;  %v2305_v25 = vsel %vm827_vm15, %v2296_v39, 0.0 }
 0x47a   : > { %v2094_v0 = vmul.f32 %v4705_v10, %v2046_v26  ;;  %v2307_v10 = vsel %vm827_vm15, %v2297_v6, 0.0  ;;  %v2326_v39 = vld [vmem:[#allocation4 + $0x118] sm:$0xff] }
 0x47b   : > { %v2099_v46 = vadd.f32 %v2098_v54, %v2097_v31  ;;  %v4737_v31 = vpop.permute.xlu0 %2149  ;;  %v2258_v54 = vld [vmem:[#allocation4 + $0xe0] sm:$0xff] }
 0x47d   : > { %v2264_v35 = vpop.permute.xlu1 %2263  ;;  %v2101_v41 = vadd.f32 %v2100_v58, %v2099_v46  ;;  %v2268_v13 = vpop.permute.xlu2 %2267  ;;  %v2325_v46 = vld [vmem:[#allocation4 + $0x110] sm:$0xff]  ;;  %v2259_v58 = vld [vmem:[#allocation4 + $0xe8] sm:$0xff] }
 0x47e   : > { %v2294_v37 = vmul.f32 %v2264_v35, %v2254_v63  ;;  %v2295_v40 = vmul.f32 %v2268_v13, %v2255_v14  ;;  %v2298_v63 = vmul.f32 %v4551_v55, %v2258_v54  ;;  %v2106_v35 = vsel %vm827_vm15, %v2093_v49, 0.0  ;;  %v2324_v49 = vld [vmem:[#allocation4 + $0x108] sm:$0xff]  ;;  %v2327_v54 = vld [vmem:[#allocation4 + $0x120] sm:$0xff] }
 0x47f   : > { %v2103_v20 = vadd.f32 %v2102_v42, %v2101_v41  ;;  %v2299_v51 = vmul.f32 %v4611_v21, %v2259_v58  ;;  %v2108_v41 = vsel %vm827_vm15, %v2094_v0, 0.0  ;;  %v2365_v13 = vmul.f32 %v4317_v17, %v2325_v46  ;;  %v2260_v42 = vld [vmem:[#allocation4 + $0xf0] sm:$0xff] }
 0x480   : > { %v2302_v44 = vsel %vm827_vm15, %v2294_v37, 0.0  ;;  %v2303_v56 = vsel %vm827_vm15, %v2295_v40, 0.0  ;;  %v2309_v26 = vsel %vm827_vm15, %v2298_v63, 0.0  ;;  %v2366_v0 = vmul.f32 %v4458_v50, %v2326_v39  ;;  %v2329_v39 = vld [vmem:[#allocation4 + $0x130] sm:$0xff] }
 0x481   : > { %v2105_v36 = vadd.f32 %v2104_v60, %v2103_v20  ;;  %v2304_v8 = vadd.f32 %v2303_v56, %v2302_v44  ;;  %v2300_v20 = vmul.f32 %v4676_v28, %v2260_v42  ;;  %v2311_v56 = vsel %vm827_vm15, %v2299_v51, 0.0 }
 0x482   : > { %v2374_v46 = vsel %vm827_vm15, %v2365_v13, 0.0  ;;  %v2367_v63 = vmul.f32 %v4545_v2, %v2327_v54  ;;  %v2395_v13 = vld [vmem:[#allocation4 + $0x158] sm:$0xff] }
 0x483   : > { %v2107_v29 = vadd.f32 %v2106_v35, %v2105_v36  ;;  %v2306_v37 = vadd.f32 %v2305_v25, %v2304_v8  ;;  %v2328_v8 = vld [vmem:[#allocation4 + $0x128] sm:$0xff]  ;;  %v2394_v35 = vld [vmem:[#allocation4 + $0x150] sm:$0xff]  ;;  %v2313_v28 = vsel %vm827_vm15, %v2300_v20, 0.0  ;;  %v4757_v58 = vpop.permute.xlu0 %2291  ;;  %v2330_v2 = vld [vmem:[#allocation4 + $0x138] sm:$0xff] }
 0x485   : > { %v2333_v57 = vpop.permute.xlu1 %2332  ;;  %v4746_v44 = vadd.f32 %v2108_v41, %v2107_v29  ;;  %v2308_v55 = vadd.f32 %v2307_v10, %v2306_v37  ;;  %v2337_v40 = vpop.permute.xlu2 %2336  ;;  %v2392_v37 = vld [vmem:[#allocation4 + $0x140] sm:$0xff]  ;;  %v2368_v10 = vmul.f32 %v4508_v9, %v2328_v8  ;;  %v2393_v41 = vld [vmem:[#allocation4 + $0x148] sm:$0xff]  ;;  %v2370_v9 = vmul.f32 %v4714_v19, %v2330_v2 }
 0x486   : > { %v2363_v14 = vmul.f32 %v2333_v57, %v2323_v34  ;;  %v2364_v60 = vmul.f32 %v2337_v40, %v2324_v49  ;;  %v2376_v57 = vsel %vm827_vm15, %v2366_v0, 0.0  ;;  %v2378_v49 = vsel %vm827_vm15, %v2367_v63, 0.0  ;;  %v2396_v0 = vld [vmem:[#allocation4 + $0x160] sm:$0xff] }
 0x487   : > { %v2310_v21 = vadd.f32 %v2309_v26, %v2308_v55  ;;  %v2369_v40 = vmul.f32 %v4669_v33, %v2329_v39  ;;  %v2436_v33 = vmul.f32 %v4554_v32, %v2396_v0  ;;  %v2384_v19 = vsel %vm827_vm15, %v2370_v9, 0.0  ;;  %v2118_v9 = vld [vmem:[#allocation4 + $0x50] sm:$0xff] }
 0x488   : > { %v2371_v6 = vsel %vm827_vm15, %v2363_v14, 0.0  ;;  %v2372_v17 = vsel %vm827_vm15, %v2364_v60, 0.0  ;;  %v2434_v14 = vmul.f32 %v4345_v27, %v2394_v35  ;;  %v2435_v60 = vmul.f32 %v4471_v15, %v2395_v13 }
 0x489   : > { %v2312_v36 = vadd.f32 %v2311_v56, %v2310_v21  ;;  %v2373_v25 = vadd.f32 %v2372_v17, %v2371_v6  ;;  %v2380_v21 = vsel %vm827_vm15, %v2368_v10, 0.0  ;;  %v2397_v17 = vld [vmem:[#allocation4 + $0x168] sm:$0xff]  ;;  %v2382_v8 = vsel %vm827_vm15, %v2369_v40, 0.0 }
 0x48a   : > { %v2445_v15 = vsel %vm827_vm15, %v2435_v60, 0.0  ;;  %v2437_v63 = vmul.f32 %v4520_v12, %v2397_v17  ;;  %v2447_v39 = vsel %vm827_vm15, %v2436_v33, 0.0  ;;  %v2187_v33 = vld [vmem:[#allocation4 + $0x90] sm:$0xff] }
 0x48b   : > { %v4759_v29 = vadd.f32 %v2313_v28, %v2312_v36  ;;  %v2375_v50 = vadd.f32 %v2374_v46, %v2373_v25  ;;  %v2443_v36 = vsel %vm827_vm15, %v2434_v14, 0.0  ;;  %v2532_v25 = vld [vmem:[#allocation4 + $0x1d0] sm:$0xff]  ;;  %v2530_v28 = vld [vmem:[#allocation4 + $0x1c0] sm:$0xff] }
 0x48c   : > { %v2572_v13 = vmul.f32 %v4392_v22, %v2532_v25  ;;  %v2449_v40 = vsel %vm827_vm15, %v2437_v63, 0.0  ;;  %v2119_v25 = vld [vmem:[#allocation4 + $0x58] sm:$0xff]  ;;  %v2227_v63 = vmul.f32 %v4272_v52, %v2187_v33  ;;  %v2189_v33 = vld [vmem:[#allocation4 + $0xa0] sm:$0xff] }
 0x48d   : > { %v2402_v34 = vpop.permute.xlu1 %2401  ;;  %v2377_v42 = vadd.f32 %v2376_v57, %v2375_v50  ;;  %v2406_v55 = vpop.permute.xlu2 %2405  ;;  %v2398_v57 = vld [vmem:[#allocation4 + $0x170] sm:$0xff] }
 0x48e   : > { %v2432_v51 = vmul.f32 %v2402_v34, %v2392_v37  ;;  %v2433_v20 = vmul.f32 %v2406_v55, %v2393_v41  ;;  %v2533_v37 = vld [vmem:[#allocation4 + $0x1d8] sm:$0xff]  ;;  %v2126_v34 = vpop.permute.xlu0 %2125  ;;  %v2531_v41 = vld [vmem:[#allocation4 + $0x1c8] sm:$0xff]  ;;  %v2438_v2 = vmul.f32 %v4680_v23, %v2398_v57  ;;  %v2581_v60 = vsel %vm827_vm15, %v2572_v13, 0.0  ;;  %v2534_v57 = vld [vmem:[#allocation4 + $0x1e0] sm:$0xff] }
 0x48f   : > { %v2379_v6 = vadd.f32 %v2378_v49, %v2377_v42  ;;  %v2573_v49 = vmul.f32 %v4488_v7, %v2533_v37 }
 0x490   : > { %v2440_v26 = vsel %vm827_vm15, %v2432_v51, 0.0  ;;  %v2441_v27 = vsel %vm827_vm15, %v2433_v20, 0.0  ;;  %v2451_v22 = vsel %vm827_vm15, %v2438_v2, 0.0 }
 0x491   : > { %v2381_v56 = vadd.f32 %v2380_v21, %v2379_v6  ;;  %v2442_v54 = vadd.f32 %v2441_v27, %v2440_v26  ;;  %v2116_v21 = vld [vmem:[#allocation4 + $0x40] sm:$0xff]  ;;  %v2583_v0 = vsel %vm827_vm15, %v2573_v49, 0.0  ;;  %v2188_v49 = vld [vmem:[#allocation4 + $0x98] sm:$0xff] }
 0x493   : > { %v2383_v46 = vadd.f32 %v2382_v8, %v2381_v56  ;;  %v2444_v35 = vadd.f32 %v2443_v36, %v2442_v54  ;;  %v2156_v56 = vmul.f32 %v2126_v34, %v2116_v21  ;;  %v2117_v54 = vld [vmem:[#allocation4 + $0x48] sm:$0xff]  ;;  %v2158_v36 = vmul.f32 %v4242_v30, %v2118_v9  ;;  %v2123_v9 = vld [vmem:[#allocation4 + $0x78] sm:$0xff] }
 0x495   : > { %v2540_v50 = vpop.permute.xlu1 %2539  ;;  %v4777_v10 = vadd.f32 %v2384_v19, %v2383_v46  ;;  %v2446_v51 = vadd.f32 %v2445_v15, %v2444_v35  ;;  %v2544_v14 = vpop.permute.xlu2 %2543  ;;  %v2159_v35 = vmul.f32 %v4424_v59, %v2119_v25  ;;  %v2164_v15 = vsel %vm827_vm15, %v2156_v56, 0.0  ;;  %v2122_v59 = vld [vmem:[#allocation4 + $0x70] sm:$0xff] }
 0x496   : > { %v2570_v32 = vmul.f32 %v2540_v50, %v2530_v28  ;;  %v2571_v42 = vmul.f32 %v2544_v14, %v2531_v41  ;;  %v4792_v46 = vpop.permute.xlu0 %2470  ;;  %v2120_v28 = vld [vmem:[#allocation4 + $0x60] sm:$0xff]  ;;  %v2121_v50 = vld [vmem:[#allocation4 + $0x68] sm:$0xff]  ;;  %v2167_v34 = vsel %vm827_vm15, %v2158_v36, 0.0  ;;  %v2261_v14 = vld [vmem:[#allocation4 + $0xf8] sm:$0xff]  ;;  %v2163_v56 = vmul.f32 %v4709_v43, %v2123_v9 }
 0x497   : > { %v2448_v55 = vadd.f32 %v2447_v39, %v2446_v51  ;;  %v2160_v30 = vmul.f32 %v4531_v24, %v2120_v28  ;;  %v2185_v51 = vld [vmem:[#allocation4 + $0x80] sm:$0xff]  ;;  %v2535_v41 = vld [vmem:[#allocation4 + $0x1e8] sm:$0xff]  ;;  %v2169_v39 = vsel %vm827_vm15, %v2159_v35, 0.0  ;;  %v2161_v2 = vmul.f32 %v4582_v5, %v2121_v50 }
 0x498   : > { %v2578_v12 = vsel %vm827_vm15, %v2570_v32, 0.0  ;;  %v2579_v26 = vsel %vm827_vm15, %v2571_v42, 0.0  ;;  %v2574_v32 = vmul.f32 %v4565_v4, %v2534_v57  ;;  %v2225_v52 = vmul.f32 %v4717_v61, %v2185_v51 }
 0x499   : > { %v2450_v20 = vadd.f32 %v2449_v40, %v2448_v55  ;;  %v2580_v6 = vadd.f32 %v2579_v26, %v2578_v12  ;;  %v2236_v42 = vsel %vm827_vm15, %v2227_v63, 0.0  ;;  %v2110_v55 = vrot.slane %v4746_v44, 4  ;;  %v2399_v12 = vld [vmem:[#allocation4 + $0x178] sm:$0xff] }
 0x49a   : > { %v2171_v40 = vsel %vm827_vm15, %v2160_v30, 0.0  ;;  %v2575_v4 = vmul.f32 %v4603_v38, %v2535_v41  ;;  %v2301_v26 = vmul.f32 %v4757_v58, %v2261_v14  ;;  %v2228_v5 = vmul.f32 %v4466_v47, %v2188_v49  ;;  %v3051_v47 = vld [vmem:[%s4950_s12 + $0x18] sm:$0xff]  ;;  %v2464_v63 = vld [vmem:[#allocation4 + $0x198] sm:$0xff] }
 0x49b   : > { %v4788_v27 = vadd.f32 %v2451_v22, %v2450_v20  ;;  %v2582_v23 = vadd.f32 %v2581_v60, %v2580_v6  ;;  %v2162_v20 = vmul.f32 %v4737_v31, %v2122_v59  ;;  %v2186_v60 = vld [vmem:[#allocation4 + $0x88] sm:$0xff]  ;;  %v2585_v61 = vsel %vm827_vm15, %v2574_v32, 0.0  ;;  %2683 = vmatpush.bf16.msrb.mxu3 %v3051_v47  ;;  %v2461_v32 = vld [vmem:[#allocation4 + $0x180] sm:$0xff] }
 0x49c   : > { %v2233_v38 = vsel %vm827_vm15, %v2225_v52, 0.0  ;;  %v2111_v58 = vadd.f32 %v2110_v55, %v4746_v44  ;;  %v2587_v25 = vsel %vm827_vm15, %v2575_v4, 0.0  ;;  %v2315_v35 = vsel %vm827_vm15, %v2301_v26, 0.0  ;;  %v2191_v52 = vld [vmem:[#allocation4 + $0xb0] sm:$0xff]  ;;  %v2462_v4 = vld [vmem:[#allocation4 + $0x188] sm:$0xff] }
 0x49d   : > { %v2584_v17 = vadd.f32 %v2583_v0, %v2582_v23  ;;  %v2130_v7 = vpop.permute.xlu1 %2129  ;;  %v2173_v0 = vsel %vm827_vm15, %v2161_v2, 0.0  ;;  %v2175_v43 = vsel %vm827_vm15, %v2162_v20, 0.0  ;;  %v2229_v44 = vmul.f32 %v4543_v62, %v2189_v33  ;;  %v2495_v59 = vpop.permute.xlu2 %2494  ;;  %v2465_v20 = vld [vmem:[#allocation4 + $0x1a0] sm:$0xff] }
 0x49e   : > { %v2157_v8 = vmul.f32 %v2130_v7, %v2117_v54  ;;  %v2430_v22 = vpop.permute.xlu0 %2429  ;;  %v2316_v28 = vadd.f32 %v2315_v35, %v4759_v29  ;;  %v2177_v30 = vsel %vm827_vm15, %v2163_v56, 0.0  ;;  %v2112_v41 = vrot.slane %v2111_v58, 2 }
 0x49f   : > { %v2439_v7 = vmul.f32 %v2430_v22, %v2399_v12  ;;  %v2586_v36 = vadd.f32 %v2585_v61, %v2584_v17  ;;  %v3050_v17 = vld [vmem:[%s4950_s12 + $0x10] sm:$0xff]  ;;  %v2501_v2 = vmul.f32 %v4792_v46, %v2461_v32  ;;  %v2240_v12 = vsel %vm827_vm15, %v2229_v44, 0.0 }
 0x4a0   : > { %v2165_v19 = vsel %vm827_vm15, %v2157_v8, 0.0  ;;  %v2190_v8 = vld [vmem:[#allocation4 + $0xa8] sm:$0xff]  ;;  %v2317_v49 = vrot.slane %v2316_v28, 4  ;;  %2684 = vmatpush.bf16.msrb.mxu3 %v3050_v17  ;;  %v2505_v61 = vmul.f32 %v4558_v3, %v2465_v20 }
 0x4a1   : > { %v2166_v37 = vadd.f32 %v2165_v19, %v2164_v15  ;;  %v2463_v19 = vld [vmem:[#allocation4 + $0x190] sm:$0xff]  ;;  %v2453_v57 = vsel %vm827_vm15, %v2439_v7, 0.0  ;;  %v2230_v62 = vmul.f32 %v4600_v18, %v2190_v8  ;;  %v3048_v8 = vld [vmem:[%s4950_s12] sm:$0xff] }
 0x4a2   : > { %v2454_v29 = vadd.f32 %v2453_v57, %v4788_v27 }
 0x4a3   : > { %v2168_v13 = vadd.f32 %v2167_v34, %v2166_v37  ;;  %v4825_v37 = vadd.f32 %v2587_v25, %v2586_v36  ;;  %v2238_v34 = vsel %vm827_vm15, %v2228_v5, 0.0  ;;  %v2242_v46 = vsel %vm827_vm15, %v2230_v62, 0.0  ;;  %v2468_v62 = vld [vmem:[#allocation4 + $0x1b8] sm:$0xff] }
 0x4a5   : > { %v2170_v24 = vadd.f32 %v2169_v39, %v2168_v13  ;;  %v2503_v13 = vmul.f32 %v4371_v45, %v2463_v19  ;;  %v2504_v39 = vmul.f32 %v4477_v53, %v2464_v63  ;;  %v2386_v45 = vrot.slane %v4777_v10, 4  ;;  %v2499_v44 = vpop.permute.xlu2 %2498 }
 0x4a7   : > { %v2199_v6 = vpop.permute.xlu1 %2198  ;;  %v2172_v21 = vadd.f32 %v2171_v40, %v2170_v24  ;;  %v2192_v24 = vld [vmem:[#allocation4 + $0xb8] sm:$0xff]  ;;  %v2512_v7 = vsel %vm827_vm15, %v2503_v13, 0.0  ;;  %v2514_v25 = vsel %vm827_vm15, %v2504_v39, 0.0  ;;  %v2536_v13 = vld [vmem:[#allocation4 + $0x1f0] sm:$0xff] }
 0x4a8   : > { %v2226_v23 = vmul.f32 %v2199_v6, %v2186_v60  ;;  %v2232_v27 = vmul.f32 %v4711_v1, %v2192_v24  ;;  %v2113_v6 = vadd.f32 %v2112_v41, %v2111_v58  ;;  %v2455_v60 = vrot.slane %v2454_v29, 4 }
 0x4a9   : > { %v2174_v31 = vadd.f32 %v2173_v0, %v2172_v21  ;;  %v2466_v21 = vld [vmem:[#allocation4 + $0x1a8] sm:$0xff] }
 0x4aa   : > { %v2234_v54 = vsel %vm827_vm15, %v2226_v23, 0.0  ;;  %v2318_v23 = vadd.f32 %v2317_v49, %v2316_v28  ;;  %v2246_v58 = vsel %vm827_vm15, %v2232_v27, 0.0  ;;  %v2456_v47 = vadd.f32 %v2455_v60, %v2454_v29 }
 0x4ab   : > { %v2235_v15 = vadd.f32 %v2234_v54, %v2233_v38  ;;  %v2176_v50 = vadd.f32 %v2175_v43, %v2174_v31  ;;  %v3049_v38 = vld [vmem:[%s4950_s12 + $0x8] sm:$0xff]  ;;  %v2387_v31 = vadd.f32 %v2386_v45, %v4777_v10  ;;  %v2114_v54 = vrot.slane %v2113_v6, 1  ;;  %v2467_v10 = vld [vmem:[#allocation4 + $0x1b0] sm:$0xff] }
 0x4ac   : > { %2685 = vmatpush.bf16.msrb.mxu3 %v3049_v38  ;;  %v2506_v35 = vmul.f32 %v4591_v11, %v2466_v21  ;;  %v2319_v19 = vrot.slane %v2318_v23, 2  ;;  %v2507_v17 = vmul.f32 %v2495_v59, %v2467_v10 }
 0x4ad   : > { %v2237_v51 = vadd.f32 %v2236_v42, %v2235_v15  ;;  %v2178_v14 = vadd.f32 %v2177_v30, %v2176_v50  ;;  %v2231_v42 = vmul.f32 %v4660_v48, %v2191_v52  ;;  %v2509_v48 = vsel %vm827_vm15, %v2501_v2, 0.0 }
 0x4ae   : > { %v2516_v15 = vsel %vm827_vm15, %v2505_v61, 0.0  ;;  %v2388_v50 = vrot.slane %v2387_v31, 2  ;;  %v2115_v57 = vadd.f32 %v2114_v54, %v2113_v6  ;;  %v2518_v11 = vsel %vm827_vm15, %v2506_v35, 0.0 }
 0x4af   : > { %v2239_v55 = vadd.f32 %v2238_v34, %v2237_v51  ;;  %v2179_v18 = vrot.slane %v2178_v14, 4  ;;  %v2244_v1 = vsel %vm827_vm15, %v2231_v42, 0.0  ;;  %v2457_v51 = vrot.slane %v2456_v47, 2 }
 0x4b0   : > { %v2475_v40 = vpop.permute.xlu1 %2474  ;;  %2686 = vmatpush.bf16.msrb.mxu3 %v3048_v8  ;;  %v2320_v39 = vadd.f32 %v2319_v19, %v2318_v23  ;;  %v2520_v59 = vsel %vm827_vm15, %v2507_v17, 0.0  ;;  %v3274_v19 = vld [vmem:[%s4949_s11] ss:$0 sm:$0xff] }
 0x4b1   : > { %v2241_v26 = vadd.f32 %v2240_v12, %v2239_v55  ;;  %v2502_v53 = vmul.f32 %v2475_v40, %v2462_v4  ;;  %v2180_v5 = vadd.f32 %v2179_v18, %v2178_v14  ;;  %v2508_v14 = vmul.f32 %v2499_v44, %v2468_v62 }
 0x4b2   : > { %v2389_v12 = vadd.f32 %v2388_v50, %v2387_v31  ;;  %v2458_v24 = vadd.f32 %v2457_v51, %v2456_v47  ;;  %v2321_v4 = vrot.slane %v2320_v39, 1 }
 0x4b3   : > { %v2243_v22 = vadd.f32 %v2242_v46, %v2241_v26  ;;  %v2510_v9 = vsel %vm827_vm15, %v2502_v53, 0.0  ;;  %v2181_v0 = vrot.slane %v2180_v5, 2  ;;  %v2522_v40 = vsel %vm827_vm15, %v2508_v14, 0.0  ;;  %v2537_v46 = vld [vmem:[#allocation4 + $0x1f8] sm:$0xff] }
 0x4b4   : > { %v2511_v56 = vadd.f32 %v2510_v9, %v2509_v48  ;;  %v2390_v26 = vrot.slane %v2389_v12, 1  ;;  %v2459_v6 = vrot.slane %v2458_v24, 1 }
 0x4b5   : > { %v2245_v3 = vadd.f32 %v2244_v1, %v2243_v22  ;;  %v2182_v36 = vadd.f32 %v2181_v0, %v2180_v5  ;;  %v2322_v22 = vadd.f32 %v2321_v4, %v2320_v39  ;;  %v3052_v39 = vld [vmem:[%s4953_s15] sm:$0xff] }
 0x4b6   : > { %v2513_v33 = vadd.f32 %v2512_v7, %v2511_v56  ;;  %v2391_v1 = vadd.f32 %v2390_v26, %v2389_v12  ;;  %v2460_v56 = vadd.f32 %v2459_v6, %v2458_v24  ;;  %v3054_v6 = vld [vmem:[%s4955_s17] sm:$0xff] }
 0x4b7   : > { %v2247_v43 = vadd.f32 %v2246_v58, %v2245_v3  ;;  %v2183_v63 = vrot.slane %v2182_v36, 1 }
 0x4b8   : > { %v2515_v28 = vadd.f32 %v2514_v25, %v2513_v33 }
 0x4b9   : > { %v2248_v34 = vrot.slane %v2247_v43, 4  ;;  %v2564_v30 = vpop.permute.xlu1 %2563  ;;  %v2184_v32 = vadd.f32 %v2183_v63, %v2182_v36  ;;  %v2616_v63 = vmul.f32 %v3274_v19, %v3853_v16 }
 0x4ba   : > { %v2517_v41 = vadd.f32 %v2516_v15, %v2515_v28  ;;  %v2576_v55 = vmul.f32 %v2564_v30, %v2536_v13  ;;  %v2640_v28 = vpop.permute.xlu2 %2639  ;;  %v3443_v30 = vld [vmem:[%s3800_s2] sm:$0xff]  ;;  %v3053_v13 = vld [vmem:[%s4953_s15 + $0x8] sm:$0xff]  ;;  %s2925_s2 = sshll.u32 %s635_s0, 3 }
 0x4bb   : > { %v2249_v29 = vadd.f32 %v2248_v34, %v2247_v43  ;;  %v2600_v2 = vsel %vm2599_vm10, %v2115_v57, %v2184_v32  ;;  %2755 = vmatpush.bf16.msra.mxu0 %v3053_v13  ;;  %s637_s29 = scalar_lea.vmem [#allocation11], %s2925_s2  ;;  %s3554_s2 = scalar_lea.hbm %s4957_s19, 16 }
 0x4bc   : > { %v2519_v52 = vadd.f32 %v2518_v11, %v2517_v41  ;;  %v2589_v45 = vsel %vm827_vm15, %v2576_v55, 0.0  ;;  %v4997_v41 = vld [vmem:[#allocation21_spill] sm:$0xff]  ;;  %s2822_s23 = sshll.u32 %s637_s29, 4  ;;  %p3556_p4 = scmp.lt.s32.totalorder %s3554_s2, %s3550_s4  ;;  %s2823_s23 = int_to_ptr.vmem [resolvable:$true] %s2822_s23 }
 0x4bd   : > { %v2250_v42 = vrot.slane %v2249_v29, 2  ;;  %v2590_v61 = vadd.f32 %v2589_v45, %v4825_v37  ;;  %v3276_v45 = vld [vmem:[%s4952_s14] ss:$0 sm:$0xff] }
 0x4be   : > { %v2521_v49 = vadd.f32 %v2520_v59, %v2519_v52  ;;  %p3557_p7 = por %p3556_p4, %p3555_p3 }
 0x4bf   : > { %v2251_v18 = vadd.f32 %v2250_v42, %v2249_v29  ;;  %2756 = vmatpush.bf16.msra.mxu0 %v3052_v39 }
 0x4c0   : > { %v2523_v27 = vadd.f32 %v2522_v40, %v2521_v49  ;;  %v3275_v40 = vld [vmem:[%s4951_s13] ss:$0 sm:$0xff]  ;;  %p3558_p8 = pnand %p3557_p7, %p3553_p2 }
 0x4c1   : > { %v2252_v53 = vrot.slane %v2251_v18, 1  ;;  %v2568_v20 = vpop.permute.xlu1 %2567 }
 0x4c2   : > { %v2524_v60 = vrot.slane %v2523_v27, 4  ;;  %v2577_v5 = vmul.f32 %v2568_v20, %v2537_v46  ;;  %v3055_v46 = vld [vmem:[%s4955_s17 + $0x8] sm:$0xff] }
 0x4c3   : > { %v2253_v48 = vadd.f32 %v2252_v53, %v2251_v18  ;;  %2801 = vmatpush.bf16.msrb.mxu1 %v3055_v46 }
 0x4c4   : > { %v2525_v9 = vadd.f32 %v2524_v60, %v2523_v27  ;;  %v2591_v21 = vsel %vm827_vm15, %v2577_v5, 0.0  ;;  %v3277_v60 = vld [vmem:[%s4954_s16] ss:$0 sm:$0xff] }
 0x4c5   : > { %v2592_v23 = vadd.f32 %v2591_v21, %v2590_v61  ;;  %v2602_v0 = vsel %vm2601_vm11, %v2600_v2, %v2253_v48 }
 0x4c6   : > { %v2526_v38 = vrot.slane %v2525_v9, 2  ;;  %v2603_v7 = vsel %vm720_vm5, %v2602_v0, %v2322_v22 }
 0x4c7   : > { %v2593_v58 = vrot.slane %v2592_v23, 4  ;;  %v2605_v31 = vsel %vm2604_vm12, %v2603_v7, %v2391_v1  ;;  %2802 = vmatpush.bf16.msrb.mxu1 %v3054_v6 }
 0x4c8   : > { %v2527_v3 = vadd.f32 %v2526_v38, %v2525_v9  ;;  %v2607_v54 = vsel %vm2606_vm13, %v2605_v31, %v2460_v56  ;;  %v3278_v31 = vld [vmem:[%s4998_s28] ss:$0 sm:$0xff] }
 0x4c9   : > { %v2594_v47 = vadd.f32 %v2593_v58, %v2592_v23 }
 0x4ca   : > { %v2528_v36 = vrot.slane %v2527_v3, 1 }
 0x4cb   : > { %v2595_v37 = vrot.slane %v2594_v47, 2 }
 0x4cc   : > { %v2529_v33 = vadd.f32 %v2528_v36, %v2527_v3 }
 0x4cd   : > { %v2596_v8 = vadd.f32 %v2595_v37, %v2594_v47 }
 0x4ce   : > { %v2608_v25 = vsel %vm764_vm9, %v2607_v54, %v2529_v33 }
 0x4cf   : > { %v2597_v35 = vrot.slane %v2596_v8, 1 }
 0x4d1   : > { %v2598_v43 = vadd.f32 %v2597_v35, %v2596_v8 }
 0x4d3   : > { %v2609_v15 = vsel %vm753_vm8, %v2608_v25, %v2598_v43 }
 0x4d4   : > { %2610 = vst.msk [vmem:[#allocation2] sm:$0xff] %vm827_vm15, %v2609_v15 }
 0x4db   : > { %v2611_v10 = vld [vmem:[#allocation2] sm:$0xff] }
 0x4dc   : > { %v2617_v44 = vadd.f32 %v2616_v63, %v2611_v10 }
 0x4de   : > { %v2642_v50 = vmul.f32 %v2640_v28, %v2617_v44 }
 0x4e0   : > { %v2643_v17 = vpack.c.bf16 %v2642_v50, %v2642_v50 }
 0x4e2   : > { %3011 = vmatmul.msk.bf16.vlgmr.msrb.gmra.mxu3 %vm827_vm15, %v2643_v17 }
 0x565   : > { %v2688_v34 = vpop.f32.mrf.mxu3 }
 0x566   : > { %v2692_v57 = vadd.f32 %v3443_v30, %v2688_v34 }
 0x568   : > { %v2695_v51 = vsel %vm646_vm0, %v2692_v57, 0.0 }
 0x569   : > { %2696 = vadd.xlane.f32.xlu0 %v2695_v51 }
 0x56d   : > { %v2690_v32 = vpop.f32.mrf.mxu3 }
 0x5dc   : > { %v2697_v62 = vpop.xlane.xlu0 %2696 }
 0x5dd   : > { %v2698_v11 = vmul.f32 %v2697_v62, %v4997_v41 }
 0x5df   : > { %v2699_v29 = vsub.f32 %v2692_v57, %v2698_v11 }
 0x5e1   : > { %v2700_v14 = vmul.f32 %v2699_v29, %v2699_v29 }
 0x5e3   : > { %v2701_v16 = vsel %vm646_vm0, %v2700_v14, 0.0 }
 0x5e4   : > { %2702 = vadd.xlane.f32.xlu1 %v2701_v16 }
 0x657   : > { %v2703_v2 = vpop.xlane.xlu1 %2702 }
 0x658   : > { %v2704_v52 = vmul.f32 %v2703_v2, %v4997_v41 }
 0x65a   : > { %v2705_v55 = vadd.f32 1e-05, %v2704_v52 }
 0x65c   : > { %3439 = vrsqrt.f32 %v2705_v55  ;;  %vm2712_vm8 = vweird.f32 %v2705_v55 }
 0x662   : > { %v3440_v12 = vpop.eup %3439 }
 0x663   : > { %v2707_v59 = vmul.f32 %v3440_v12, %v2705_v55  ;;  %vm2713_vm5 = vweird.f32 %v3440_v12 }
 0x664   : > { %vm2714_vm9 = vmor %vm2712_vm8, %vm2713_vm5 }
 0x665   : > { %v2708_v42 = vmul.f32 %v3440_v12, %v2707_v59 }
 0x667   : > { %v2709_v24 = vmul.f32 0.5, %v2708_v42 }
 0x669   : > { %v2710_v49 = vsub.f32 1.5, %v2709_v24 }
 0x66b   : > { %v2711_v18 = vmul.f32 %v3440_v12, %v2710_v49 }
 0x66d   : > { %v2715_v4 = vsel %vm2714_vm9, %v3440_v12, %v2711_v18 }
 0x66e   : > { %v2716_v27 = vmul.f32 %v2715_v4, %v2699_v29 }
 0x670   : > { %v2720_v26 = vmul.f32 %v3275_v40, %v2716_v27 }
 0x672   : > { %v2724_v53 = vadd.f32 %v3276_v45, %v2720_v26 }
 0x674   : > { %v2725_v20 = vpack.c.bf16 %v2724_v53, %v2724_v53 }
 0x676   : > { %3020 = vmatmul.msk.bf16.vlgmr.msra.gmra.mxu0 %vm646_vm0, %v2725_v20 }
 0x6f3   : > { %v2758_v5 = vpop.f32.mrf.mxu0 }
 0x6f4   : > { %v2759_v48 = vadd.f32 %v3277_v60, %v2758_v5 }
 0x6f6   : > { %v2763_v61 = vmul.f32 0.044715, %v2759_v48  ;;  %v2762_v56 = vmul.f32 0.5, %v2759_v48 }
 0x6f8   : > { %v2764_v22 = vmul.f32 %v2763_v61, %v2759_v48 }
 0x6fa   : > { %v2765_v9 = vmul.f32 %v2764_v22, %v2759_v48 }
 0x6fb   : > { %v2760_v21 = vpop.f32.mrf.mxu0 }
 0x6fc   : > { %v2766_v1 = vadd.f32 %v2765_v9, %v2759_v48 }
 0x6fe   : > { %v2767_v23 = vmul.f32 0.7978846, %v2766_v1 }
 0x700   : > { %3441 = vtanh.f32 %v2767_v23 }
 0x706   : > { %v3442_v0 = vpop.eup %3441 }
 0x707   : > { %v2769_v38 = vadd.f32 1.0, %v3442_v0 }
 0x709   : > { %v2770_v7 = vmul.f32 %v2769_v38, %v2762_v56 }
 0x70b   : > { %v2771_v58 = vpack.c.bf16 %v2770_v7, %v2770_v7 }
 0x70d   : > { %3029 = vmatmul.msk.bf16.vlgmr.msrb.gmra.mxu1 %vm646_vm0, %v2771_v58 }
 0x78a   : > { %v2804_v3 = vpop.f32.mrf.mxu1 }
 0x78b   : > { %v2805_v54 = vadd.f32 %v3278_v31, %v2804_v3 }
 0x78d   : > { %2808 = vst.msk [vmem:[%s637_s29] sm:$0xff] %vm646_vm0, %v2805_v54 }
 0x78e   : > { %3561 = shalt.err (!%p3558_p8)
}
 0x78f   : > { %3070 = dma.vmem_to_hbm [thread:$0]  (%p3757_p5), %s2823_s23, 128, %s2825_s5, %s2810_s1  }
 0x792   : > { %v2806_v47 = vpop.f32.mrf.mxu1 }
 0x793 PF: > { %s4999_s0 = sld [smem:[#allocation17_spill]] }
 0x794   : > { %s5000_s22 = sld [smem:[#allocation15_spill]] }
 0x799   : > { %p3092_p9 = scmp.ge.s32.totalorder %s4999_s0, 2 }
 0x79a   : > { %s2836_s28 = sand.u32 1, %s5000_s22  }
 0x79b   : > { %p3083_p10 = pnand %p3092_p9, %p3761_p6  ;;  %s2837_s29 = scalar_lea.sflag [#allocation7], %s2836_s28 }
 0x79d   : > { %p3084_p11 = pneg %p3083_p10 }
 0x79f   : > { %3587 = dma.done.wait (%p3084_p11), %s2837_s29, 128  }
 0x7a0   : > { %3589 = vsyncadd (%p3084_p11), %s2837_s29, 4294967168  ;;  %s5002_s21 = sld [smem:[#allocation18_spill]]  ;;  %s5005_s0 = smov %s3596_s30 }
 0x7a1   : > { %s5003_s4 = sld [smem:[#allocation16_spill]] }
 0x7a2   : > { %s5004_s20 = sld [smem:[#allocation19_spill]] }
 0x7a6   : > { %p31_p12 = scmp.ge.s32.totalorder %s5002_s21, 4  }
 0x7a7   : > { %s5006_s30 = smov %s5003_s4 }
 0x7a8   :  { %33 = sbr.rel (!%p31_p12) target bundleno = 13 (0xd), region = 158 }
 0x7ad   :  { %2843 = vsyncpa [#allocation6], 1 }
 0x7ae   :  { %2845 = vsyncpa [#allocation6 + $0x1], 1 }
 0x7af   :  { %2846 = vsyncpa [#allocation9], 1 }
 0x7b0   :  { %2847 = vsyncpa [#allocation7], 1 }
 0x7b1   :  { %2849 = vsyncpa [#allocation7 + $0x1], 1 }

</bundles_post_ra>
